<compile_context>
chip_gen: v7x
topology: tpu7x:2x2x1
jax: 0.10.0
libtpu: 0.0.40
codegen_flags: <defaults>
</compile_context>

<pallas_src>
import math
import functools
import numpy as np

import jax
import jax.numpy as jnp
from jax.experimental import pallas as pl
from jax.experimental.pallas import tpu as pltpu


# ----------------------------------------------------------------------------
# Parameter construction (mirrors CascadeGaussianSmoothing.__init__, numpy glue)
# ----------------------------------------------------------------------------
def build_gaussian_kernels(kernel_size, sigma):
    if isinstance(kernel_size, (int, float)):
        kernel_size = [int(kernel_size), int(kernel_size)]
    cascade_coefficients = [0.5, 1.0, 2.0]
    sigmas = [[c * sigma, c * sigma] for c in cascade_coefficients]
    pad = int(kernel_size[0] / 2)

    grids = np.meshgrid(
        np.arange(kernel_size[0], dtype=np.float32),
        np.arange(kernel_size[1], dtype=np.float32),
        indexing="ij",
    )
    kernels = []
    for sig in sigmas:
        kern = np.ones_like(grids[0])
        for size_1d, std_1d, grid in zip(kernel_size, sig, grids):
            mean = (size_1d - 1) / 2
            kern = kern * (
                1.0 / (std_1d * math.sqrt(2 * math.pi))
                * np.exp(-(((grid - mean) / std_1d) ** 2) / 2)
            )
        kern = kern / kern.sum()
        kernels.append(kern.astype(np.float32))
    return np.stack(kernels, axis=0), pad  # (3, kH, kW), pad


# ----------------------------------------------------------------------------
# Pallas kernel: single pre-summed Gaussian stencil on a batch-last tile
# ----------------------------------------------------------------------------
def _smooth_kernel(x_ref, o_ref, *, H, W, kH, kW, taps):
    # x_ref: VMEM (Hp, Wp, B)  reflect-padded tile, batch-last (lanes = B)
    # o_ref: VMEM (H,  W,  B)
    # taps : nested tuple of python floats (compile-time constants), already
    #        summed over the 3 cascades and divided by 3.
    acc = jnp.zeros(o_ref.shape, jnp.float32)
    for dy in range(kH):                     # unrolled stencil taps
        for dx in range(kW):
            w = taps[dy][dx]                 # constant -> folded into the vmul
            acc = acc + w * x_ref[dy:dy + H, dx:dx + W, :].astype(jnp.float32)
    o_ref[...] = acc.astype(o_ref.dtype)     # single down-cast on store


def cascade_gaussian_smoothing(x, kernel_size=5, sigma=1.0):
    weights, pad = build_gaussian_kernels(kernel_size, sigma)
    kH, kW = int(weights.shape[1]), int(weights.shape[2])
    assert kH == kW and kH % 2 == 1, "square odd kernel_size required"

    N, C, H, W = x.shape
    assert C == 3, "module repeats the kernel 3x -> expects 3 input channels"
    assert pad < H and pad < W, "reflect padding needs pad < H and pad < W"

    # Pre-sum the 3 cascade kernels and fold in the final /3 (exact).
    w_sum = (weights[0] + weights[1] + weights[2]) / 3.0
    taps = tuple(tuple(float(v) for v in row) for row in w_sum)

    # Batch-last, lane-dense layout: (N, C, H, W) -> (H, W, N*C).
    # Reflect pad fuses with this transpose into one XLA data-movement pass.
    NC = N * C
    x_t = jnp.transpose(x.reshape(NC, H, W), (1, 2, 0))              # (H, W, NC)
    xp = jnp.pad(x_t, ((pad, pad), (pad, pad), (0, 0)), mode="reflect")
    Hp, Wp = H + 2 * pad, W + 2 * pad

    # Flattened single grid axis over lane-blocks of the batch*channel dim.
    B = NC if NC <= 128 else 128             # lane-dense block (full or 128-mult)
    grid = (pl.cdiv(NC, B),)

    kernel = functools.partial(_smooth_kernel, H=H, W=W, kH=kH, kW=kW, taps=taps)

    out_t = pl.pallas_call(
        kernel,
        out_shape=jax.ShapeDtypeStruct((H, W, NC), x.dtype),
        grid=grid,
        in_specs=[pl.BlockSpec((Hp, Wp, B), lambda i: (0, 0, i))],
        out_specs=pl.BlockSpec((H, W, B), lambda i: (0, 0, i)),
        compiler_params=pltpu.CompilerParams(
            dimension_semantics=("parallel",)
        ),
    )(xp)

    # Back to NCHW.
    return jnp.transpose(out_t, (2, 0, 1)).reshape(N, C, H, W)


# ----------------------------------------------------------------------------
# Pure-JAX reference (for correctness check)
# ----------------------------------------------------------------------------
def ref_forward(x, kernel_size=5, sigma=1.0):
    weights, pad = build_gaussian_kernels(kernel_size, sigma)
    kH, kW = weights.shape[1], weights.shape[2]
    C = x.shape[1]
    xp = jnp.pad(x, ((0, 0), (0, 0), (pad, pad), (pad, pad)), mode="reflect")
    outs = []
    for i in range(3):
        w = jnp.broadcast_to(jnp.asarray(weights[i])[None, None], (C, 1, kH, kW))
        o = jax.lax.conv_general_dilated(
            xp, w, window_strides=(1, 1), padding="VALID",
            dimension_numbers=("NCHW", "OIHW", "NCHW"),
            feature_group_count=C,
        )
        outs.append(o)
    return (outs[0] + outs[1] + outs[2]) / 3.0


if __name__ == "__main__":
    key = jax.random.PRNGKey(0)
    x = jax.random.normal(key, (2, 3, 16, 16), dtype=jnp.float32)

    out = cascade_gaussian_smoothing(x, kernel_size=5, sigma=1.0)
    out = jax.block_until_ready(out)

    ref = jax.block_until_ready(ref_forward(x, kernel_size=5, sigma=1.0))
    assert out.shape == ref.shape == (2, 3, 16, 16)
    np.testing.assert_allclose(np.asarray(out), np.asarray(ref),
                               rtol=1e-5, atol=1e-5)

    print("KERNEL_OK")
</pallas_src>

<mosaic_0001>
module attributes {stable_mosaic.version = 11 : i64} {
  func.func @_smooth_kernel(%arg0: i32, %arg1: memref<20x20x6xf32, #tpu.memory_space<vmem>>, %arg2: memref<16x16x6xf32, #tpu.memory_space<vmem>>) attributes {dimension_semantics = [#tpu.dimension_semantics<parallel>], iteration_bounds = array<i64: 1>, scalar_prefetch = 0 : i64, scratch_operands = 0 : i64, tpu.core_type = #tpu.core_type<tc>, window_params = [{transform_indices = @transform_0, window_bounds = array<i64: 20, 20, 6>}, {transform_indices = @transform_1, window_bounds = array<i64: 16, 16, 6>}]} {
    %cst = arith.constant 0.000000e+00 : f32
    %0 = vector.broadcast %cst : f32 to vector<16x16x6xf32>
    %c0 = arith.constant 0 : index
    %c0_0 = arith.constant 0 : index
    %c0_1 = arith.constant 0 : index
    %1 = vector.load %arg1[%c0, %c0_0, %c0_1] : memref<20x20x6xf32, #tpu.memory_space<vmem>>, vector<16x16x6xf32>
    %cst_2 = arith.constant 0.00873864255 : f32
    %2 = vector.broadcast %cst_2 : f32 to vector<16x16x6xf32>
    %3 = arith.mulf %2, %1 : vector<16x16x6xf32>
    %4 = arith.addf %0, %3 : vector<16x16x6xf32>
    %c0_3 = arith.constant 0 : index
    %c1 = arith.constant 1 : index
    %c0_4 = arith.constant 0 : index
    %5 = vector.load %arg1[%c0_3, %c1, %c0_4] : memref<20x20x6xf32, #tpu.memory_space<vmem>>, vector<16x16x6xf32>
    %cst_5 = arith.constant 0.0157194156 : f32
    %6 = vector.broadcast %cst_5 : f32 to vector<16x16x6xf32>
    %7 = arith.mulf %6, %5 : vector<16x16x6xf32>
    %8 = arith.addf %4, %7 : vector<16x16x6xf32>
    %c0_6 = arith.constant 0 : index
    %c2 = arith.constant 2 : index
    %c0_7 = arith.constant 0 : index
    %9 = vector.load %arg1[%c0_6, %c2, %c0_7] : memref<20x20x6xf32, #tpu.memory_space<vmem>>, vector<16x16x6xf32>
    %cst_8 = arith.constant 0.0201577786 : f32
    %10 = vector.broadcast %cst_8 : f32 to vector<16x16x6xf32>
    %11 = arith.mulf %10, %9 : vector<16x16x6xf32>
    %12 = arith.addf %8, %11 : vector<16x16x6xf32>
    %c0_9 = arith.constant 0 : index
    %c3 = arith.constant 3 : index
    %c0_10 = arith.constant 0 : index
    %13 = vector.load %arg1[%c0_9, %c3, %c0_10] : memref<20x20x6xf32, #tpu.memory_space<vmem>>, vector<16x16x6xf32>
    %cst_11 = arith.constant 0.0157194156 : f32
    %14 = vector.broadcast %cst_11 : f32 to vector<16x16x6xf32>
    %15 = arith.mulf %14, %13 : vector<16x16x6xf32>
    %16 = arith.addf %12, %15 : vector<16x16x6xf32>
    %c0_12 = arith.constant 0 : index
    %c4 = arith.constant 4 : index
    %c0_13 = arith.constant 0 : index
    %17 = vector.load %arg1[%c0_12, %c4, %c0_13] : memref<20x20x6xf32, #tpu.memory_space<vmem>>, vector<16x16x6xf32>
    %cst_14 = arith.constant 0.00873864255 : f32
    %18 = vector.broadcast %cst_14 : f32 to vector<16x16x6xf32>
    %19 = arith.mulf %18, %17 : vector<16x16x6xf32>
    %20 = arith.addf %16, %19 : vector<16x16x6xf32>
    %c1_15 = arith.constant 1 : index
    %c0_16 = arith.constant 0 : index
    %c0_17 = arith.constant 0 : index
    %21 = vector.load %arg1[%c1_15, %c0_16, %c0_17] : memref<20x20x6xf32, #tpu.memory_space<vmem>>, vector<16x16x6xf32>
    %cst_18 = arith.constant 0.0157194156 : f32
    %22 = vector.broadcast %cst_18 : f32 to vector<16x16x6xf32>
    %23 = arith.mulf %22, %21 : vector<16x16x6xf32>
    %24 = arith.addf %20, %23 : vector<16x16x6xf32>
    %c1_19 = arith.constant 1 : index
    %c1_20 = arith.constant 1 : index
    %c0_21 = arith.constant 0 : index
    %25 = vector.load %arg1[%c1_19, %c1_20, %c0_21] : memref<20x20x6xf32, #tpu.memory_space<vmem>>, vector<16x16x6xf32>
    %cst_22 = arith.constant 0.0400598757 : f32
    %26 = vector.broadcast %cst_22 : f32 to vector<16x16x6xf32>
    %27 = arith.mulf %26, %25 : vector<16x16x6xf32>
    %28 = arith.addf %24, %27 : vector<16x16x6xf32>
    %c1_23 = arith.constant 1 : index
    %c2_24 = arith.constant 2 : index
    %c0_25 = arith.constant 0 : index
    %29 = vector.load %arg1[%c1_23, %c2_24, %c0_25] : memref<20x20x6xf32, #tpu.memory_space<vmem>>, vector<16x16x6xf32>
    %cst_26 = arith.constant 0.0792725533 : f32
    %30 = vector.broadcast %cst_26 : f32 to vector<16x16x6xf32>
    %31 = arith.mulf %30, %29 : vector<16x16x6xf32>
    %32 = arith.addf %28, %31 : vector<16x16x6xf32>
    %c1_27 = arith.constant 1 : index
    %c3_28 = arith.constant 3 : index
    %c0_29 = arith.constant 0 : index
    %33 = vector.load %arg1[%c1_27, %c3_28, %c0_29] : memref<20x20x6xf32, #tpu.memory_space<vmem>>, vector<16x16x6xf32>
    %cst_30 = arith.constant 0.0400598757 : f32
    %34 = vector.broadcast %cst_30 : f32 to vector<16x16x6xf32>
    %35 = arith.mulf %34, %33 : vector<16x16x6xf32>
    %36 = arith.addf %32, %35 : vector<16x16x6xf32>
    %c1_31 = arith.constant 1 : index
    %c4_32 = arith.constant 4 : index
    %c0_33 = arith.constant 0 : index
    %37 = vector.load %arg1[%c1_31, %c4_32, %c0_33] : memref<20x20x6xf32, #tpu.memory_space<vmem>>, vector<16x16x6xf32>
    %cst_34 = arith.constant 0.0157194156 : f32
    %38 = vector.broadcast %cst_34 : f32 to vector<16x16x6xf32>
    %39 = arith.mulf %38, %37 : vector<16x16x6xf32>
    %40 = arith.addf %36, %39 : vector<16x16x6xf32>
    %c2_35 = arith.constant 2 : index
    %c0_36 = arith.constant 0 : index
    %c0_37 = arith.constant 0 : index
    %41 = vector.load %arg1[%c2_35, %c0_36, %c0_37] : memref<20x20x6xf32, #tpu.memory_space<vmem>>, vector<16x16x6xf32>
    %cst_38 = arith.constant 0.0201577786 : f32
    %42 = vector.broadcast %cst_38 : f32 to vector<16x16x6xf32>
    %43 = arith.mulf %42, %41 : vector<16x16x6xf32>
    %44 = arith.addf %40, %43 : vector<16x16x6xf32>
    %c2_39 = arith.constant 2 : index
    %c1_40 = arith.constant 1 : index
    %c0_41 = arith.constant 0 : index
    %45 = vector.load %arg1[%c2_39, %c1_40, %c0_41] : memref<20x20x6xf32, #tpu.memory_space<vmem>>, vector<16x16x6xf32>
    %cst_42 = arith.constant 0.0792725533 : f32
    %46 = vector.broadcast %cst_42 : f32 to vector<16x16x6xf32>
    %47 = arith.mulf %46, %45 : vector<16x16x6xf32>
    %48 = arith.addf %44, %47 : vector<16x16x6xf32>
    %c2_43 = arith.constant 2 : index
    %c2_44 = arith.constant 2 : index
    %c0_45 = arith.constant 0 : index
    %49 = vector.load %arg1[%c2_43, %c2_44, %c0_45] : memref<20x20x6xf32, #tpu.memory_space<vmem>>, vector<16x16x6xf32>
    %cst_46 = arith.constant 0.281329274 : f32
    %50 = vector.broadcast %cst_46 : f32 to vector<16x16x6xf32>
    %51 = arith.mulf %50, %49 : vector<16x16x6xf32>
    %52 = arith.addf %48, %51 : vector<16x16x6xf32>
    %c2_47 = arith.constant 2 : index
    %c3_48 = arith.constant 3 : index
    %c0_49 = arith.constant 0 : index
    %53 = vector.load %arg1[%c2_47, %c3_48, %c0_49] : memref<20x20x6xf32, #tpu.memory_space<vmem>>, vector<16x16x6xf32>
    %cst_50 = arith.constant 0.0792725533 : f32
    %54 = vector.broadcast %cst_50 : f32 to vector<16x16x6xf32>
    %55 = arith.mulf %54, %53 : vector<16x16x6xf32>
    %56 = arith.addf %52, %55 : vector<16x16x6xf32>
    %c2_51 = arith.constant 2 : index
    %c4_52 = arith.constant 4 : index
    %c0_53 = arith.constant 0 : index
    %57 = vector.load %arg1[%c2_51, %c4_52, %c0_53] : memref<20x20x6xf32, #tpu.memory_space<vmem>>, vector<16x16x6xf32>
    %cst_54 = arith.constant 0.0201577786 : f32
    %58 = vector.broadcast %cst_54 : f32 to vector<16x16x6xf32>
    %59 = arith.mulf %58, %57 : vector<16x16x6xf32>
    %60 = arith.addf %56, %59 : vector<16x16x6xf32>
    %c3_55 = arith.constant 3 : index
    %c0_56 = arith.constant 0 : index
    %c0_57 = arith.constant 0 : index
    %61 = vector.load %arg1[%c3_55, %c0_56, %c0_57] : memref<20x20x6xf32, #tpu.memory_space<vmem>>, vector<16x16x6xf32>
    %cst_58 = arith.constant 0.0157194156 : f32
    %62 = vector.broadcast %cst_58 : f32 to vector<16x16x6xf32>
    %63 = arith.mulf %62, %61 : vector<16x16x6xf32>
    %64 = arith.addf %60, %63 : vector<16x16x6xf32>
    %c3_59 = arith.constant 3 : index
    %c1_60 = arith.constant 1 : index
    %c0_61 = arith.constant 0 : index
    %65 = vector.load %arg1[%c3_59, %c1_60, %c0_61] : memref<20x20x6xf32, #tpu.memory_space<vmem>>, vector<16x16x6xf32>
    %cst_62 = arith.constant 0.0400598757 : f32
    %66 = vector.broadcast %cst_62 : f32 to vector<16x16x6xf32>
    %67 = arith.mulf %66, %65 : vector<16x16x6xf32>
    %68 = arith.addf %64, %67 : vector<16x16x6xf32>
    %c3_63 = arith.constant 3 : index
    %c2_64 = arith.constant 2 : index
    %c0_65 = arith.constant 0 : index
    %69 = vector.load %arg1[%c3_63, %c2_64, %c0_65] : memref<20x20x6xf32, #tpu.memory_space<vmem>>, vector<16x16x6xf32>
    %cst_66 = arith.constant 0.0792725533 : f32
    %70 = vector.broadcast %cst_66 : f32 to vector<16x16x6xf32>
    %71 = arith.mulf %70, %69 : vector<16x16x6xf32>
    %72 = arith.addf %68, %71 : vector<16x16x6xf32>
    %c3_67 = arith.constant 3 : index
    %c3_68 = arith.constant 3 : index
    %c0_69 = arith.constant 0 : index
    %73 = vector.load %arg1[%c3_67, %c3_68, %c0_69] : memref<20x20x6xf32, #tpu.memory_space<vmem>>, vector<16x16x6xf32>
    %cst_70 = arith.constant 0.0400598757 : f32
    %74 = vector.broadcast %cst_70 : f32 to vector<16x16x6xf32>
    %75 = arith.mulf %74, %73 : vector<16x16x6xf32>
    %76 = arith.addf %72, %75 : vector<16x16x6xf32>
    %c3_71 = arith.constant 3 : index
    %c4_72 = arith.constant 4 : index
    %c0_73 = arith.constant 0 : index
    %77 = vector.load %arg1[%c3_71, %c4_72, %c0_73] : memref<20x20x6xf32, #tpu.memory_space<vmem>>, vector<16x16x6xf32>
    %cst_74 = arith.constant 0.0157194156 : f32
    %78 = vector.broadcast %cst_74 : f32 to vector<16x16x6xf32>
    %79 = arith.mulf %78, %77 : vector<16x16x6xf32>
    %80 = arith.addf %76, %79 : vector<16x16x6xf32>
    %c4_75 = arith.constant 4 : index
    %c0_76 = arith.constant 0 : index
    %c0_77 = arith.constant 0 : index
    %81 = vector.load %arg1[%c4_75, %c0_76, %c0_77] : memref<20x20x6xf32, #tpu.memory_space<vmem>>, vector<16x16x6xf32>
    %cst_78 = arith.constant 0.00873864255 : f32
    %82 = vector.broadcast %cst_78 : f32 to vector<16x16x6xf32>
    %83 = arith.mulf %82, %81 : vector<16x16x6xf32>
    %84 = arith.addf %80, %83 : vector<16x16x6xf32>
    %c4_79 = arith.constant 4 : index
    %c1_80 = arith.constant 1 : index
    %c0_81 = arith.constant 0 : index
    %85 = vector.load %arg1[%c4_79, %c1_80, %c0_81] : memref<20x20x6xf32, #tpu.memory_space<vmem>>, vector<16x16x6xf32>
    %cst_82 = arith.constant 0.0157194156 : f32
    %86 = vector.broadcast %cst_82 : f32 to vector<16x16x6xf32>
    %87 = arith.mulf %86, %85 : vector<16x16x6xf32>
    %88 = arith.addf %84, %87 : vector<16x16x6xf32>
    %c4_83 = arith.constant 4 : index
    %c2_84 = arith.constant 2 : index
    %c0_85 = arith.constant 0 : index
    %89 = vector.load %arg1[%c4_83, %c2_84, %c0_85] : memref<20x20x6xf32, #tpu.memory_space<vmem>>, vector<16x16x6xf32>
    %cst_86 = arith.constant 0.0201577786 : f32
    %90 = vector.broadcast %cst_86 : f32 to vector<16x16x6xf32>
    %91 = arith.mulf %90, %89 : vector<16x16x6xf32>
    %92 = arith.addf %88, %91 : vector<16x16x6xf32>
    %c4_87 = arith.constant 4 : index
    %c3_88 = arith.constant 3 : index
    %c0_89 = arith.constant 0 : index
    %93 = vector.load %arg1[%c4_87, %c3_88, %c0_89] : memref<20x20x6xf32, #tpu.memory_space<vmem>>, vector<16x16x6xf32>
    %cst_90 = arith.constant 0.0157194156 : f32
    %94 = vector.broadcast %cst_90 : f32 to vector<16x16x6xf32>
    %95 = arith.mulf %94, %93 : vector<16x16x6xf32>
    %96 = arith.addf %92, %95 : vector<16x16x6xf32>
    %c4_91 = arith.constant 4 : index
    %c4_92 = arith.constant 4 : index
    %c0_93 = arith.constant 0 : index
    %97 = vector.load %arg1[%c4_91, %c4_92, %c0_93] : memref<20x20x6xf32, #tpu.memory_space<vmem>>, vector<16x16x6xf32>
    %cst_94 = arith.constant 0.00873864255 : f32
    %98 = vector.broadcast %cst_94 : f32 to vector<16x16x6xf32>
    %99 = arith.mulf %98, %97 : vector<16x16x6xf32>
    %100 = arith.addf %96, %99 : vector<16x16x6xf32>
    %c0_95 = arith.constant 0 : index
    %c0_96 = arith.constant 0 : index
    %c0_97 = arith.constant 0 : index
    %101 = vector.load %arg2[%c0_95, %c0_96, %c0_97] : memref<16x16x6xf32, #tpu.memory_space<vmem>>, vector<16x16x6xf32>
    tpu.vector_store %arg2[%c0_95, %c0_96, %c0_97], %100 {strides = array<i32>} : memref<16x16x6xf32, #tpu.memory_space<vmem>>, vector<16x16x6xf32>,
    return
  }
  func.func @transform_0(%arg0: i32) -> (i32, i32, i32) {
    %c0_i32 = arith.constant 0 : i32
    %c0_i32_0 = arith.constant 0 : i32
    %c0_i32_1 = arith.constant 0 : i32
    return %c0_i32, %c0_i32_0, %arg0 : i32, i32, i32
  }
  func.func @transform_1(%arg0: i32) -> (i32, i32, i32) {
    %c0_i32 = arith.constant 0 : i32
    %c0_i32_0 = arith.constant 0 : i32
    %c0_i32_1 = arith.constant 0 : i32
    return %c0_i32, %c0_i32_0, %arg0 : i32, i32, i32
  }
}

</mosaic_0001>

<bundles_post_ra>
// kernel: tpu_custom_call.1
= control target key start
LH: loop header
LB: loop body
LE: loop exit
PB: predicated region body
PF: predicated region fallthrough
CT: control target
= control target key end

     0   :  { %vm2412_vm0 = vcmask 48128   ;;  %s8221_s0 = inlined_call_operand.vmem [shape: f32[20,20,6], index: 0, kind: input, shape index: {}]   ;;  %s8222_s1 = inlined_call_operand.vmem [shape: f32[16,16,6], index: 1, kind: output, shape index: {}]  }
   0x1   :  { %v8_v0 = vld [vmem:[%s8221_s0] sm:$0xff]  ;;  %v9_v1 = vld [vmem:[%s8221_s0 + $0x8] sm:$0xff]  ;;  %v3108_v2 = vld [vmem:[%s8221_s0 + $0x18] sm:$0xff] }
   0x2   :  { %v3113_v3 = vld [vmem:[%s8221_s0 + $0x20] sm:$0xff]  ;;  %v3118_v4 = vld [vmem:[%s8221_s0 + $0x30] sm:$0xff]  ;;  %v3123_v5 = vld [vmem:[%s8221_s0 + $0x38] sm:$0xff]  ;;  %v3125_v6 = vmul.f32 0.008738643, %v8_v0 }
   0x3   :  { %8542 = vst [vmem:[#allocation2_spill] sm:$0xff] %v3113_v3  ;;  %8543 = vst [vmem:[#allocation3_spill] sm:$0xff] %v3118_v4  ;;  %v3130_v7 = vld [vmem:[%s8221_s0 + $0x48] sm:$0xff]  ;;  %v3135_v8 = vld [vmem:[%s8221_s0 + $0x50] sm:$0xff]  ;;  %v3142_v10 = vmul.f32 0.008738643, %v9_v1 }
   0x4   :  { %8544 = vst [vmem:[#allocation4_spill] sm:$0xff] %v3123_v5  ;;  %8545 = vst [vmem:[#allocation5_spill] sm:$0xff] %v3130_v7  ;;  %v3140_v9 = vld [vmem:[%s8221_s0 + $0x60] sm:$0xff]  ;;  %v3147_v11 = vld [vmem:[%s8221_s0 + $0x68] sm:$0xff]  ;;  %v3160_v14 = vmul.f32 0.008738643, %v3108_v2 }
   0x5   :  { %8546 = vst [vmem:[#allocation6_spill] sm:$0xff] %v3135_v8  ;;  %8547 = vst [vmem:[#allocation7_spill] sm:$0xff] %v3140_v9  ;;  %v3152_v12 = vld [vmem:[%s8221_s0 + $0x78] sm:$0xff]  ;;  %v3157_v13 = vld [vmem:[%s8221_s0 + $0x80] sm:$0xff]  ;;  %v3178_v18 = vmul.f32 0.008738643, %v3113_v3 }
   0x6   :  { %8548 = vst [vmem:[#allocation8_spill] sm:$0xff] %v3147_v11  ;;  %8549 = vst [vmem:[#allocation9_spill] sm:$0xff] %v3152_v12  ;;  %v3165_v15 = vld [vmem:[%s8221_s0 + $0x90] sm:$0xff]  ;;  %v3170_v16 = vld [vmem:[%s8221_s0 + $0x98] sm:$0xff]  ;;  %v3196_v22 = vmul.f32 0.008738643, %v3118_v4 }
   0x7   :  { %8550 = vst [vmem:[#allocation10_spill] sm:$0xff] %v3157_v13  ;;  %8551 = vst [vmem:[#allocation11_spill] sm:$0xff] %v3165_v15  ;;  %v3175_v17 = vld [vmem:[%s8221_s0 + $0xa8] sm:$0xff]  ;;  %v3183_v19 = vld [vmem:[%s8221_s0 + $0xb0] sm:$0xff]  ;;  %v3214_v26 = vmul.f32 0.008738643, %v3123_v5 }
   0x8   :  { %8552 = vst [vmem:[#allocation12_spill] sm:$0xff] %v3170_v16  ;;  %8553 = vst [vmem:[#allocation13_spill] sm:$0xff] %v3175_v17  ;;  %v3188_v20 = vld [vmem:[%s8221_s0 + $0xc0] sm:$0xff]  ;;  %v3193_v21 = vld [vmem:[%s8221_s0 + $0xc8] sm:$0xff]  ;;  %v3232_v30 = vmul.f32 0.008738643, %v3130_v7 }
   0x9   :  { %8554 = vst [vmem:[#allocation14_spill] sm:$0xff] %v3183_v19  ;;  %8555 = vst [vmem:[#allocation15_spill] sm:$0xff] %v3188_v20  ;;  %v3201_v23 = vld [vmem:[%s8221_s0 + $0xd8] sm:$0xff]  ;;  %v3206_v24 = vld [vmem:[%s8221_s0 + $0xe0] sm:$0xff]  ;;  %v3235_v31 = vmul.f32 0.008738643, %v3135_v8 }
   0xa   :  { %8556 = vst [vmem:[#allocation16_spill] sm:$0xff] %v3193_v21  ;;  %8557 = vst [vmem:[#allocation17_spill] sm:$0xff] %v3201_v23  ;;  %v3211_v25 = vld [vmem:[%s8221_s0 + $0xf0] sm:$0xff]  ;;  %v3219_v27 = vld [vmem:[%s8221_s0 + $0xf8] sm:$0xff]  ;;  %v3238_v32 = vmul.f32 0.008738643, %v3140_v9 }
   0xb   :  { %8558 = vst [vmem:[#allocation18_spill] sm:$0xff] %v3206_v24  ;;  %8559 = vst [vmem:[#allocation19_spill] sm:$0xff] %v3211_v25  ;;  %v3224_v28 = vld [vmem:[%s8221_s0 + $0x108] sm:$0xff]  ;;  %v3229_v29 = vld [vmem:[%s8221_s0 + $0x110] sm:$0xff]  ;;  %v3256_v36 = vmul.f32 0.008738643, %v3147_v11 }
   0xc   :  { %8560 = vst [vmem:[#allocation20_spill] sm:$0xff] %v3219_v27  ;;  %8561 = vst [vmem:[#allocation21_spill] sm:$0xff] %v3224_v28  ;;  %v3243_v33 = vld [vmem:[%s8221_s0 + $0x120] sm:$0xff]  ;;  %v3248_v34 = vld [vmem:[%s8221_s0 + $0x128] sm:$0xff]  ;;  %v3259_v37 = vmul.f32 0.008738643, %v3152_v12 }
   0xd   :  { %8562 = vst [vmem:[#allocation22_spill] sm:$0xff] %v3229_v29  ;;  %8563 = vst [vmem:[#allocation23_spill] sm:$0xff] %v3243_v33  ;;  %v3253_v35 = vld [vmem:[%s8221_s0 + $0x138] sm:$0xff]  ;;  %v3262_v38 = vmul.f32 0.008738643, %v3157_v13  ;;  %v3267_v39 = vld [vmem:[%s8221_s0 + $0x140] sm:$0xff] }
   0xe   :  { %8564 = vst [vmem:[#allocation24_spill] sm:$0xff] %v3248_v34  ;;  %8565 = vst [vmem:[#allocation25_spill] sm:$0xff] %v3253_v35  ;;  %v3272_v40 = vld [vmem:[%s8221_s0 + $0x150] sm:$0xff]  ;;  %v3275_v41 = vmul.f32 0.008738643, %v3165_v15  ;;  %v3286_v44 = vld [vmem:[%s8221_s0 + $0x158] sm:$0xff] }
   0xf   :  { %8566 = vst [vmem:[#allocation26_spill] sm:$0xff] %v3267_v39  ;;  %8567 = vst [vmem:[#allocation27_spill] sm:$0xff] %v3272_v40  ;;  %v3278_v42 = vmul.f32 0.008738643, %v3170_v16  ;;  %v3281_v43 = vmul.f32 0.008738643, %v3175_v17 }
  0x10   :  { %8568 = vst [vmem:[#allocation28_spill] sm:$0xff] %v3286_v44  ;;  %v3291_v45 = vld [vmem:[%s8221_s0 + $0x168] sm:$0xff]  ;;  %v3294_v46 = vmul.f32 0.008738643, %v3183_v19  ;;  %v3297_v47 = vmul.f32 0.008738643, %v3188_v20 }
  0x11   :  { %8569 = vst [vmem:[#allocation29_spill] sm:$0xff] %v3291_v45  ;;  %v3300_v48 = vmul.f32 0.008738643, %v3193_v21  ;;  %v3305_v49 = vld [vmem:[%s8221_s0 + $0x170] sm:$0xff]  ;;  %v3308_v50 = vmul.f32 0.008738643, %v3201_v23 }
  0x12   :  { %8570 = vst [vmem:[#allocation30_spill] sm:$0xff] %v3305_v49  ;;  %v3311_v51 = vmul.f32 0.008738643, %v3206_v24  ;;  %v3314_v52 = vmul.f32 0.008738643, %v3211_v25  ;;  %v104_v61 = vld [vmem:[%s8221_s0 + $0x1] sm:$0xff] }
  0x13   :  { %v3317_v53 = vmul.f32 0.008738643, %v3219_v27  ;;  %v3320_v54 = vmul.f32 0.008738643, %v3224_v28  ;;  %v3323_v55 = vmul.f32 0.008738643, %v3229_v29 }
  0x14   :  { %v3326_v56 = vmul.f32 0.008738643, %v3243_v33  ;;  %v3329_v57 = vmul.f32 0.008738643, %v3248_v34  ;;  %v3332_v58 = vmul.f32 0.008738643, %v3253_v35 }
  0x15   :  { %v3335_v59 = vmul.f32 0.008738643, %v3267_v39  ;;  %v3338_v60 = vmul.f32 0.008738643, %v3272_v40  ;;  %v3344_v62 = vmul.f32 0.008738643, %v3286_v44 }
  0x16   :  { %v3347_v63 = vmul.f32 0.008738643, %v3291_v45  ;;  %v105_v0 = vld [vmem:[%s8221_s0 + $0x9] sm:$0xff]  ;;  %v3355_v1 = vld [vmem:[%s8221_s0 + $0x19] sm:$0xff]  ;;  %v3358_v40 = vmul.f32 0.008738643, %v3305_v49 }
  0x17   :  { %8571 = vst [vmem:[#allocation31_spill] sm:$0xff] %v3355_v1  ;;  %v3363_v44 = vld [vmem:[%s8221_s0 + $0x21] sm:$0xff]  ;;  %v3368_v45 = vld [vmem:[%s8221_s0 + $0x31] sm:$0xff]  ;;  %v3373_v39 = vld [vmem:[%s8221_s0 + $0x39] sm:$0xff]  ;;  %v136_v34 = vmul.f32 0.015719416, %v104_v61 }
  0x18   :  { %8572 = vst [vmem:[#allocation32_spill] sm:$0xff] %v3363_v44  ;;  %8573 = vst [vmem:[#allocation33_spill] sm:$0xff] %v3368_v45  ;;  %v3378_v49 = vld [vmem:[%s8221_s0 + $0x49] sm:$0xff]  ;;  %v3383_v35 = vld [vmem:[%s8221_s0 + $0x51] sm:$0xff]  ;;  %v3386_v33 = vmul.f32 0.015719416, %v3108_v2 }
  0x19   :  { %8574 = vst [vmem:[#allocation34_spill] sm:$0xff] %v3373_v39  ;;  %8575 = vst [vmem:[#allocation35_spill] sm:$0xff] %v3378_v49  ;;  %v3391_v29 = vld [vmem:[%s8221_s0 + $0x61] sm:$0xff]  ;;  %v3396_v28 = vld [vmem:[%s8221_s0 + $0x69] sm:$0xff]  ;;  %v137_v27 = vmul.f32 0.015719416, %v105_v0  ;;  %v3466_v11 = vadd.f32 %v136_v34, %v3125_v6 }
  0x1a   :  { %8576 = vst [vmem:[#allocation36_spill] sm:$0xff] %v3383_v35  ;;  %8577 = vst [vmem:[#allocation37_spill] sm:$0xff] %v3386_v33  ;;  %v138_v25 = vmul.f32 0.015719416, %v3355_v1  ;;  %v3402_v61 = vld [vmem:[%s8221_s0 + $0x79] sm:$0xff]  ;;  %v3407_v2 = vld [vmem:[%s8221_s0 + $0x81] sm:$0xff] }
  0x1b   :  { %8578 = vst [vmem:[#allocation38_spill] sm:$0xff] %v3391_v29  ;;  %8579 = vst [vmem:[#allocation39_spill] sm:$0xff] %v3396_v28  ;;  %v3412_v24 = vld [vmem:[%s8221_s0 + $0x91] sm:$0xff]  ;;  %v139_v23 = vmul.f32 0.015719416, %v3363_v44  ;;  %v3420_v21 = vld [vmem:[%s8221_s0 + $0x99] sm:$0xff] }
  0x1c   :  { %8580 = vst [vmem:[#allocation40_spill] sm:$0xff] %v3402_v61  ;;  %8581 = vst [vmem:[#allocation41_spill] sm:$0xff] %v3407_v2  ;;  %v140_v0 = vmul.f32 0.015719416, %v3368_v45  ;;  %v141_v1 = vmul.f32 0.015719416, %v3373_v39  ;;  %v3472_v9 = vadd.f32 %v138_v25, %v3160_v14 }
  0x1d   :  { %8582 = vst [vmem:[#allocation42_spill] sm:$0xff] %v3412_v24  ;;  %8583 = vst [vmem:[#allocation43_spill] sm:$0xff] %v3420_v21  ;;  %v3425_v20 = vld [vmem:[%s8221_s0 + $0xa9] sm:$0xff]  ;;  %v3430_v19 = vld [vmem:[%s8221_s0 + $0xb1] sm:$0xff]  ;;  %v142_v44 = vmul.f32 0.015719416, %v3378_v49  ;;  %v3491_v14 = vadd.f32 %v139_v23, %v3178_v18 }
  0x1e   :  { %8584 = vst [vmem:[#allocation44_spill] sm:$0xff] %v3425_v20  ;;  %8585 = vst [vmem:[#allocation45_spill] sm:$0xff] %v3430_v19  ;;  %v3436_v39 = vld [vmem:[%s8221_s0 + $0xc1] sm:$0xff]  ;;  %v3441_v45 = vld [vmem:[%s8221_s0 + $0xc9] sm:$0xff]  ;;  %v143_v16 = vmul.f32 0.015719416, %v3383_v35  ;;  %v3469_v35 = vadd.f32 %v137_v27, %v3142_v10  ;;  %v3494_v25 = vadd.f32 %v140_v0, %v3196_v22  ;;  %v3497_v27 = vadd.f32 %v141_v1, %v3214_v26 }
  0x1f   :  { %8586 = vst [vmem:[#allocation46_spill] sm:$0xff] %v3436_v39  ;;  %8587 = vst [vmem:[#allocation47_spill] sm:$0xff] %v3441_v45  ;;  %v3446_v17 = vld [vmem:[%s8221_s0 + $0xd9] sm:$0xff]  ;;  %v3452_v49 = vld [vmem:[%s8221_s0 + $0xe1] sm:$0xff]  ;;  %v144_v12 = vmul.f32 0.015719416, %v3391_v29  ;;  %v3518_v1 = vadd.f32 %v142_v44, %v3232_v30 }
  0x20   :  { %8588 = vst [vmem:[#allocation48_spill] sm:$0xff] %v3446_v17  ;;  %8589 = vst [vmem:[#allocation49_spill] sm:$0xff] %v3452_v49  ;;  %v3457_v15 = vld [vmem:[%s8221_s0 + $0xf1] sm:$0xff]  ;;  %v3462_v13 = vld [vmem:[%s8221_s0 + $0xf9] sm:$0xff]  ;;  %v145_v10 = vmul.f32 0.015719416, %v3396_v28 }
  0x21   :  { %8590 = vst [vmem:[#allocation50_spill] sm:$0xff] %v3457_v15  ;;  %8591 = vst [vmem:[#allocation51_spill] sm:$0xff] %v3462_v13  ;;  %v3477_v8 = vld [vmem:[%s8221_s0 + $0x109] sm:$0xff]  ;;  %v3482_v7 = vld [vmem:[%s8221_s0 + $0x111] sm:$0xff]  ;;  %v146_v22 = vmul.f32 0.015719416, %v3402_v61 }
  0x22   :  { %8592 = vst [vmem:[#allocation52_spill] sm:$0xff] %v3477_v8  ;;  %8593 = vst [vmem:[#allocation53_spill] sm:$0xff] %v3482_v7  ;;  %v3487_v6 = vld [vmem:[%s8221_s0 + $0x121] sm:$0xff]  ;;  %v3502_v34 = vld [vmem:[%s8221_s0 + $0x129] sm:$0xff]  ;;  %v147_v23 = vmul.f32 0.015719416, %v3407_v2  ;;  %v3556_v33 = vadd.f32 %v145_v10, %v3256_v36 }
  0x23   :  { %8594 = vst [vmem:[#allocation54_spill] sm:$0xff] %v3487_v6  ;;  %8595 = vst [vmem:[#allocation55_spill] sm:$0xff] %v3502_v34  ;;  %v3507_v29 = vld [vmem:[%s8221_s0 + $0x139] sm:$0xff]  ;;  %v3512_v18 = vld [vmem:[%s8221_s0 + $0x141] sm:$0xff]  ;;  %v148_v26 = vmul.f32 0.015719416, %v3412_v24  ;;  %v3534_v24 = vadd.f32 %v143_v16, %v3235_v31 }
  0x24   :  { %8596 = vst [vmem:[#allocation56_spill] sm:$0xff] %v3507_v29  ;;  %8597 = vst [vmem:[#allocation57_spill] sm:$0xff] %v3512_v18  ;;  %v3523_v0 = vld [vmem:[%s8221_s0 + $0x151] sm:$0xff]  ;;  %v3528_v28 = vld [vmem:[%s8221_s0 + $0x159] sm:$0xff]  ;;  %v149_v5 = vmul.f32 0.015719416, %v3420_v21 }
  0x25   :  { %8598 = vst [vmem:[#allocation58_spill] sm:$0xff] %v3523_v0  ;;  %8599 = vst [vmem:[#allocation59_spill] sm:$0xff] %v3528_v28  ;;  %v150_v61 = vmul.f32 0.015719416, %v3425_v20  ;;  %v151_v2 = vmul.f32 0.015719416, %v3430_v19  ;;  %v3550_v19 = vadd.f32 %v144_v12, %v3238_v32 }
  0x26   :  { %8600 = vst [vmem:[#allocation60_spill] sm:$0xff] %v3534_v24  ;;  %v3539_v30 = vld [vmem:[%s8221_s0 + $0x169] sm:$0xff]  ;;  %v3544_v44 = vld [vmem:[%s8221_s0 + $0x171] sm:$0xff]  ;;  %v152_v4 = vmul.f32 0.015719416, %v3436_v39 }
  0x27   :  { %8601 = vst [vmem:[#allocation61_spill] sm:$0xff] %v3539_v30  ;;  %8602 = vst [vmem:[#allocation62_spill] sm:$0xff] %v3544_v44  ;;  %v153_v21 = vmul.f32 0.015719416, %v3441_v45  ;;  %v154_v20 = vmul.f32 0.015719416, %v3446_v17  ;;  %v3562_v17 = vadd.f32 %v146_v22, %v3259_v37 }
  0x28   :  { %v155_v16 = vmul.f32 0.015719416, %v3452_v49  ;;  %v156_v31 = vmul.f32 0.015719416, %v3457_v15  ;;  %v157_v3 = vmul.f32 0.015719416, %v3462_v13  ;;  %v3568_v13 = vadd.f32 %v147_v23, %v3262_v38 }
  0x29   :  { %v158_v24 = vmul.f32 0.015719416, %v3477_v8  ;;  %v159_v39 = vmul.f32 0.015719416, %v3482_v7  ;;  %v160_v45 = vmul.f32 0.015719416, %v3487_v6  ;;  %v3573_v7 = vadd.f32 %v148_v26, %v3275_v41 }
  0x2a   :  { %v161_v12 = vmul.f32 0.015719416, %v3502_v34  ;;  %v162_v32 = vmul.f32 0.015719416, %v3507_v29  ;;  %v163_v15 = vmul.f32 0.015719416, %v3512_v18  ;;  %v3576_v6 = vadd.f32 %v149_v5, %v3278_v42 }
  0x2b   :  { %v164_v36 = vmul.f32 0.015719416, %v3523_v0  ;;  %v165_v10 = vmul.f32 0.015719416, %v3528_v28  ;;  %v200_v37 = vld [vmem:[%s8221_s0 + $0x2] sm:$0xff]  ;;  %v201_v22 = vld [vmem:[%s8221_s0 + $0xa] sm:$0xff]  ;;  %v3587_v28 = vadd.f32 %v150_v61, %v3281_v43  ;;  %v3590_v41 = vadd.f32 %v151_v2, %v3294_v46 }
  0x2c   :  { %v166_v38 = vmul.f32 0.015719416, %v3539_v30  ;;  %v167_v23 = vmul.f32 0.015719416, %v3544_v44  ;;  %v3595_v5 = vld [vmem:[%s8221_s0 + $0x1a] sm:$0xff]  ;;  %v3598_v42 = vadd.f32 %v152_v4, %v3297_v47  ;;  %v3601_v26 = vadd.f32 %v153_v21, %v3300_v48  ;;  %v3612_v46 = vld [vmem:[%s8221_s0 + $0x22] sm:$0xff] }
  0x2d   :  { %8603 = vst [vmem:[#allocation63_spill] sm:$0xff] %v3595_v5  ;;  %v3604_v30 = vadd.f32 %v154_v20, %v3308_v50  ;;  %v3607_v43 = vadd.f32 %v155_v16, %v3311_v51  ;;  %8604 = vst [vmem:[#allocation64_spill] sm:$0xff] %v3612_v46  ;;  %v3617_v61 = vld [vmem:[%s8221_s0 + $0x32] sm:$0xff]  ;;  %v3622_v4 = vld [vmem:[%s8221_s0 + $0x3a] sm:$0xff]  ;;  %v3625_v20 = vadd.f32 %v156_v31, %v3314_v52  ;;  %v232_v51 = vmul.f32 0.020157779, %v200_v37 }
  0x2e   :  { %8605 = vst [vmem:[#allocation65_spill] sm:$0xff] %v3617_v61  ;;  %8606 = vst [vmem:[#allocation66_spill] sm:$0xff] %v3622_v4  ;;  %v3628_v21 = vadd.f32 %v157_v3, %v3317_v53  ;;  %v3633_v47 = vld [vmem:[%s8221_s0 + $0x4a] sm:$0xff]  ;;  %v3638_v48 = vld [vmem:[%s8221_s0 + $0x52] sm:$0xff]  ;;  %v233_v52 = vmul.f32 0.020157779, %v201_v22  ;;  %v3646_v3 = vadd.f32 %v158_v24, %v3320_v54  ;;  %v3649_v53 = vadd.f32 %v159_v39, %v3323_v55 }
  0x2f   :  { %8607 = vst [vmem:[#allocation67_spill] sm:$0xff] %v3633_v47  ;;  %8608 = vst [vmem:[#allocation68_spill] sm:$0xff] %v3638_v48  ;;  %v3643_v50 = vld [vmem:[%s8221_s0 + $0x62] sm:$0xff]  ;;  %v3652_v2 = vadd.f32 %v160_v45, %v3326_v56  ;;  %v3657_v16 = vld [vmem:[%s8221_s0 + $0x6a] sm:$0xff]  ;;  %v234_v39 = vmul.f32 0.020157779, %v3595_v5  ;;  %v3671_v45 = vadd.f32 %v161_v12, %v3329_v57  ;;  %v3674_v54 = vadd.f32 %v162_v32, %v3332_v58 }
  0x30   :  { %8609 = vst [vmem:[#allocation69_spill] sm:$0xff] %v3643_v50  ;;  %8610 = vst [vmem:[#allocation70_spill] sm:$0xff] %v3657_v16  ;;  %v3662_v31 = vld [vmem:[%s8221_s0 + $0x7a] sm:$0xff]  ;;  %v3667_v24 = vld [vmem:[%s8221_s0 + $0x82] sm:$0xff]  ;;  %v3677_v55 = vadd.f32 %v163_v15, %v3335_v59  ;;  %v235_v58 = vmul.f32 0.020157779, %v3612_v46  ;;  %v3696_v15 = vadd.f32 %v164_v36, %v3338_v60  ;;  %v3699_v59 = vadd.f32 %v165_v10, %v3344_v62 }
  0x31   :  { %8611 = vst [vmem:[#allocation71_spill] sm:$0xff] %v3662_v31  ;;  %8612 = vst [vmem:[#allocation72_spill] sm:$0xff] %v3667_v24  ;;  %v3682_v56 = vld [vmem:[%s8221_s0 + $0x92] sm:$0xff]  ;;  %v3687_v37 = vld [vmem:[%s8221_s0 + $0x9a] sm:$0xff]  ;;  %v3702_v12 = vadd.f32 %v166_v38, %v3347_v63  ;;  %v236_v62 = vmul.f32 0.020157779, %v3617_v61  ;;  %v3721_v63 = vadd.f32 %v167_v23, %v3358_v40  ;;  %v3740_v40 = vadd.f32 %v232_v51, %v3466_v11 }
  0x32   :  { %8613 = vst [vmem:[#allocation73_spill] sm:$0xff] %v3682_v56  ;;  %8614 = vst [vmem:[#allocation74_spill] sm:$0xff] %v3687_v37  ;;  %v3692_v57 = vld [vmem:[%s8221_s0 + $0xaa] sm:$0xff]  ;;  %v3707_v32 = vld [vmem:[%s8221_s0 + $0xb2] sm:$0xff]  ;;  %v237_v61 = vmul.f32 0.020157779, %v3622_v4  ;;  %v3743_v23 = vadd.f32 %v233_v52, %v3469_v35  ;;  %v3764_v52 = vadd.f32 %v234_v39, %v3472_v9 }
  0x33   :  { %8615 = vst [vmem:[#allocation75_spill] sm:$0xff] %v3692_v57  ;;  %8616 = vst [vmem:[#allocation76_spill] sm:$0xff] %v3707_v32  ;;  %v3712_v22 = vld [vmem:[%s8221_s0 + $0xc2] sm:$0xff]  ;;  %v3717_v60 = vld [vmem:[%s8221_s0 + $0xca] sm:$0xff]  ;;  %v238_v11 = vmul.f32 0.020157779, %v3633_v47 }
  0x34   :  { %8617 = vst [vmem:[#allocation77_spill] sm:$0xff] %v3712_v22  ;;  %8618 = vst [vmem:[#allocation78_spill] sm:$0xff] %v3717_v60  ;;  %v3726_v36 = vld [vmem:[%s8221_s0 + $0xda] sm:$0xff]  ;;  %v3731_v10 = vld [vmem:[%s8221_s0 + $0xe2] sm:$0xff]  ;;  %v239_v35 = vmul.f32 0.020157779, %v3638_v48  ;;  %v3785_v48 = vadd.f32 %v235_v58, %v3491_v14 }
  0x35   :  { %8619 = vst [vmem:[#allocation79_spill] sm:$0xff] %v3726_v36  ;;  %8620 = vst [vmem:[#allocation80_spill] sm:$0xff] %v3731_v10  ;;  %v3736_v38 = vld [vmem:[%s8221_s0 + $0xf2] sm:$0xff]  ;;  %v3748_v46 = vld [vmem:[%s8221_s0 + $0xfa] sm:$0xff]  ;;  %v240_v51 = vmul.f32 0.020157779, %v3643_v50 }
  0x36   :  { %8621 = vst [vmem:[#allocation81_spill] sm:$0xff] %v3736_v38  ;;  %8622 = vst [vmem:[#allocation82_spill] sm:$0xff] %v3743_v23  ;;  %v3753_v5 = vld [vmem:[%s8221_s0 + $0x10a] sm:$0xff]  ;;  %v3758_v4 = vld [vmem:[%s8221_s0 + $0x112] sm:$0xff]  ;;  %v241_v50 = vmul.f32 0.020157779, %v3657_v16 }
  0x37   :  { %8623 = vst [vmem:[#allocation83_spill] sm:$0xff] %v3748_v46  ;;  %8624 = vst [vmem:[#allocation84_spill] sm:$0xff] %v3753_v5  ;;  %v3769_v44 = vld [vmem:[%s8221_s0 + $0x122] sm:$0xff]  ;;  %v3774_v0 = vld [vmem:[%s8221_s0 + $0x12a] sm:$0xff]  ;;  %v242_v9 = vmul.f32 0.020157779, %v3662_v31  ;;  %v3806_v31 = vadd.f32 %v236_v62, %v3494_v25 }
  0x38   :  { %8625 = vst [vmem:[#allocation85_spill] sm:$0xff] %v3758_v4  ;;  %8626 = vst [vmem:[#allocation86_spill] sm:$0xff] %v3764_v52  ;;  %v3779_v47 = vld [vmem:[%s8221_s0 + $0x13a] sm:$0xff]  ;;  %v243_v39 = vmul.f32 0.020157779, %v3667_v24  ;;  %v3790_v18 = vld [vmem:[%s8221_s0 + $0x142] sm:$0xff] }
  0x39   :  { %8627 = vst [vmem:[#allocation87_spill] sm:$0xff] %v3769_v44  ;;  %8628 = vst [vmem:[#allocation88_spill] sm:$0xff] %v3774_v0  ;;  %v3795_v29 = vld [vmem:[%s8221_s0 + $0x152] sm:$0xff]  ;;  %v3800_v16 = vld [vmem:[%s8221_s0 + $0x15a] sm:$0xff]  ;;  %v244_v24 = vmul.f32 0.020157779, %v3682_v56 }
  0x3a   :  { %8629 = vst [vmem:[#allocation89_spill] sm:$0xff] %v3779_v47  ;;  %8630 = vst [vmem:[#allocation90_spill] sm:$0xff] %v3785_v48  ;;  %v245_v14 = vmul.f32 0.020157779, %v3687_v37  ;;  %v246_v58 = vmul.f32 0.020157779, %v3692_v57  ;;  %v3822_v57 = vadd.f32 %v237_v61, %v3497_v27  ;;  %v3828_v48 = vadd.f32 %v238_v11, %v3518_v1 }
  0x3b   :  { %8631 = vst [vmem:[#allocation91_spill] sm:$0xff] %v3790_v18  ;;  %8632 = vst [vmem:[#allocation92_spill] sm:$0xff] %v3795_v29  ;;  %v3811_v34 = vld [vmem:[%s8221_s0 + $0x16a] sm:$0xff]  ;;  %v3816_v8 = vld [vmem:[%s8221_s0 + $0x172] sm:$0xff]  ;;  %v247_v49 = vmul.f32 0.020157779, %v3707_v32 }
  0x3c   :  { %8633 = vst [vmem:[#allocation93_spill] sm:$0xff] %v3800_v16  ;;  %8634 = vst [vmem:[#allocation94_spill] sm:$0xff] %v3806_v31  ;;  %v248_v56 = vmul.f32 0.020157779, %v3712_v22  ;;  %v249_v37 = vmul.f32 0.020157779, %v3717_v60 }
  0x3d   :  { %8635 = vst [vmem:[#allocation95_spill] sm:$0xff] %v3811_v34  ;;  %8636 = vst [vmem:[#allocation96_spill] sm:$0xff] %v3816_v8  ;;  %v250_v25 = vmul.f32 0.020157779, %v3726_v36  ;;  %v251_v62 = vmul.f32 0.020157779, %v3731_v10 }
  0x3e   :  { %v252_v31 = vmul.f32 0.020157779, %v3736_v38  ;;  %v253_v52 = vmul.f32 0.020157779, %v3748_v46  ;;  %v254_v32 = vmul.f32 0.020157779, %v3753_v5  ;;  %v3840_v38 = vadd.f32 %v240_v51, %v3550_v19 }
  0x3f   :  { %v255_v22 = vmul.f32 0.020157779, %v3758_v4  ;;  %v8637_v23 = vld [vmem:[#allocation60_spill] sm:$0xff]  ;;  %v256_v27 = vmul.f32 0.020157779, %v3769_v44  ;;  %v3846_v4 = vadd.f32 %v241_v50, %v3556_v33  ;;  %v296_v19 = vld [vmem:[%s8221_s0 + $0x3] sm:$0xff]  ;;  %v3863_v33 = vadd.f32 %v244_v24, %v3573_v7 }
  0x40   :  { %v3834_v60 = vadd.f32 %v239_v35, %v8637_v23  ;;  %v257_v61 = vmul.f32 0.020157779, %v3774_v0  ;;  %v258_v10 = vmul.f32 0.020157779, %v3779_v47  ;;  %v259_v1 = vmul.f32 0.020157779, %v3790_v18 }
  0x41   :  { %v260_v11 = vmul.f32 0.020157779, %v3795_v29  ;;  %v261_v5 = vmul.f32 0.020157779, %v3800_v16  ;;  %v262_v23 = vmul.f32 0.020157779, %v3811_v34  ;;  %v3851_v0 = vadd.f32 %v242_v9, %v3562_v17 }
  0x42   :  { %v263_v35 = vmul.f32 0.020157779, %v3816_v8  ;;  %v3854_v47 = vadd.f32 %v243_v39, %v3568_v13  ;;  %v297_v51 = vld [vmem:[%s8221_s0 + $0xb] sm:$0xff]  ;;  %v3866_v50 = vadd.f32 %v245_v14, %v3576_v6  ;;  %v3869_v17 = vadd.f32 %v246_v58, %v3587_v28  ;;  %v3877_v9 = vld [vmem:[%s8221_s0 + $0x1b] sm:$0xff]  ;;  %v3920_v24 = vld [vmem:[%s8221_s0 + $0x53] sm:$0xff] }
  0x43   :  { %v3872_v13 = vadd.f32 %v247_v49, %v3590_v41  ;;  %8638 = vst [vmem:[#allocation60_spill] sm:$0xff] %v3877_v9  ;;  %v3880_v39 = vadd.f32 %v248_v56, %v3598_v42  ;;  %v3883_v7 = vadd.f32 %v249_v37, %v3601_v26  ;;  %v3886_v6 = vadd.f32 %v250_v25, %v3604_v30  ;;  %v3894_v49 = vld [vmem:[%s8221_s0 + $0x23] sm:$0xff]  ;;  %v3899_v41 = vld [vmem:[%s8221_s0 + $0x33] sm:$0xff]  ;;  %v3904_v42 = vld [vmem:[%s8221_s0 + $0x3b] sm:$0xff] }
  0x44   :  { %v3889_v28 = vadd.f32 %v251_v62, %v3607_v43  ;;  %8639 = vst [vmem:[#allocation97_spill] sm:$0xff] %v3894_v49  ;;  %8640 = vst [vmem:[#allocation98_spill] sm:$0xff] %v3899_v41  ;;  %v3907_v30 = vadd.f32 %v252_v31, %v3625_v20  ;;  %v3910_v26 = vadd.f32 %v253_v52, %v3628_v21  ;;  %v3915_v43 = vld [vmem:[%s8221_s0 + $0x4b] sm:$0xff]  ;;  %v3925_v56 = vld [vmem:[%s8221_s0 + $0x63] sm:$0xff]  ;;  %v328_v20 = vmul.f32 0.015719416, %v296_v19 }
  0x45   :  { %8641 = vst [vmem:[#allocation99_spill] sm:$0xff] %v3904_v42  ;;  %8642 = vst [vmem:[#allocation100_spill] sm:$0xff] %v3915_v43  ;;  %v329_v31 = vmul.f32 0.015719416, %v297_v51  ;;  %v3928_v21 = vadd.f32 %v254_v32, %v3646_v3  ;;  %v3931_v37 = vadd.f32 %v255_v22, %v3649_v53  ;;  %v3934_v52 = vadd.f32 %v256_v27, %v3652_v2  ;;  %v3939_v14 = vld [vmem:[%s8221_s0 + $0x6b] sm:$0xff]  ;;  %v3944_v58 = vld [vmem:[%s8221_s0 + $0x7b] sm:$0xff] }
  0x46   :  { %8643 = vst [vmem:[#allocation101_spill] sm:$0xff] %v3920_v24  ;;  %8644 = vst [vmem:[#allocation102_spill] sm:$0xff] %v3925_v56  ;;  %v3949_v3 = vld [vmem:[%s8221_s0 + $0x83] sm:$0xff]  ;;  %v330_v53 = vmul.f32 0.015719416, %v3877_v9  ;;  %v3953_v2 = vadd.f32 %v257_v61, %v3671_v45  ;;  %v3956_v32 = vadd.f32 %v258_v10, %v3674_v54  ;;  %v3959_v22 = vadd.f32 %v259_v1, %v3677_v55  ;;  %v3964_v25 = vld [vmem:[%s8221_s0 + $0x93] sm:$0xff] }
  0x47   :  { %8645 = vst [vmem:[#allocation103_spill] sm:$0xff] %v3939_v14  ;;  %8646 = vst [vmem:[#allocation104_spill] sm:$0xff] %v3944_v58  ;;  %v3969_v62 = vld [vmem:[%s8221_s0 + $0x9b] sm:$0xff]  ;;  %v3974_v45 = vld [vmem:[%s8221_s0 + $0xab] sm:$0xff]  ;;  %v331_v54 = vmul.f32 0.015719416, %v3894_v49  ;;  %v3978_v55 = vadd.f32 %v260_v11, %v3696_v15  ;;  %v3981_v10 = vadd.f32 %v261_v5, %v3699_v59  ;;  %v3984_v27 = vadd.f32 %v262_v23, %v3702_v12 }
  0x48   :  { %8647 = vst [vmem:[#allocation105_spill] sm:$0xff] %v3949_v3  ;;  %8648 = vst [vmem:[#allocation106_spill] sm:$0xff] %v3964_v25  ;;  %v3989_v61 = vld [vmem:[%s8221_s0 + $0xb3] sm:$0xff]  ;;  %v3994_v1 = vld [vmem:[%s8221_s0 + $0xc3] sm:$0xff]  ;;  %v332_v5 = vmul.f32 0.015719416, %v3899_v41  ;;  %v4003_v59 = vadd.f32 %v263_v35, %v3721_v63  ;;  %v4022_v63 = vadd.f32 %v328_v20, %v3740_v40 }
  0x49   :  { %8649 = vst [vmem:[#allocation107_spill] sm:$0xff] %v3969_v62  ;;  %8650 = vst [vmem:[#allocation108_spill] sm:$0xff] %v3974_v45  ;;  %v3999_v15 = vld [vmem:[%s8221_s0 + $0xcb] sm:$0xff]  ;;  %v4008_v12 = vld [vmem:[%s8221_s0 + $0xdb] sm:$0xff]  ;;  %v333_v19 = vmul.f32 0.015719416, %v3904_v42 }
  0x4a   :  { %8651 = vst [vmem:[#allocation109_spill] sm:$0xff] %v3989_v61  ;;  %8652 = vst [vmem:[#allocation110_spill] sm:$0xff] %v3994_v1  ;;  %v4013_v11 = vld [vmem:[%s8221_s0 + $0xe3] sm:$0xff]  ;;  %v4018_v23 = vld [vmem:[%s8221_s0 + $0xf3] sm:$0xff]  ;;  %v334_v9 = vmul.f32 0.015719416, %v3915_v43 }
  0x4b   :  { %8653 = vst [vmem:[#allocation111_spill] sm:$0xff] %v3999_v15  ;;  %8654 = vst [vmem:[#allocation112_spill] sm:$0xff] %v4008_v12  ;;  %v8657_v35 = vld [vmem:[#allocation82_spill] sm:$0xff]  ;;  %v4035_v49 = vld [vmem:[%s8221_s0 + $0x10b] sm:$0xff]  ;;  %v335_v42 = vmul.f32 0.015719416, %v3920_v24 }
  0x4c   :  { %8655 = vst [vmem:[#allocation113_spill] sm:$0xff] %v4013_v11  ;;  %8656 = vst [vmem:[#allocation114_spill] sm:$0xff] %v4018_v23  ;;  %v4025_v51 = vadd.f32 %v329_v31, %v8657_v35  ;;  %v4030_v41 = vld [vmem:[%s8221_s0 + $0xfb] sm:$0xff]  ;;  %v336_v40 = vmul.f32 0.015719416, %v3925_v56  ;;  %v4046_v31 = vld [vmem:[%s8221_s0 + $0x113] sm:$0xff] }
  0x4d   :  { %8658 = vst [vmem:[#allocation82_spill] sm:$0xff] %v4030_v41  ;;  %8659 = vst [vmem:[#allocation115_spill] sm:$0xff] %v4035_v49  ;;  %v8660_v20 = vld [vmem:[#allocation86_spill] sm:$0xff]  ;;  %v4056_v43 = vld [vmem:[%s8221_s0 + $0x12b] sm:$0xff]  ;;  %v337_v56 = vmul.f32 0.015719416, %v3939_v14 }
  0x4e   :  { %v4041_v8 = vadd.f32 %v330_v53, %v8660_v20  ;;  %8661 = vst [vmem:[#allocation86_spill] sm:$0xff] %v4046_v31  ;;  %v4051_v35 = vld [vmem:[%s8221_s0 + $0x123] sm:$0xff]  ;;  %8663 = vst [vmem:[#allocation117_spill] sm:$0xff] %v4056_v43  ;;  %v338_v53 = vmul.f32 0.015719416, %v3944_v58  ;;  %v4067_v16 = vld [vmem:[%s8221_s0 + $0x13b] sm:$0xff] }
  0x4f   :  { %8662 = vst [vmem:[#allocation116_spill] sm:$0xff] %v4051_v35  ;;  %v339_v20 = vmul.f32 0.015719416, %v3949_v3  ;;  %v8664_v24 = vld [vmem:[#allocation90_spill] sm:$0xff]  ;;  %8666 = vst [vmem:[#allocation118_spill] sm:$0xff] %v4067_v16  ;;  %v4077_v14 = vld [vmem:[%s8221_s0 + $0x153] sm:$0xff] }
  0x50   :  { %v4062_v34 = vadd.f32 %v331_v54, %v8664_v24  ;;  %v4072_v29 = vld [vmem:[%s8221_s0 + $0x143] sm:$0xff]  ;;  %8668 = vst [vmem:[#allocation120_spill] sm:$0xff] %v4077_v14  ;;  %v340_v3 = vmul.f32 0.015719416, %v3964_v25  ;;  %v341_v24 = vmul.f32 0.015719416, %v3969_v62 }
  0x51   :  { %8667 = vst [vmem:[#allocation119_spill] sm:$0xff] %v4072_v29  ;;  %v342_v54 = vmul.f32 0.015719416, %v3974_v45  ;;  %v8669_v58 = vld [vmem:[#allocation94_spill] sm:$0xff]  ;;  %v4093_v46 = vld [vmem:[%s8221_s0 + $0x16b] sm:$0xff]  ;;  %v4099_v45 = vadd.f32 %v333_v19, %v3822_v57  ;;  %v4115_v57 = vadd.f32 %v335_v42, %v3834_v60  ;;  %v4118_v19 = vadd.f32 %v336_v40, %v3840_v38 }
  0x52   :  { %8665 = vst [vmem:[#allocation90_spill] sm:$0xff] %v4062_v34  ;;  %v4083_v18 = vadd.f32 %v332_v5, %v8669_v58  ;;  %v4088_v44 = vld [vmem:[%s8221_s0 + $0x15b] sm:$0xff]  ;;  %8672 = vst [vmem:[#allocation122_spill] sm:$0xff] %v4093_v46  ;;  %v343_v36 = vmul.f32 0.015719416, %v3989_v61  ;;  %v4105_v34 = vadd.f32 %v334_v9, %v3828_v48  ;;  %v4110_v61 = vld [vmem:[%s8221_s0 + $0x173] sm:$0xff]  ;;  %v4133_v42 = vadd.f32 %v338_v53, %v3851_v0 }
  0x53   :  { %8671 = vst [vmem:[#allocation121_spill] sm:$0xff] %v4088_v44  ;;  %v344_v25 = vmul.f32 0.015719416, %v3994_v1  ;;  %v345_v62 = vmul.f32 0.015719416, %v3999_v15  ;;  %8673 = vst [vmem:[#allocation123_spill] sm:$0xff] %v4110_v61 }
  0x54   :  { %8670 = vst [vmem:[#allocation94_spill] sm:$0xff] %v4083_v18  ;;  %v346_v58 = vmul.f32 0.015719416, %v4008_v12  ;;  %v347_v5 = vmul.f32 0.015719416, %v4013_v11  ;;  %v392_v48 = vld [vmem:[%s8221_s0 + $0x4] sm:$0xff]  ;;  %v4159_v53 = vadd.f32 %v343_v36, %v3872_v13 }
  0x55   :  { %v348_v18 = vmul.f32 0.015719416, %v4018_v23  ;;  %v349_v1 = vmul.f32 0.015719416, %v4030_v41  ;;  %v350_v15 = vmul.f32 0.015719416, %v4035_v49  ;;  %v4127_v41 = vadd.f32 %v337_v56, %v3846_v4 }
  0x56   :  { %v351_v9 = vmul.f32 0.015719416, %v4046_v31  ;;  %v352_v23 = vmul.f32 0.015719416, %v4051_v35  ;;  %v353_v11 = vmul.f32 0.015719416, %v4056_v43  ;;  %v4138_v35 = vadd.f32 %v339_v20, %v3854_v47 }
  0x57   :  { %v354_v49 = vmul.f32 0.015719416, %v4067_v16  ;;  %v355_v60 = vmul.f32 0.015719416, %v4072_v29  ;;  %v356_v38 = vmul.f32 0.015719416, %v4077_v14  ;;  %v4142_v56 = vadd.f32 %v340_v3, %v3863_v33 }
  0x58   :  { %v357_v40 = vmul.f32 0.015719416, %v4088_v44  ;;  %v358_v31 = vmul.f32 0.015719416, %v4093_v46  ;;  %v424_v43 = vmul.f32 0.008738643, %v392_v48  ;;  %v4145_v29 = vadd.f32 %v341_v24, %v3866_v50 }
  0x59   :  { %v359_v4 = vmul.f32 0.015719416, %v4110_v61  ;;  %v4148_v14 = vadd.f32 %v342_v54, %v3869_v17  ;;  %v393_v0 = vld [vmem:[%s8221_s0 + $0xc] sm:$0xff]  ;;  %v4156_v47 = vld [vmem:[%s8221_s0 + $0x1c] sm:$0xff]  ;;  %v4162_v33 = vadd.f32 %v344_v25, %v3880_v39  ;;  %v4165_v50 = vadd.f32 %v345_v62, %v3883_v7  ;;  %v4173_v3 = vld [vmem:[%s8221_s0 + $0x24] sm:$0xff] }
  0x5a   :  { %8674 = vst [vmem:[#allocation124_spill] sm:$0xff] %v4156_v47  ;;  %v4168_v17 = vadd.f32 %v346_v58, %v3886_v6  ;;  %8675 = vst [vmem:[#allocation125_spill] sm:$0xff] %v4173_v3  ;;  %v4178_v20 = vld [vmem:[%s8221_s0 + $0x34] sm:$0xff]  ;;  %v4181_v36 = vadd.f32 %v347_v5, %v3889_v28  ;;  %v4184_v13 = vadd.f32 %v348_v18, %v3907_v30  ;;  %v4195_v6 = vld [vmem:[%s8221_s0 + $0x3c] sm:$0xff]  ;;  %v426_v62 = vmul.f32 0.008738643, %v4156_v47 }
  0x5b   :  { %8676 = vst [vmem:[#allocation126_spill] sm:$0xff] %v4178_v20  ;;  %v4187_v39 = vadd.f32 %v349_v1, %v3910_v26  ;;  %v4190_v7 = vadd.f32 %v350_v15, %v3928_v21  ;;  %8677 = vst [vmem:[#allocation127_spill] sm:$0xff] %v4195_v6  ;;  %v4200_v25 = vld [vmem:[%s8221_s0 + $0x4c] sm:$0xff]  ;;  %v4205_v18 = vld [vmem:[%s8221_s0 + $0x54] sm:$0xff]  ;;  %v4208_v28 = vadd.f32 %v351_v9, %v3931_v37  ;;  %v425_v21 = vmul.f32 0.008738643, %v393_v0 }
  0x5c   :  { %8678 = vst [vmem:[#allocation128_spill] sm:$0xff] %v4200_v25  ;;  %8679 = vst [vmem:[#allocation129_spill] sm:$0xff] %v4205_v18  ;;  %v4213_v30 = vld [vmem:[%s8221_s0 + $0x64] sm:$0xff]  ;;  %v4218_v26 = vld [vmem:[%s8221_s0 + $0x6c] sm:$0xff]  ;;  %v456_v1 = vadd.f32 %v424_v43, %v4022_v63  ;;  %v4223_v15 = vadd.f32 %v352_v23, %v3934_v52  ;;  %v4226_v37 = vadd.f32 %v353_v11, %v3953_v2  ;;  %v427_v52 = vmul.f32 0.008738643, %v4173_v3 }
  0x5d   :  { %8680 = vst [vmem:[#allocation130_spill] sm:$0xff] %v4213_v30  ;;  %8681 = vst [vmem:[#allocation131_spill] sm:$0xff] %v4218_v26  ;;  %v4231_v24 = vld [vmem:[%s8221_s0 + $0x7c] sm:$0xff]  ;;  %v4236_v54 = vld [vmem:[%s8221_s0 + $0x84] sm:$0xff]  ;;  %v428_v2 = vmul.f32 0.008738643, %v4178_v20  ;;  %v4246_v11 = vadd.f32 %v354_v49, %v3956_v32  ;;  %v4249_v23 = vadd.f32 %v355_v60, %v3959_v22  ;;  %v4252_v63 = vadd.f32 %v356_v38, %v3978_v55 }
  0x5e   :  { %8682 = vst [vmem:[#allocation132_spill] sm:$0xff] %v4231_v24  ;;  %8683 = vst [vmem:[#allocation133_spill] sm:$0xff] %v4236_v54  ;;  %v4241_v43 = vld [vmem:[%s8221_s0 + $0x94] sm:$0xff]  ;;  %v4257_v58 = vld [vmem:[%s8221_s0 + $0x9c] sm:$0xff]  ;;  %v429_v32 = vmul.f32 0.008738643, %v4195_v6  ;;  %v4271_v22 = vadd.f32 %v357_v40, %v3981_v10  ;;  %v4274_v55 = vadd.f32 %v358_v31, %v3984_v27  ;;  %v4277_v48 = vadd.f32 %v359_v4, %v4003_v59 }
  0x5f   :  { %8684 = vst [vmem:[#allocation134_spill] sm:$0xff] %v4241_v43  ;;  %8685 = vst [vmem:[#allocation135_spill] sm:$0xff] %v4257_v58  ;;  %v4262_v5 = vld [vmem:[%s8221_s0 + $0xac] sm:$0xff]  ;;  %v4267_v49 = vld [vmem:[%s8221_s0 + $0xb4] sm:$0xff]  ;;  %v430_v27 = vmul.f32 0.008738643, %v4200_v25  ;;  %v4312_v4 = vadd.f32 %v425_v21, %v4025_v51  ;;  %v4315_v0 = vadd.f32 %v426_v62, %v4041_v8 }
  0x60   :  { %8686 = vst [vmem:[#allocation136_spill] sm:$0xff] %v4262_v5  ;;  %8687 = vst [vmem:[#allocation137_spill] sm:$0xff] %v4267_v49  ;;  %v4282_v9 = vld [vmem:[%s8221_s0 + $0xc4] sm:$0xff]  ;;  %v4287_v60 = vld [vmem:[%s8221_s0 + $0xcc] sm:$0xff]  ;;  %v431_v40 = vmul.f32 0.008738643, %v4205_v18 }
  0x61   :  { %8688 = vst [vmem:[#allocation138_spill] sm:$0xff] %v4282_v9  ;;  %8689 = vst [vmem:[#allocation139_spill] sm:$0xff] %v4287_v60  ;;  %v4292_v10 = vld [vmem:[%s8221_s0 + $0xdc] sm:$0xff]  ;;  %v4298_v59 = vld [vmem:[%s8221_s0 + $0xe4] sm:$0xff]  ;;  %v432_v8 = vmul.f32 0.008738643, %v4213_v30 }
  0x62   :  { %8690 = vst [vmem:[#allocation140_spill] sm:$0xff] %v4292_v10  ;;  %8691 = vst [vmem:[#allocation141_spill] sm:$0xff] %v4298_v59  ;;  %v4303_v31 = vld [vmem:[%s8221_s0 + $0xf4] sm:$0xff]  ;;  %v4308_v38 = vld [vmem:[%s8221_s0 + $0xfc] sm:$0xff]  ;;  %v440_v16 = vmul.f32 0.008738643, %v4282_v9 }
  0x63   :  { %8692 = vst [vmem:[#allocation142_spill] sm:$0xff] %v4303_v31  ;;  %8693 = vst [vmem:[#allocation143_spill] sm:$0xff] %v4308_v38  ;;  %v8694_v25 = vld [vmem:[#allocation37_spill] sm:$0xff]  ;;  %v4323_v20 = vld [vmem:[%s8221_s0 + $0x10c] sm:$0xff]  ;;  %v441_v12 = vmul.f32 0.008738643, %v4287_v60 }
  0x64   :  { %v4318_v6 = vadd.f32 %v8694_v25, %v456_v1  ;;  %8696 = vst [vmem:[#allocation144_spill] sm:$0xff] %v4323_v20  ;;  %v4328_v3 = vld [vmem:[%s8221_s0 + $0x114] sm:$0xff]  ;;  %v4333_v51 = vld [vmem:[%s8221_s0 + $0x124] sm:$0xff]  ;;  %v433_v25 = vmul.f32 0.008738643, %v4218_v26  ;;  %v4346_v47 = vld [vmem:[%s8221_s0 + $0x12c] sm:$0xff] }
  0x65   :  { %8697 = vst [vmem:[#allocation145_spill] sm:$0xff] %v4328_v3  ;;  %8698 = vst [vmem:[#allocation146_spill] sm:$0xff] %v4333_v51  ;;  %v8699_v21 = vld [vmem:[#allocation90_spill] sm:$0xff]  ;;  %v4367_v30 = vld [vmem:[%s8221_s0 + $0x154] sm:$0xff]  ;;  %v447_v9 = vmul.f32 0.008738643, %v4328_v3 }
  0x66   :  { %8695 = vst [vmem:[#allocation37_spill] sm:$0xff] %v4318_v6  ;;  %v4338_v62 = vadd.f32 %v427_v52, %v8699_v21  ;;  %v8700_v1 = vld [vmem:[#allocation94_spill] sm:$0xff]  ;;  %8701 = vst [vmem:[#allocation90_spill] sm:$0xff] %v4346_v47  ;;  %v434_v52 = vmul.f32 0.008738643, %v4231_v24  ;;  %v4377_v24 = vld [vmem:[%s8221_s0 + $0x16c] sm:$0xff] }
  0x67   :  { %v4341_v18 = vadd.f32 %v428_v2, %v8700_v1  ;;  %v4351_v61 = vld [vmem:[%s8221_s0 + $0x13c] sm:$0xff]  ;;  %v4356_v26 = vld [vmem:[%s8221_s0 + $0x144] sm:$0xff]  ;;  %v435_v2 = vmul.f32 0.008738643, %v4236_v54  ;;  %v436_v21 = vmul.f32 0.008738643, %v4241_v43  ;;  %v4362_v1 = vadd.f32 %v429_v32, %v4099_v45 }
  0x68   :  { %8702 = vst [vmem:[#allocation94_spill] sm:$0xff] %v4351_v61  ;;  %8703 = vst [vmem:[#allocation147_spill] sm:$0xff] %v4356_v26  ;;  %v4372_v46 = vld [vmem:[%s8221_s0 + $0x15c] sm:$0xff]  ;;  %v437_v43 = vmul.f32 0.008738643, %v4257_v58  ;;  %v4383_v54 = vadd.f32 %v430_v27, %v4105_v34  ;;  %v4388_v44 = vld [vmem:[%s8221_s0 + $0x174] sm:$0xff]  ;;  %v4394_v58 = vadd.f32 %v431_v40, %v4115_v57  ;;  %v4400_v27 = vadd.f32 %v432_v8, %v4118_v19 }
  0x69   :  { %8704 = vst [vmem:[#allocation148_spill] sm:$0xff] %v4367_v30  ;;  %8705 = vst [vmem:[#allocation149_spill] sm:$0xff] %v4372_v46  ;;  %v438_v45 = vmul.f32 0.008738643, %v4262_v5  ;;  %v439_v32 = vmul.f32 0.008738643, %v4267_v49 }
  0x6a   :  { %8706 = vst [vmem:[#allocation150_spill] sm:$0xff] %v4377_v24  ;;  %8707 = vst [vmem:[#allocation151_spill] sm:$0xff] %v4383_v54  ;;  %v442_v6 = vmul.f32 0.008738643, %v4292_v10  ;;  %v443_v5 = vmul.f32 0.008738643, %v4298_v59  ;;  %v4406_v10 = vadd.f32 %v433_v25, %v4127_v41  ;;  %v4422_v25 = vadd.f32 %v436_v21, %v4142_v56 }
  0x6b   :  { %8708 = vst [vmem:[#allocation152_spill] sm:$0xff] %v4388_v44  ;;  %v444_v49 = vmul.f32 0.008738643, %v4303_v31  ;;  %v445_v34 = vmul.f32 0.008738643, %v4308_v38  ;;  %v4412_v38 = vadd.f32 %v434_v52, %v4133_v42  ;;  %v4428_v42 = vadd.f32 %v438_v45, %v4148_v14  ;;  %v8716_v21 = vld [vmem:[#allocation9_spill] sm:$0xff] }
  0x6c   :  { %v446_v54 = vmul.f32 0.008738643, %v4323_v20  ;;  %v448_v60 = vmul.f32 0.008738643, %v4333_v51  ;;  %v449_v57 = vmul.f32 0.008738643, %v4346_v47  ;;  %v4418_v51 = vadd.f32 %v435_v2, %v4138_v35 }
  0x6d   :  { %v450_v40 = vmul.f32 0.008738643, %v4351_v61  ;;  %v451_v31 = vmul.f32 0.008738643, %v4356_v26  ;;  %v452_v19 = vmul.f32 0.008738643, %v4367_v30  ;;  %v4425_v61 = vadd.f32 %v437_v43, %v4145_v29 }
  0x6e   :  { %v453_v8 = vmul.f32 0.008738643, %v4372_v46  ;;  %v454_v3 = vmul.f32 0.008738643, %v4377_v24  ;;  %v455_v41 = vmul.f32 0.008738643, %v4388_v44  ;;  %v4431_v52 = vadd.f32 %v439_v32, %v4159_v53 }
  0x6f   :  { %v4434_v46 = vadd.f32 %v440_v16, %v4162_v33  ;;  %v4437_v35 = vadd.f32 %v441_v12, %v4165_v50  ;;  %v4440_v2 = vadd.f32 %v442_v6, %v4168_v17  ;;  %v4443_v56 = vadd.f32 %v443_v5, %v4181_v36  ;;  %v8709_v50 = vld [vmem:[#allocation2_spill] sm:$0xff]  ;;  %v8712_v43 = vld [vmem:[#allocation5_spill] sm:$0xff]  ;;  %v8734_v26 = vld [vmem:[#allocation23_spill] sm:$0xff] }
  0x70   :  { %v4446_v29 = vadd.f32 %v444_v49, %v4184_v13  ;;  %v4449_v14 = vadd.f32 %v445_v34, %v4187_v39  ;;  %v4452_v53 = vadd.f32 %v446_v54, %v4190_v7  ;;  %v4455_v16 = vadd.f32 %v447_v9, %v4208_v28  ;;  %v8710_v7 = vld [vmem:[#allocation3_spill] sm:$0xff]  ;;  %v8732_v44 = vld [vmem:[#allocation21_spill] sm:$0xff]  ;;  %v8733_v30 = vld [vmem:[#allocation22_spill] sm:$0xff] }
  0x71   :  { %v4458_v12 = vadd.f32 %v448_v60, %v4223_v15  ;;  %v4461_v33 = vadd.f32 %v449_v57, %v4226_v37  ;;  %v522_v17 = vmul.f32 0.015719416, %v8709_v50  ;;  %v4465_v36 = vadd.f32 %v450_v40, %v4246_v11  ;;  %v8711_v37 = vld [vmem:[#allocation4_spill] sm:$0xff]  ;;  %v8714_v9 = vld [vmem:[#allocation7_spill] sm:$0xff]  ;;  %v8736_v47 = vld [vmem:[#allocation25_spill] sm:$0xff] }
  0x72   :  { %v4468_v13 = vadd.f32 %v451_v31, %v4249_v23  ;;  %v4471_v39 = vadd.f32 %v452_v19, %v4252_v63  ;;  %v523_v6 = vmul.f32 0.015719416, %v8710_v7  ;;  %v4475_v28 = vadd.f32 %v453_v8, %v4271_v22  ;;  %v8713_v23 = vld [vmem:[#allocation6_spill] sm:$0xff]  ;;  %v8715_v60 = vld [vmem:[#allocation8_spill] sm:$0xff]  ;;  %v8718_v34 = vld [vmem:[#allocation11_spill] sm:$0xff] }
  0x73   :  { %v4478_v15 = vadd.f32 %v454_v3, %v4274_v55  ;;  %v524_v54 = vmul.f32 0.015719416, %v8711_v37  ;;  %v525_v5 = vmul.f32 0.015719416, %v8712_v43  ;;  %v4483_v11 = vadd.f32 %v455_v41, %v4277_v48  ;;  %v8717_v22 = vld [vmem:[#allocation10_spill] sm:$0xff]  ;;  %v8719_v57 = vld [vmem:[#allocation12_spill] sm:$0xff] }
  0x74   :  { %v526_v49 = vmul.f32 0.015719416, %v8713_v23  ;;  %v527_v63 = vmul.f32 0.015719416, %v8714_v9  ;;  %v528_v31 = vmul.f32 0.015719416, %v8715_v60  ;;  %v4492_v55 = vadd.f32 %v522_v17, %v4312_v4 }
  0x75   :  { %v529_v45 = vmul.f32 0.015719416, %v8716_v21  ;;  %v530_v32 = vmul.f32 0.015719416, %v8717_v22  ;;  %v531_v3 = vmul.f32 0.015719416, %v8718_v34  ;;  %v4498_v50 = vadd.f32 %v523_v6, %v4315_v0 }
  0x76   :  { %v532_v40 = vmul.f32 0.015719416, %v8719_v57  ;;  %v8720_v19 = vld [vmem:[#allocation13_spill] sm:$0xff]  ;;  %v8721_v8 = vld [vmem:[#allocation14_spill] sm:$0xff]  ;;  %v4508_v37 = vld [vmem:[%s8221_s0 + $0x188] sm:$0xff]  ;;  %v4514_v21 = vadd.f32 %v524_v54, %v4338_v62 }
  0x77   :  { %v533_v48 = vmul.f32 0.015719416, %v8720_v19  ;;  %v534_v41 = vmul.f32 0.015719416, %v8721_v8  ;;  %v4503_v7 = vld [vmem:[%s8221_s0 + $0x180] sm:$0xff]  ;;  %8723 = vst [vmem:[#allocation3_spill] sm:$0xff] %v4508_v37  ;;  %v4520_v8 = vadd.f32 %v525_v5, %v4341_v18 }
  0x78   :  { %8722 = vst [vmem:[#allocation2_spill] sm:$0xff] %v4503_v7  ;;  %v8724_v4 = vld [vmem:[#allocation15_spill] sm:$0xff]  ;;  %v8725_v43 = vld [vmem:[#allocation16_spill] sm:$0xff]  ;;  %v8726_v9 = vld [vmem:[#allocation17_spill] sm:$0xff]  ;;  %v541_v24 = vmul.f32 0.015719416, %v8732_v44 }
  0x79   :  { %v535_v17 = vmul.f32 0.015719416, %v8724_v4  ;;  %v536_v23 = vmul.f32 0.015719416, %v8725_v43  ;;  %v537_v60 = vmul.f32 0.015719416, %v8726_v9  ;;  %v4526_v9 = vadd.f32 %v526_v49, %v4362_v1 }
  0x7a   :  { %8727 = vst [vmem:[#allocation4_spill] sm:$0xff] %v4514_v21  ;;  %v8728_v0 = vld [vmem:[#allocation18_spill] sm:$0xff]  ;;  %v8729_v22 = vld [vmem:[#allocation19_spill] sm:$0xff]  ;;  %v8730_v57 = vld [vmem:[#allocation20_spill] sm:$0xff]  ;;  %v542_v4 = vmul.f32 0.015719416, %v8733_v30 }
  0x7b   :  { %v538_v6 = vmul.f32 0.015719416, %v8728_v0  ;;  %v539_v34 = vmul.f32 0.015719416, %v8729_v22  ;;  %v540_v19 = vmul.f32 0.015719416, %v8730_v57 }
  0x7c   :  { %8731 = vst [vmem:[#allocation5_spill] sm:$0xff] %v4520_v8  ;;  %v543_v43 = vmul.f32 0.015719416, %v8734_v26  ;;  %v8735_v62 = vld [vmem:[#allocation24_spill] sm:$0xff]  ;;  %v545_v0 = vmul.f32 0.015719416, %v8736_v47  ;;  %v4538_v26 = vadd.f32 %v528_v31, %v4394_v58  ;;  %v4556_v58 = vadd.f32 %v533_v48, %v4422_v25 }
  0x7d   :  { %v544_v54 = vmul.f32 0.015719416, %v8735_v62  ;;  %v8737_v20 = vld [vmem:[#allocation26_spill] sm:$0xff]  ;;  %v8738_v59 = vld [vmem:[#allocation151_spill] sm:$0xff]  ;;  %v8740_v8 = vld [vmem:[#allocation28_spill] sm:$0xff]  ;;  %v4559_v31 = vadd.f32 %v534_v41, %v4425_v61  ;;  %v4577_v25 = vadd.f32 %v540_v19, %v4443_v56  ;;  %v4580_v61 = vadd.f32 %v541_v24, %v4446_v29 }
  0x7e   :  { %v546_v22 = vmul.f32 0.015719416, %v8737_v20  ;;  %v4532_v57 = vadd.f32 %v527_v63, %v8738_v59  ;;  %v8739_v18 = vld [vmem:[#allocation27_spill] sm:$0xff]  ;;  %v548_v44 = vmul.f32 0.015719416, %v8740_v8  ;;  %v8741_v21 = vld [vmem:[#allocation29_spill] sm:$0xff]  ;;  %v4544_v20 = vadd.f32 %v529_v45, %v4400_v27 }
  0x7f   :  { %v547_v5 = vmul.f32 0.015719416, %v8739_v18  ;;  %v549_v30 = vmul.f32 0.015719416, %v8741_v21  ;;  %v8742_v1 = vld [vmem:[#allocation30_spill] sm:$0xff]  ;;  %v4547_v59 = vadd.f32 %v530_v32, %v4406_v10  ;;  %v4550_v63 = vadd.f32 %v531_v3, %v4412_v38  ;;  %v8744_v29 = vld [vmem:[#allocation32_spill] sm:$0xff] }
  0x80   :  { %v550_v49 = vmul.f32 0.015719416, %v8742_v1  ;;  %v551_v62 = vmul.f32 0.015719416, %v4503_v7  ;;  %v552_v47 = vmul.f32 0.015719416, %v4508_v37  ;;  %v4553_v21 = vadd.f32 %v532_v40, %v4418_v51 }
  0x81   :  { %v4562_v8 = vadd.f32 %v535_v17, %v4428_v42  ;;  %v4565_v27 = vadd.f32 %v536_v23, %v4431_v52  ;;  %v4568_v10 = vadd.f32 %v537_v60, %v4434_v46  ;;  %v4571_v38 = vadd.f32 %v538_v6, %v4437_v35  ;;  %v8743_v35 = vld [vmem:[#allocation31_spill] sm:$0xff]  ;;  %v8745_v3 = vld [vmem:[#allocation33_spill] sm:$0xff]  ;;  %v8749_v60 = vld [vmem:[#allocation38_spill] sm:$0xff] }
  0x82   :  { %v4574_v51 = vadd.f32 %v539_v34, %v4440_v2  ;;  %v4583_v42 = vadd.f32 %v542_v4, %v4449_v14  ;;  %v4586_v52 = vadd.f32 %v543_v43, %v4452_v53  ;;  %v4589_v46 = vadd.f32 %v544_v54, %v4455_v16  ;;  %v8747_v41 = vld [vmem:[#allocation35_spill] sm:$0xff]  ;;  %v8752_v4 = vld [vmem:[#allocation40_spill] sm:$0xff]  ;;  %v8757_v1 = vld [vmem:[#allocation45_spill] sm:$0xff] }
  0x83   :  { %v617_v45 = vmul.f32 0.040059876, %v8743_v35  ;;  %v4593_v2 = vadd.f32 %v545_v0, %v4458_v12  ;;  %v4596_v56 = vadd.f32 %v546_v22, %v4461_v33  ;;  %v4599_v24 = vadd.f32 %v547_v5, %v4465_v36  ;;  %v8746_v36 = vld [vmem:[#allocation34_spill] sm:$0xff]  ;;  %v8750_v6 = vld [vmem:[#allocation39_spill] sm:$0xff]  ;;  %v8775_v7 = vld [vmem:[#allocation56_spill] sm:$0xff] }
  0x84   :  { %v618_v14 = vmul.f32 0.040059876, %v8744_v29  ;;  %v4603_v32 = vadd.f32 %v548_v44, %v4468_v13  ;;  %v4606_v53 = vadd.f32 %v549_v30, %v4471_v39  ;;  %v4609_v16 = vadd.f32 %v550_v49, %v4475_v28  ;;  %v8748_v13 = vld [vmem:[#allocation36_spill] sm:$0xff]  ;;  %v8751_v28 = vld [vmem:[#allocation37_spill] sm:$0xff]  ;;  %v8754_v0 = vld [vmem:[#allocation42_spill] sm:$0xff] }
  0x85   :  { %v619_v12 = vmul.f32 0.040059876, %v8745_v3  ;;  %v4613_v40 = vadd.f32 %v551_v62, %v4478_v15  ;;  %v4616_v33 = vadd.f32 %v552_v47, %v4483_v11  ;;  %v620_v48 = vmul.f32 0.040059876, %v8746_v36  ;;  %v8753_v15 = vld [vmem:[#allocation41_spill] sm:$0xff]  ;;  %v8755_v18 = vld [vmem:[#allocation43_spill] sm:$0xff] }
  0x86   :  { %v621_v17 = vmul.f32 0.040059876, %v8747_v41  ;;  %v622_v23 = vmul.f32 0.040059876, %v8748_v13  ;;  %v623_v39 = vmul.f32 0.040059876, %v8749_v60  ;;  %v4624_v19 = vadd.f32 %v617_v45, %v8751_v28 }
  0x87   :  { %v624_v34 = vmul.f32 0.040059876, %v8750_v6  ;;  %v625_v43 = vmul.f32 0.040059876, %v8752_v4  ;;  %v626_v54 = vmul.f32 0.040059876, %v8753_v15  ;;  %v4630_v22 = vadd.f32 %v618_v14, %v4492_v55 }
  0x88   :  { %v627_v11 = vmul.f32 0.040059876, %v8754_v0  ;;  %v628_v5 = vmul.f32 0.040059876, %v8755_v18  ;;  %v8756_v44 = vld [vmem:[#allocation44_spill] sm:$0xff]  ;;  %v4636_v62 = vadd.f32 %v619_v12, %v4498_v50  ;;  %v4641_v47 = vld [vmem:[%s8221_s0 + $0x181] sm:$0xff] }
  0x89   :  { %v629_v30 = vmul.f32 0.040059876, %v8756_v44  ;;  %v630_v49 = vmul.f32 0.040059876, %v8757_v1  ;;  %8759 = vst [vmem:[#allocation7_spill] sm:$0xff] %v4641_v47  ;;  %v4646_v35 = vld [vmem:[%s8221_s0 + $0x189] sm:$0xff] }
  0x8a   :  { %8758 = vst [vmem:[#allocation6_spill] sm:$0xff] %v4636_v62  ;;  %8760 = vst [vmem:[#allocation8_spill] sm:$0xff] %v4646_v35  ;;  %v8761_v55 = vld [vmem:[#allocation46_spill] sm:$0xff]  ;;  %v8762_v29 = vld [vmem:[#allocation47_spill] sm:$0xff] }
  0x8b   :  { %v631_v45 = vmul.f32 0.040059876, %v8761_v55  ;;  %v632_v14 = vmul.f32 0.040059876, %v8762_v29  ;;  %v8763_v3 = vld [vmem:[#allocation48_spill] sm:$0xff]  ;;  %v8766_v50 = vld [vmem:[#allocation49_spill] sm:$0xff] }
  0x8c   :  { %v633_v36 = vmul.f32 0.040059876, %v8763_v3  ;;  %v8764_v41 = vld [vmem:[#allocation4_spill] sm:$0xff]  ;;  %v634_v12 = vmul.f32 0.040059876, %v8766_v50  ;;  %v8767_v60 = vld [vmem:[#allocation50_spill] sm:$0xff]  ;;  %v4664_v3 = vadd.f32 %v622_v23, %v4526_v9 }
  0x8d   :  { %v4652_v13 = vadd.f32 %v620_v48, %v8764_v41  ;;  %v635_v6 = vmul.f32 0.040059876, %v8767_v60  ;;  %v8768_v28 = vld [vmem:[#allocation51_spill] sm:$0xff]  ;;  %v8769_v15 = vld [vmem:[#allocation5_spill] sm:$0xff]  ;;  %v8771_v18 = vld [vmem:[#allocation52_spill] sm:$0xff] }
  0x8e   :  { %v636_v4 = vmul.f32 0.040059876, %v8768_v28  ;;  %v4658_v0 = vadd.f32 %v621_v17, %v8769_v15  ;;  %v637_v44 = vmul.f32 0.040059876, %v8771_v18  ;;  %v8772_v1 = vld [vmem:[#allocation53_spill] sm:$0xff]  ;;  %v8773_v37 = vld [vmem:[#allocation54_spill] sm:$0xff]  ;;  %v4670_v28 = vadd.f32 %v623_v39, %v4532_v57 }
  0x8f   :  { %8765 = vst [vmem:[#allocation9_spill] sm:$0xff] %v4652_v13  ;;  %v638_v55 = vmul.f32 0.040059876, %v8772_v1  ;;  %v639_v29 = vmul.f32 0.040059876, %v8773_v37  ;;  %v8774_v48 = vld [vmem:[#allocation55_spill] sm:$0xff]  ;;  %v4676_v37 = vadd.f32 %v624_v34, %v4538_v26  ;;  %v4685_v57 = vadd.f32 %v626_v54, %v4547_v59 }
  0x90   :  { %8770 = vst [vmem:[#allocation10_spill] sm:$0xff] %v4658_v0  ;;  %v640_v41 = vmul.f32 0.040059876, %v8774_v48  ;;  %v641_v50 = vmul.f32 0.040059876, %v8775_v7  ;;  %v8776_v13 = vld [vmem:[#allocation57_spill] sm:$0xff]  ;;  %v4688_v39 = vadd.f32 %v627_v11, %v4550_v63  ;;  %v4694_v26 = vadd.f32 %v629_v30, %v4556_v58 }
  0x91   :  { %v642_v60 = vmul.f32 0.040059876, %v8776_v13  ;;  %v8777_v17 = vld [vmem:[#allocation58_spill] sm:$0xff]  ;;  %v8778_v0 = vld [vmem:[#allocation59_spill] sm:$0xff]  ;;  %v8779_v62 = vld [vmem:[#allocation61_spill] sm:$0xff]  ;;  %v4682_v13 = vadd.f32 %v625_v43, %v4544_v20  ;;  %v4697_v34 = vadd.f32 %v630_v49, %v4559_v31  ;;  %v4703_v20 = vadd.f32 %v632_v14, %v4565_v27 }
  0x92   :  { %v643_v15 = vmul.f32 0.040059876, %v8777_v17  ;;  %v644_v18 = vmul.f32 0.040059876, %v8778_v0  ;;  %v645_v1 = vmul.f32 0.040059876, %v8779_v62  ;;  %v4691_v62 = vadd.f32 %v628_v5, %v4553_v21 }
  0x93   :  { %v8780_v9 = vld [vmem:[#allocation62_spill] sm:$0xff]  ;;  %v647_v48 = vmul.f32 0.040059876, %v4641_v47  ;;  %v648_v7 = vmul.f32 0.040059876, %v4646_v35  ;;  %v4700_v0 = vadd.f32 %v631_v45, %v4562_v8  ;;  %v4706_v59 = vadd.f32 %v633_v36, %v4568_v10  ;;  %v8782_v54 = vld [vmem:[#allocation64_spill] sm:$0xff] }
  0x94   :  { %v646_v23 = vmul.f32 0.040059876, %v8780_v9  ;;  %v4709_v63 = vadd.f32 %v634_v12, %v4571_v38  ;;  %v4712_v21 = vadd.f32 %v635_v6, %v4574_v51  ;;  %v4715_v58 = vadd.f32 %v636_v4, %v4577_v25  ;;  %v8781_v38 = vld [vmem:[#allocation63_spill] sm:$0xff]  ;;  %v8783_v5 = vld [vmem:[#allocation65_spill] sm:$0xff]  ;;  %v8788_v6 = vld [vmem:[#allocation70_spill] sm:$0xff] }
  0x95   :  { %v4718_v31 = vadd.f32 %v637_v44, %v4580_v61  ;;  %v4721_v8 = vadd.f32 %v638_v55, %v4583_v42  ;;  %v4724_v27 = vadd.f32 %v639_v29, %v4586_v52  ;;  %v4727_v10 = vadd.f32 %v640_v41, %v4589_v46  ;;  %v8785_v45 = vld [vmem:[#allocation67_spill] sm:$0xff]  ;;  %v8787_v12 = vld [vmem:[#allocation69_spill] sm:$0xff] }
  0x96   :  { %v713_v43 = vmul.f32 0.07927255, %v8781_v38  ;;  %v4731_v51 = vadd.f32 %v641_v50, %v4593_v2  ;;  %v4734_v25 = vadd.f32 %v642_v60, %v4596_v56  ;;  %v4737_v61 = vadd.f32 %v643_v15, %v4599_v24  ;;  %v8784_v24 = vld [vmem:[#allocation66_spill] sm:$0xff]  ;;  %v8789_v44 = vld [vmem:[#allocation71_spill] sm:$0xff]  ;;  %v8791_v41 = vld [vmem:[#allocation73_spill] sm:$0xff] }
  0x97   :  { %v714_v42 = vmul.f32 0.07927255, %v8782_v54  ;;  %v4741_v11 = vadd.f32 %v644_v18, %v4603_v32  ;;  %v4744_v52 = vadd.f32 %v645_v1, %v4606_v53  ;;  %v4747_v46 = vadd.f32 %v646_v23, %v4609_v16  ;;  %v8786_v32 = vld [vmem:[#allocation68_spill] sm:$0xff]  ;;  %v8792_v60 = vld [vmem:[#allocation74_spill] sm:$0xff]  ;;  %v8793_v15 = vld [vmem:[#allocation75_spill] sm:$0xff] }
  0x98   :  { %v715_v2 = vmul.f32 0.07927255, %v8783_v5  ;;  %v4751_v30 = vadd.f32 %v647_v48, %v4613_v40  ;;  %v4754_v56 = vadd.f32 %v648_v7, %v4616_v33  ;;  %v716_v49 = vmul.f32 0.07927255, %v8784_v24  ;;  %v8790_v40 = vld [vmem:[#allocation72_spill] sm:$0xff]  ;;  %v8795_v23 = vld [vmem:[#allocation6_spill] sm:$0xff] }
  0x99   :  { %v717_v14 = vmul.f32 0.07927255, %v8785_v45  ;;  %v718_v36 = vmul.f32 0.07927255, %v8786_v32  ;;  %v719_v53 = vmul.f32 0.07927255, %v8787_v12  ;;  %v4762_v16 = vadd.f32 %v713_v43, %v4624_v19 }
  0x9a   :  { %v720_v4 = vmul.f32 0.07927255, %v8788_v6  ;;  %v721_v55 = vmul.f32 0.07927255, %v8789_v44  ;;  %v722_v29 = vmul.f32 0.07927255, %v8790_v40  ;;  %v4768_v50 = vadd.f32 %v714_v42, %v4630_v22 }
  0x9b   :  { %v723_v33 = vmul.f32 0.07927255, %v8791_v41  ;;  %v724_v17 = vmul.f32 0.07927255, %v8792_v60  ;;  %v725_v18 = vmul.f32 0.07927255, %v8793_v15  ;;  %v4774_v48 = vadd.f32 %v715_v2, %v8795_v23 }
  0x9c   :  { %v8794_v1 = vld [vmem:[#allocation76_spill] sm:$0xff]  ;;  %v4779_v19 = vld [vmem:[%s8221_s0 + $0x182] sm:$0xff]  ;;  %v8799_v22 = vld [vmem:[#allocation77_spill] sm:$0xff] }
  0x9d   :  { %v726_v9 = vmul.f32 0.07927255, %v8794_v1  ;;  %8796 = vst [vmem:[#allocation11_spill] sm:$0xff] %v4774_v48  ;;  %8797 = vst [vmem:[#allocation12_spill] sm:$0xff] %v4779_v19  ;;  %v4784_v7 = vld [vmem:[%s8221_s0 + $0x18a] sm:$0xff]  ;;  %v8800_v43 = vld [vmem:[#allocation78_spill] sm:$0xff] }
  0x9e   :  { %8798 = vst [vmem:[#allocation13_spill] sm:$0xff] %v4784_v7  ;;  %v727_v38 = vmul.f32 0.07927255, %v8799_v22  ;;  %v728_v54 = vmul.f32 0.07927255, %v8800_v43  ;;  %v8801_v42 = vld [vmem:[#allocation79_spill] sm:$0xff] }
  0x9f   :  { %v729_v5 = vmul.f32 0.07927255, %v8801_v42  ;;  %v8802_v24 = vld [vmem:[#allocation9_spill] sm:$0xff]  ;;  %v8804_v2 = vld [vmem:[#allocation80_spill] sm:$0xff]  ;;  %v8806_v44 = vld [vmem:[#allocation83_spill] sm:$0xff]  ;;  %v4802_v42 = vadd.f32 %v718_v36, %v4664_v3 }
  0xa0   :  { %v4790_v45 = vadd.f32 %v716_v49, %v8802_v24  ;;  %v730_v32 = vmul.f32 0.07927255, %v8804_v2  ;;  %v8805_v12 = vld [vmem:[#allocation81_spill] sm:$0xff]  ;;  %v732_v40 = vmul.f32 0.07927255, %v8806_v44  ;;  %v8807_v41 = vld [vmem:[#allocation10_spill] sm:$0xff]  ;;  %v4808_v44 = vadd.f32 %v719_v53, %v4670_v28 }
  0xa1   :  { %v731_v6 = vmul.f32 0.07927255, %v8805_v12  ;;  %v4796_v60 = vadd.f32 %v717_v14, %v8807_v41  ;;  %v8809_v15 = vld [vmem:[#allocation84_spill] sm:$0xff]  ;;  %v8810_v23 = vld [vmem:[#allocation85_spill] sm:$0xff]  ;;  %v8811_v35 = vld [vmem:[#allocation87_spill] sm:$0xff]  ;;  %v4823_v28 = vadd.f32 %v722_v29, %v4685_v57  ;;  %v4826_v53 = vadd.f32 %v723_v33, %v4688_v39 }
  0xa2   :  { %8803 = vst [vmem:[#allocation14_spill] sm:$0xff] %v4790_v45  ;;  %v733_v1 = vmul.f32 0.07927255, %v8809_v15  ;;  %v734_v22 = vmul.f32 0.07927255, %v8810_v23  ;;  %v8812_v49 = vld [vmem:[#allocation88_spill] sm:$0xff]  ;;  %v4844_v57 = vadd.f32 %v729_v5, %v4706_v59  ;;  %v4847_v39 = vadd.f32 %v730_v32, %v4709_v63 }
  0xa3   :  { %8808 = vst [vmem:[#allocation15_spill] sm:$0xff] %v4796_v60  ;;  %v735_v43 = vmul.f32 0.07927255, %v8811_v35  ;;  %v736_v24 = vmul.f32 0.07927255, %v8812_v49  ;;  %v8813_v47 = vld [vmem:[#allocation89_spill] sm:$0xff]  ;;  %v4814_v35 = vadd.f32 %v720_v4, %v4676_v37  ;;  %v4832_v37 = vadd.f32 %v725_v18, %v4694_v26 }
  0xa4   :  { %v737_v2 = vmul.f32 0.07927255, %v8813_v47  ;;  %v8814_v45 = vld [vmem:[#allocation91_spill] sm:$0xff]  ;;  %v8815_v14 = vld [vmem:[#allocation92_spill] sm:$0xff]  ;;  %v8816_v60 = vld [vmem:[#allocation93_spill] sm:$0xff]  ;;  %v4835_v4 = vadd.f32 %v726_v9, %v4697_v34  ;;  %v4853_v26 = vadd.f32 %v732_v40, %v4715_v58  ;;  %v4856_v34 = vadd.f32 %v733_v1, %v4718_v31 }
  0xa5   :  { %v738_v12 = vmul.f32 0.07927255, %v8814_v45  ;;  %v739_v41 = vmul.f32 0.07927255, %v8815_v14  ;;  %v740_v15 = vmul.f32 0.07927255, %v8816_v60  ;;  %v4820_v45 = vadd.f32 %v721_v55, %v4682_v13 }
  0xa6   :  { %v8817_v48 = vld [vmem:[#allocation95_spill] sm:$0xff]  ;;  %v8818_v3 = vld [vmem:[#allocation96_spill] sm:$0xff]  ;;  %v743_v49 = vmul.f32 0.07927255, %v4779_v19  ;;  %v744_v47 = vmul.f32 0.07927255, %v4784_v7  ;;  %v4838_v60 = vadd.f32 %v727_v38, %v4700_v0  ;;  %v4841_v13 = vadd.f32 %v728_v54, %v4703_v20 }
  0xa7   :  { %v741_v23 = vmul.f32 0.07927255, %v8817_v48  ;;  %v742_v36 = vmul.f32 0.07927255, %v8818_v3  ;;  %v4829_v48 = vadd.f32 %v724_v17, %v4691_v62  ;;  %v4850_v62 = vadd.f32 %v731_v6, %v4712_v21  ;;  %v8824_v29 = vld [vmem:[#allocation97_spill] sm:$0xff]  ;;  %v8825_v33 = vld [vmem:[#allocation98_spill] sm:$0xff] }
  0xa8   :  { %v4859_v0 = vadd.f32 %v734_v22, %v4721_v8  ;;  %v4862_v20 = vadd.f32 %v735_v43, %v4724_v27  ;;  %v4865_v59 = vadd.f32 %v736_v24, %v4727_v10  ;;  %v4868_v63 = vadd.f32 %v737_v2, %v4731_v51  ;;  %v8821_v8 = vld [vmem:[#allocation60_spill] sm:$0xff]  ;;  %v8829_v38 = vld [vmem:[#allocation101_spill] sm:$0xff]  ;;  %v8835_v24 = vld [vmem:[#allocation106_spill] sm:$0xff] }
  0xa9   :  { %v4871_v21 = vadd.f32 %v738_v12, %v4734_v25  ;;  %v4874_v58 = vadd.f32 %v739_v41, %v4737_v61  ;;  %v4877_v31 = vadd.f32 %v740_v15, %v4741_v11  ;;  %v809_v55 = vmul.f32 0.040059876, %v8821_v8  ;;  %v8827_v61 = vld [vmem:[#allocation99_spill] sm:$0xff]  ;;  %v8828_v9 = vld [vmem:[#allocation100_spill] sm:$0xff]  ;;  %v8834_v22 = vld [vmem:[#allocation105_spill] sm:$0xff] }
  0xaa   :  { %v4881_v27 = vadd.f32 %v741_v23, %v4744_v52  ;;  %v4884_v10 = vadd.f32 %v742_v36, %v4747_v46  ;;  %v810_v51 = vmul.f32 0.040059876, %v8824_v29  ;;  %v811_v17 = vmul.f32 0.040059876, %v8825_v33  ;;  %v8831_v52 = vld [vmem:[#allocation102_spill] sm:$0xff]  ;;  %v8832_v46 = vld [vmem:[#allocation103_spill] sm:$0xff] }
  0xab   :  { %8819 = vst [vmem:[#allocation16_spill] sm:$0xff] %v4874_v58  ;;  %8820 = vst [vmem:[#allocation17_spill] sm:$0xff] %v4877_v31  ;;  %v4889_v25 = vadd.f32 %v743_v49, %v4751_v30  ;;  %v812_v18 = vmul.f32 0.040059876, %v8827_v61  ;;  %v813_v11 = vmul.f32 0.040059876, %v8828_v9  ;;  %v4895_v5 = vadd.f32 %v744_v47, %v4754_v56 }
  0xac   :  { %8822 = vst [vmem:[#allocation18_spill] sm:$0xff] %v4881_v27  ;;  %8823 = vst [vmem:[#allocation19_spill] sm:$0xff] %v4884_v10  ;;  %v814_v54 = vmul.f32 0.040059876, %v8829_v38  ;;  %v815_v32 = vmul.f32 0.040059876, %v8831_v52  ;;  %v841_v14 = vadd.f32 %v809_v55, %v4762_v16  ;;  %v842_v49 = vadd.f32 %v810_v51, %v4768_v50 }
  0xad   :  { %8826 = vst [vmem:[#allocation20_spill] sm:$0xff] %v4889_v25  ;;  %8830 = vst [vmem:[#allocation21_spill] sm:$0xff] %v4895_v5  ;;  %v816_v6 = vmul.f32 0.040059876, %v8832_v46  ;;  %v8833_v40 = vld [vmem:[#allocation104_spill] sm:$0xff]  ;;  %v8836_v2 = vld [vmem:[#allocation107_spill] sm:$0xff] }
  0xae   :  { %v817_v1 = vmul.f32 0.040059876, %v8833_v40  ;;  %v818_v43 = vmul.f32 0.040059876, %v8834_v22  ;;  %v819_v30 = vmul.f32 0.040059876, %v8835_v24 }
  0xaf   :  { %v820_v12 = vmul.f32 0.040059876, %v8836_v2  ;;  %v8837_v41 = vld [vmem:[#allocation108_spill] sm:$0xff]  ;;  %v8838_v23 = vld [vmem:[#allocation109_spill] sm:$0xff]  ;;  %v8839_v56 = vld [vmem:[#allocation110_spill] sm:$0xff] }
  0xb0   :  { %v821_v15 = vmul.f32 0.040059876, %v8837_v41  ;;  %v822_v3 = vmul.f32 0.040059876, %v8838_v23  ;;  %v823_v36 = vmul.f32 0.040059876, %v8839_v56 }
  0xb1   :  { %v4911_v47 = vld [vmem:[%s8221_s0 + $0x183] sm:$0xff]  ;;  %v4916_v8 = vld [vmem:[%s8221_s0 + $0x18b] sm:$0xff]  ;;  %v8844_v61 = vld [vmem:[#allocation113_spill] sm:$0xff] }
  0xb2   :  { %8840 = vst [vmem:[#allocation22_spill] sm:$0xff] %v4911_v47  ;;  %8841 = vst [vmem:[#allocation23_spill] sm:$0xff] %v4916_v8  ;;  %v8842_v29 = vld [vmem:[#allocation111_spill] sm:$0xff]  ;;  %v8843_v55 = vld [vmem:[#allocation112_spill] sm:$0xff]  ;;  %v826_v9 = vmul.f32 0.040059876, %v8844_v61 }
  0xb3   :  { %v824_v16 = vmul.f32 0.040059876, %v8842_v29  ;;  %v825_v33 = vmul.f32 0.040059876, %v8843_v55  ;;  %v8845_v38 = vld [vmem:[#allocation11_spill] sm:$0xff]  ;;  %v8846_v46 = vld [vmem:[#allocation114_spill] sm:$0xff] }
  0xb4   :  { %v843_v52 = vadd.f32 %v811_v17, %v8845_v38  ;;  %v827_v50 = vmul.f32 0.040059876, %v8846_v46  ;;  %v8847_v51 = vld [vmem:[#allocation82_spill] sm:$0xff]  ;;  %v8848_v22 = vld [vmem:[#allocation115_spill] sm:$0xff]  ;;  %v8851_v7 = vld [vmem:[#allocation116_spill] sm:$0xff] }
  0xb5   :  { %v828_v40 = vmul.f32 0.040059876, %v8847_v51  ;;  %v829_v24 = vmul.f32 0.040059876, %v8848_v22  ;;  %v8849_v2 = vld [vmem:[#allocation14_spill] sm:$0xff]  ;;  %v8852_v5 = vld [vmem:[#allocation117_spill] sm:$0xff]  ;;  %v846_v51 = vadd.f32 %v814_v54, %v4802_v42  ;;  %v4947_v42 = vadd.f32 %v818_v43, %v4823_v28 }
  0xb6   :  { %v844_v41 = vadd.f32 %v812_v18, %v8849_v2  ;;  %v8850_v23 = vld [vmem:[#allocation86_spill] sm:$0xff]  ;;  %v831_v19 = vmul.f32 0.040059876, %v8851_v7  ;;  %v832_v29 = vmul.f32 0.040059876, %v8852_v5  ;;  %v8853_v25 = vld [vmem:[#allocation15_spill] sm:$0xff]  ;;  %v847_v7 = vadd.f32 %v815_v32, %v4808_v44 }
  0xb7   :  { %v830_v56 = vmul.f32 0.040059876, %v8850_v23  ;;  %v845_v55 = vadd.f32 %v813_v11, %v8853_v25  ;;  %v8854_v10 = vld [vmem:[#allocation118_spill] sm:$0xff]  ;;  %v8855_v27 = vld [vmem:[#allocation119_spill] sm:$0xff]  ;;  %v8856_v38 = vld [vmem:[#allocation120_spill] sm:$0xff]  ;;  %v4956_v44 = vadd.f32 %v821_v15, %v4832_v37  ;;  %v4959_v11 = vadd.f32 %v822_v3, %v4835_v4 }
  0xb8   :  { %v833_v61 = vmul.f32 0.040059876, %v8854_v10  ;;  %v834_v17 = vmul.f32 0.040059876, %v8855_v27  ;;  %v835_v46 = vmul.f32 0.040059876, %v8856_v38  ;;  %v4941_v10 = vadd.f32 %v816_v6, %v4814_v35 }
  0xb9   :  { %v8857_v31 = vld [vmem:[#allocation121_spill] sm:$0xff]  ;;  %v8858_v58 = vld [vmem:[#allocation122_spill] sm:$0xff]  ;;  %v8859_v2 = vld [vmem:[#allocation123_spill] sm:$0xff]  ;;  %v839_v5 = vmul.f32 0.040059876, %v4911_v47  ;;  %v4944_v27 = vadd.f32 %v817_v1, %v4820_v45  ;;  %v4962_v35 = vadd.f32 %v823_v36, %v4838_v60  ;;  %v4965_v45 = vadd.f32 %v824_v16, %v4841_v13 }
  0xba   :  { %v836_v22 = vmul.f32 0.040059876, %v8857_v31  ;;  %v837_v18 = vmul.f32 0.040059876, %v8858_v58  ;;  %v838_v23 = vmul.f32 0.040059876, %v8859_v2  ;;  %v4950_v31 = vadd.f32 %v819_v30, %v4826_v53 }
  0xbb   :  { %v840_v25 = vmul.f32 0.040059876, %v4916_v8  ;;  %v4953_v58 = vadd.f32 %v820_v12, %v4829_v48  ;;  %v4968_v28 = vadd.f32 %v825_v33, %v4844_v57  ;;  %v4971_v53 = vadd.f32 %v826_v9, %v4847_v39  ;;  %v8860_v39 = vld [vmem:[#allocation124_spill] sm:$0xff]  ;;  %v8862_v6 = vld [vmem:[#allocation125_spill] sm:$0xff]  ;;  %v8866_v12 = vld [vmem:[#allocation126_spill] sm:$0xff] }
  0xbc   :  { %v4974_v48 = vadd.f32 %v827_v50, %v4850_v62  ;;  %v4977_v37 = vadd.f32 %v828_v40, %v4853_v26  ;;  %v4980_v4 = vadd.f32 %v829_v24, %v4856_v34  ;;  %v4983_v60 = vadd.f32 %v830_v56, %v4859_v0  ;;  %v8861_v32 = vld [vmem:[#allocation16_spill] sm:$0xff]  ;;  %v8863_v1 = vld [vmem:[#allocation17_spill] sm:$0xff]  ;;  %v8869_v16 = vld [vmem:[#allocation127_spill] sm:$0xff] }
  0xbd   :  { %v4986_v13 = vadd.f32 %v831_v19, %v4862_v20  ;;  %v4989_v57 = vadd.f32 %v832_v29, %v4865_v59  ;;  %v905_v54 = vmul.f32 0.015719416, %v8860_v39  ;;  %v4993_v62 = vadd.f32 %v833_v61, %v4868_v63  ;;  %v8864_v19 = vld [vmem:[#allocation18_spill] sm:$0xff]  ;;  %v8865_v59 = vld [vmem:[#allocation19_spill] sm:$0xff]  ;;  %v8867_v15 = vld [vmem:[#allocation20_spill] sm:$0xff] }
  0xbe   :  { %v4996_v26 = vadd.f32 %v834_v17, %v4871_v21  ;;  %v4999_v34 = vadd.f32 %v835_v46, %v8861_v32  ;;  %v906_v0 = vmul.f32 0.015719416, %v8862_v6  ;;  %v5003_v43 = vadd.f32 %v836_v22, %v8863_v1  ;;  %v8868_v21 = vld [vmem:[#allocation21_spill] sm:$0xff]  ;;  %v8870_v9 = vld [vmem:[#allocation128_spill] sm:$0xff]  ;;  %v8872_v56 = vld [vmem:[#allocation130_spill] sm:$0xff] }
  0xbf   :  { %v5006_v20 = vadd.f32 %v837_v18, %v8864_v19  ;;  %v5009_v30 = vadd.f32 %v838_v23, %v8865_v59  ;;  %v907_v63 = vmul.f32 0.015719416, %v8866_v12  ;;  %v5013_v3 = vadd.f32 %v839_v5, %v8867_v15  ;;  %v8871_v40 = vld [vmem:[#allocation129_spill] sm:$0xff]  ;;  %v8873_v61 = vld [vmem:[#allocation131_spill] sm:$0xff]  ;;  %v8874_v46 = vld [vmem:[#allocation132_spill] sm:$0xff] }
  0xc0   :  { %v5016_v36 = vadd.f32 %v840_v25, %v8868_v21  ;;  %v908_v33 = vmul.f32 0.015719416, %v8869_v16  ;;  %v909_v50 = vmul.f32 0.015719416, %v8870_v9  ;;  %v910_v24 = vmul.f32 0.015719416, %v8871_v40 }
  0xc1   :  { %v911_v29 = vmul.f32 0.015719416, %v8872_v56  ;;  %v912_v17 = vmul.f32 0.015719416, %v8873_v61  ;;  %v5023_v38 = vadd.f32 %v905_v54, %v841_v14  ;;  %v913_v22 = vmul.f32 0.015719416, %v8874_v46 }
  0xc2   :  { %v8875_v18 = vld [vmem:[#allocation133_spill] sm:$0xff]  ;;  %v8876_v23 = vld [vmem:[#allocation134_spill] sm:$0xff]  ;;  %v5028_v25 = vadd.f32 %v906_v0, %v842_v49  ;;  %v8878_v39 = vld [vmem:[#allocation135_spill] sm:$0xff]  ;;  %v5033_v12 = vadd.f32 %v907_v63, %v843_v52  ;;  %v5048_v40 = vadd.f32 %v908_v33, %v844_v41 }
  0xc3   :  { %v914_v2 = vmul.f32 0.015719416, %v8875_v18  ;;  %v915_v5 = vmul.f32 0.015719416, %v8876_v23  ;;  %v916_v32 = vmul.f32 0.015719416, %v8878_v39  ;;  %v5053_v23 = vadd.f32 %v909_v50, %v845_v55 }
  0xc4   :  { %8877 = vst [vmem:[#allocation24_spill] sm:$0xff] %v5028_v25  ;;  %v8879_v6 = vld [vmem:[#allocation136_spill] sm:$0xff]  ;;  %v8880_v19 = vld [vmem:[#allocation137_spill] sm:$0xff]  ;;  %8881 = vst [vmem:[#allocation25_spill] sm:$0xff] %v5033_v12  ;;  %v5058_v12 = vadd.f32 %v910_v24, %v846_v51  ;;  %v5063_v25 = vadd.f32 %v911_v29, %v847_v7 }
  0xc5   :  { %v917_v1 = vmul.f32 0.015719416, %v8879_v6  ;;  %v918_v59 = vmul.f32 0.015719416, %v8880_v19  ;;  %v5038_v14 = vld [vmem:[%s8221_s0 + $0x184] sm:$0xff]  ;;  %v5043_v54 = vld [vmem:[%s8221_s0 + $0x18c] sm:$0xff]  ;;  %v5078_v7 = vadd.f32 %v914_v2, %v4947_v42  ;;  %v5081_v29 = vadd.f32 %v915_v5, %v4950_v31 }
  0xc6   :  { %8882 = vst [vmem:[#allocation26_spill] sm:$0xff] %v5038_v14  ;;  %8883 = vst [vmem:[#allocation151_spill] sm:$0xff] %v5043_v54  ;;  %v8884_v49 = vld [vmem:[#allocation138_spill] sm:$0xff]  ;;  %v8885_v15 = vld [vmem:[#allocation139_spill] sm:$0xff]  ;;  %v935_v24 = vmul.f32 0.015719416, %v5038_v14 }
  0xc7   :  { %v919_v0 = vmul.f32 0.015719416, %v8884_v49  ;;  %v920_v21 = vmul.f32 0.015719416, %v8885_v15  ;;  %v8886_v16 = vld [vmem:[#allocation140_spill] sm:$0xff]  ;;  %8887 = vst [vmem:[#allocation27_spill] sm:$0xff] %v5048_v40  ;;  %v5096_v42 = vadd.f32 %v918_v59, %v4959_v11 }
  0xc8   :  { %v921_v9 = vmul.f32 0.015719416, %v8886_v16  ;;  %v8888_v52 = vld [vmem:[#allocation141_spill] sm:$0xff]  ;;  %v8889_v56 = vld [vmem:[#allocation142_spill] sm:$0xff]  ;;  %v8890_v46 = vld [vmem:[#allocation143_spill] sm:$0xff]  ;;  %8891 = vst [vmem:[#allocation28_spill] sm:$0xff] %v5053_v23 }
  0xc9   :  { %v922_v63 = vmul.f32 0.015719416, %v8888_v52  ;;  %v923_v61 = vmul.f32 0.015719416, %v8889_v56  ;;  %v924_v18 = vmul.f32 0.015719416, %v8890_v46  ;;  %v5099_v31 = vadd.f32 %v919_v0, %v4962_v35 }
  0xca   :  { %v8892_v39 = vld [vmem:[#allocation144_spill] sm:$0xff]  ;;  %v8893_v19 = vld [vmem:[#allocation145_spill] sm:$0xff]  ;;  %v8894_v47 = vld [vmem:[#allocation146_spill] sm:$0xff] }
  0xcb   :  { %v925_v6 = vmul.f32 0.015719416, %v8892_v39  ;;  %v926_v8 = vmul.f32 0.015719416, %v8893_v19  ;;  %v927_v49 = vmul.f32 0.015719416, %v8894_v47  ;;  %v5069_v19 = vadd.f32 %v912_v17, %v4941_v10 }
  0xcc   :  { %v8895_v15 = vld [vmem:[#allocation90_spill] sm:$0xff]  ;;  %v8897_v40 = vld [vmem:[#allocation147_spill] sm:$0xff]  ;;  %v8898_v56 = vld [vmem:[#allocation148_spill] sm:$0xff]  ;;  %v5087_v10 = vadd.f32 %v917_v1, %v4956_v44  ;;  %v5105_v44 = vadd.f32 %v921_v9, %v4968_v28  ;;  %v5123_v35 = vadd.f32 %v922_v63, %v4971_v53  ;;  %v5129_v28 = vadd.f32 %v924_v18, %v4977_v37 }
  0xcd   :  { %v928_v16 = vmul.f32 0.015719416, %v8895_v15  ;;  %v8896_v41 = vld [vmem:[#allocation94_spill] sm:$0xff]  ;;  %v930_v52 = vmul.f32 0.015719416, %v8897_v40  ;;  %v8899_v55 = vld [vmem:[#allocation149_spill] sm:$0xff]  ;;  %v5084_v40 = vadd.f32 %v916_v32, %v4953_v58  ;;  %v5102_v58 = vadd.f32 %v920_v21, %v4965_v45 }
  0xce   :  { %v929_v33 = vmul.f32 0.015719416, %v8896_v41  ;;  %v931_v46 = vmul.f32 0.015719416, %v8898_v56  ;;  %v932_v50 = vmul.f32 0.015719416, %v8899_v55  ;;  %v5075_v41 = vadd.f32 %v913_v22, %v4944_v27 }
  0xcf   :  { %v8900_v23 = vld [vmem:[#allocation150_spill] sm:$0xff]  ;;  %v8901_v47 = vld [vmem:[#allocation152_spill] sm:$0xff]  ;;  %v936_v15 = vmul.f32 0.015719416, %v5043_v54  ;;  %v2610_v27 = vld [vmem:[%s8221_s0 + $0x38] sm:$0xff]  ;;  %v5126_v45 = vadd.f32 %v923_v61, %v4974_v48  ;;  %v5132_v5 = vadd.f32 %v925_v6, %v4980_v4  ;;  %v5150_v48 = vadd.f32 %v926_v8, %v4983_v60 }
  0xd0   :  { %v933_v39 = vmul.f32 0.015719416, %v8900_v23  ;;  %v934_v51 = vmul.f32 0.015719416, %v8901_v47  ;;  %v2609_v17 = vld [vmem:[%s8221_s0 + $0x30] sm:$0xff]  ;;  %v5110_v22 = vld [vmem:[%s8221_s0 + $0x48] sm:$0xff]  ;;  %v5153_v37 = vadd.f32 %v927_v49, %v4986_v13  ;;  %v5156_v4 = vadd.f32 %v928_v16, %v4989_v57 }
  0xd1   :  { %8902 = vst [vmem:[#allocation29_spill] sm:$0xff] %v5110_v22  ;;  %v5115_v2 = vld [vmem:[%s8221_s0 + $0x50] sm:$0xff]  ;;  %v5120_v11 = vld [vmem:[%s8221_s0 + $0x60] sm:$0xff]  ;;  %v5137_v32 = vld [vmem:[%s8221_s0 + $0x68] sm:$0xff]  ;;  %v1002_v60 = vmul.f32 0.020157779, %v2609_v17  ;;  %v5174_v13 = vadd.f32 %v929_v33, %v4993_v62  ;;  %v5177_v57 = vadd.f32 %v930_v52, %v4996_v26  ;;  %v5180_v21 = vadd.f32 %v931_v46, %v4999_v34 }
  0xd2   :  { %8903 = vst [vmem:[#allocation30_spill] sm:$0xff] %v5115_v2  ;;  %8904 = vst [vmem:[#allocation31_spill] sm:$0xff] %v5120_v11  ;;  %v5142_v1 = vld [vmem:[%s8221_s0 + $0x78] sm:$0xff]  ;;  %v5147_v53 = vld [vmem:[%s8221_s0 + $0x80] sm:$0xff]  ;;  %v1003_v26 = vmul.f32 0.020157779, %v2610_v27  ;;  %v5198_v61 = vadd.f32 %v932_v50, %v5003_v43  ;;  %v5201_v34 = vadd.f32 %v933_v39, %v5006_v20  ;;  %v5204_v18 = vadd.f32 %v934_v51, %v5009_v30 }
  0xd3   :  { %8905 = vst [vmem:[#allocation32_spill] sm:$0xff] %v5137_v32  ;;  %8906 = vst [vmem:[#allocation33_spill] sm:$0xff] %v5142_v1  ;;  %v5161_v59 = vld [vmem:[%s8221_s0 + $0x90] sm:$0xff]  ;;  %v5166_v0 = vld [vmem:[%s8221_s0 + $0x98] sm:$0xff]  ;;  %v1004_v20 = vmul.f32 0.020157779, %v5110_v22  ;;  %v5223_v30 = vadd.f32 %v935_v24, %v5013_v3  ;;  %v5226_v49 = vadd.f32 %v936_v15, %v5016_v36  ;;  %v5264_v51 = vadd.f32 %v1002_v60, %v5023_v38 }
  0xd4   :  { %8907 = vst [vmem:[#allocation34_spill] sm:$0xff] %v5147_v53  ;;  %8908 = vst [vmem:[#allocation35_spill] sm:$0xff] %v5161_v59  ;;  %v5171_v8 = vld [vmem:[%s8221_s0 + $0xa8] sm:$0xff]  ;;  %v5185_v9 = vld [vmem:[%s8221_s0 + $0xb0] sm:$0xff]  ;;  %v1005_v3 = vmul.f32 0.020157779, %v5115_v2 }
  0xd5   :  { %8909 = vst [vmem:[#allocation36_spill] sm:$0xff] %v5166_v0  ;;  %8910 = vst [vmem:[#allocation38_spill] sm:$0xff] %v5171_v8  ;;  %v5190_v63 = vld [vmem:[%s8221_s0 + $0xc0] sm:$0xff]  ;;  %v5195_v62 = vld [vmem:[%s8221_s0 + $0xc8] sm:$0xff]  ;;  %v1006_v36 = vmul.f32 0.020157779, %v5120_v11 }
  0xd6   :  { %8911 = vst [vmem:[#allocation39_spill] sm:$0xff] %v5185_v9  ;;  %8912 = vst [vmem:[#allocation37_spill] sm:$0xff] %v5190_v63  ;;  %v5209_v23 = vld [vmem:[%s8221_s0 + $0xd8] sm:$0xff]  ;;  %v5214_v6 = vld [vmem:[%s8221_s0 + $0xe0] sm:$0xff]  ;;  %v1007_v50 = vmul.f32 0.020157779, %v5137_v32 }
  0xd7   :  { %8913 = vst [vmem:[#allocation40_spill] sm:$0xff] %v5195_v62  ;;  %8914 = vst [vmem:[#allocation41_spill] sm:$0xff] %v5209_v23  ;;  %v5219_v43 = vld [vmem:[%s8221_s0 + $0xf0] sm:$0xff]  ;;  %v5231_v16 = vld [vmem:[%s8221_s0 + $0xf8] sm:$0xff]  ;;  %v1008_v39 = vmul.f32 0.020157779, %v5142_v1 }
  0xd8   :  { %8915 = vst [vmem:[#allocation42_spill] sm:$0xff] %v5214_v6  ;;  %8916 = vst [vmem:[#allocation43_spill] sm:$0xff] %v5219_v43  ;;  %v5236_v33 = vld [vmem:[%s8221_s0 + $0x108] sm:$0xff]  ;;  %v5241_v52 = vld [vmem:[%s8221_s0 + $0x110] sm:$0xff]  ;;  %v1009_v47 = vmul.f32 0.020157779, %v5147_v53 }
  0xd9   :  { %8917 = vst [vmem:[#allocation44_spill] sm:$0xff] %v5226_v49  ;;  %8918 = vst [vmem:[#allocation45_spill] sm:$0xff] %v5231_v16  ;;  %v5248_v56 = vld [vmem:[%s8221_s0 + $0x120] sm:$0xff]  ;;  %v5253_v46 = vld [vmem:[%s8221_s0 + $0x128] sm:$0xff]  ;;  %v1010_v27 = vmul.f32 0.020157779, %v5161_v59 }
  0xda   :  { %8919 = vst [vmem:[#allocation46_spill] sm:$0xff] %v5236_v33  ;;  %8920 = vst [vmem:[#allocation47_spill] sm:$0xff] %v5241_v52  ;;  %v5258_v55 = vld [vmem:[%s8221_s0 + $0x138] sm:$0xff]  ;;  %v5269_v24 = vld [vmem:[%s8221_s0 + $0x140] sm:$0xff]  ;;  %v1011_v38 = vmul.f32 0.020157779, %v5166_v0 }
  0xdb   :  { %8921 = vst [vmem:[#allocation48_spill] sm:$0xff] %v5248_v56  ;;  %8922 = vst [vmem:[#allocation4_spill] sm:$0xff] %v5253_v46  ;;  %v5274_v15 = vld [vmem:[%s8221_s0 + $0x150] sm:$0xff]  ;;  %v5279_v17 = vld [vmem:[%s8221_s0 + $0x158] sm:$0xff]  ;;  %v1012_v60 = vmul.f32 0.020157779, %v5171_v8 }
  0xdc   :  { %8923 = vst [vmem:[#allocation49_spill] sm:$0xff] %v5258_v55  ;;  %8924 = vst [vmem:[#allocation50_spill] sm:$0xff] %v5264_v51  ;;  %v8928_v53 = vld [vmem:[#allocation24_spill] sm:$0xff]  ;;  %v5290_v32 = vld [vmem:[%s8221_s0 + $0x168] sm:$0xff]  ;;  %v1013_v2 = vmul.f32 0.020157779, %v5185_v9 }
  0xdd   :  { %8925 = vst [vmem:[#allocation51_spill] sm:$0xff] %v5269_v24  ;;  %8926 = vst [vmem:[#allocation5_spill] sm:$0xff] %v5274_v15  ;;  %v5285_v1 = vadd.f32 %v1003_v26, %v8928_v53  ;;  %v5295_v11 = vld [vmem:[%s8221_s0 + $0x170] sm:$0xff]  ;;  %v1014_v59 = vmul.f32 0.020157779, %v5190_v63  ;;  %v8932_v8 = vld [vmem:[#allocation25_spill] sm:$0xff] }
  0xde   :  { %8927 = vst [vmem:[#allocation52_spill] sm:$0xff] %v5279_v17  ;;  %8930 = vst [vmem:[#allocation54_spill] sm:$0xff] %v5290_v32  ;;  %v1015_v0 = vmul.f32 0.020157779, %v5195_v62  ;;  %v5301_v22 = vadd.f32 %v1004_v20, %v8932_v8  ;;  %v5306_v53 = vld [vmem:[%s8221_s0 + $0x198] sm:$0xff]  ;;  %v5311_v26 = vld [vmem:[%s8221_s0 + $0x1a0] sm:$0xff] }
  0xdf   :  { %8929 = vst [vmem:[#allocation53_spill] sm:$0xff] %v5285_v1  ;;  %8931 = vst [vmem:[#allocation55_spill] sm:$0xff] %v5295_v11  ;;  %v1016_v54 = vmul.f32 0.020157779, %v5209_v23  ;;  %v1017_v9 = vmul.f32 0.020157779, %v5214_v6 }
  0xe0   :  { %8933 = vst [vmem:[#allocation56_spill] sm:$0xff] %v5301_v22  ;;  %8934 = vst [vmem:[#allocation57_spill] sm:$0xff] %v5306_v53  ;;  %v1018_v63 = vmul.f32 0.020157779, %v5219_v43  ;;  %v8936_v62 = vld [vmem:[#allocation27_spill] sm:$0xff]  ;;  %v8937_v1 = vld [vmem:[#allocation28_spill] sm:$0xff]  ;;  %v5329_v43 = vadd.f32 %v1007_v50, %v5058_v12 }
  0xe1   :  { %8935 = vst [vmem:[#allocation58_spill] sm:$0xff] %v5311_v26  ;;  %v5317_v14 = vadd.f32 %v1005_v3, %v8936_v62  ;;  %v1019_v8 = vmul.f32 0.020157779, %v5231_v16  ;;  %v1020_v20 = vmul.f32 0.020157779, %v5236_v33  ;;  %v5323_v51 = vadd.f32 %v1006_v36, %v8937_v1  ;;  %v8939_v12 = vld [vmem:[#allocation3_spill] sm:$0xff] }
  0xe2   :  { %v1021_v22 = vmul.f32 0.020157779, %v5241_v52  ;;  %v1022_v49 = vmul.f32 0.020157779, %v5248_v56  ;;  %v1023_v23 = vmul.f32 0.020157779, %v5253_v46  ;;  %v5335_v52 = vadd.f32 %v1008_v39, %v5063_v25 }
  0xe3   :  { %v1024_v6 = vmul.f32 0.020157779, %v5258_v55  ;;  %v1025_v62 = vmul.f32 0.020157779, %v5269_v24  ;;  %v1026_v3 = vmul.f32 0.020157779, %v5274_v15  ;;  %v5341_v55 = vadd.f32 %v1009_v47, %v5069_v19 }
  0xe4   :  { %v1027_v33 = vmul.f32 0.020157779, %v5279_v17  ;;  %v1028_v1 = vmul.f32 0.020157779, %v5290_v32  ;;  %v1029_v36 = vmul.f32 0.020157779, %v5295_v11  ;;  %v5347_v17 = vadd.f32 %v1010_v27, %v5075_v41 }
  0xe5   :  { %v8938_v56 = vld [vmem:[#allocation2_spill] sm:$0xff]  ;;  %v1031_v50 = vmul.f32 0.020157779, %v8939_v12  ;;  %v1032_v24 = vmul.f32 0.020157779, %v5306_v53  ;;  %v5350_v25 = vadd.f32 %v1011_v38, %v5078_v7  ;;  %v5353_v39 = vadd.f32 %v1012_v60, %v5081_v29  ;;  %v2641_v47 = vld [vmem:[%s8221_s0 + $0x31] sm:$0xff] }
  0xe6   :  { %v1030_v46 = vmul.f32 0.020157779, %v8938_v56  ;;  %v1033_v15 = vmul.f32 0.020157779, %v5311_v26  ;;  %v5356_v56 = vadd.f32 %v1013_v2, %v5084_v40  ;;  %v5359_v19 = vadd.f32 %v1014_v59, %v5087_v10  ;;  %v2642_v41 = vld [vmem:[%s8221_s0 + $0x39] sm:$0xff]  ;;  %v5370_v7 = vld [vmem:[%s8221_s0 + $0x49] sm:$0xff] }
  0xe7   :  { %8940 = vst [vmem:[#allocation59_spill] sm:$0xff] %v5370_v7  ;;  %v5373_v29 = vadd.f32 %v1015_v0, %v5096_v42  ;;  %v5376_v40 = vadd.f32 %v1016_v54, %v5099_v31  ;;  %v5379_v10 = vadd.f32 %v1017_v9, %v5102_v58  ;;  %v5382_v2 = vadd.f32 %v1018_v63, %v5105_v44  ;;  %v5387_v59 = vld [vmem:[%s8221_s0 + $0x51] sm:$0xff]  ;;  %v5392_v27 = vld [vmem:[%s8221_s0 + $0x61] sm:$0xff]  ;;  %v5397_v54 = vld [vmem:[%s8221_s0 + $0x69] sm:$0xff] }
  0xe8   :  { %8941 = vst [vmem:[#allocation61_spill] sm:$0xff] %v5387_v59  ;;  %8942 = vst [vmem:[#allocation62_spill] sm:$0xff] %v5392_v27  ;;  %v5400_v42 = vadd.f32 %v1019_v8, %v5123_v35  ;;  %v5403_v31 = vadd.f32 %v1020_v20, %v5126_v45  ;;  %v5406_v58 = vadd.f32 %v1021_v22, %v5129_v28  ;;  %v5414_v0 = vld [vmem:[%s8221_s0 + $0x79] sm:$0xff]  ;;  %v5419_v9 = vld [vmem:[%s8221_s0 + $0x81] sm:$0xff] }
  0xe9   :  { %8943 = vst [vmem:[#allocation63_spill] sm:$0xff] %v5397_v54  ;;  %v5409_v44 = vadd.f32 %v1022_v49, %v5132_v5  ;;  %8944 = vst [vmem:[#allocation64_spill] sm:$0xff] %v5414_v0  ;;  %v5424_v35 = vld [vmem:[%s8221_s0 + $0x91] sm:$0xff]  ;;  %v5427_v22 = vadd.f32 %v1023_v23, %v5150_v48  ;;  %v5430_v45 = vadd.f32 %v1024_v6, %v5153_v37  ;;  %v5441_v63 = vld [vmem:[%s8221_s0 + $0x99] sm:$0xff] }
  0xea   :  { %8945 = vst [vmem:[#allocation65_spill] sm:$0xff] %v5419_v9  ;;  %8946 = vst [vmem:[#allocation66_spill] sm:$0xff] %v5424_v35  ;;  %v5433_v28 = vadd.f32 %v1025_v62, %v5156_v4  ;;  %v5436_v5 = vadd.f32 %v1026_v3, %v5174_v13  ;;  %v5446_v49 = vld [vmem:[%s8221_s0 + $0xa9] sm:$0xff]  ;;  %v5451_v48 = vld [vmem:[%s8221_s0 + $0xb1] sm:$0xff]  ;;  %v5454_v37 = vadd.f32 %v1027_v33, %v5177_v57 }
  0xeb   :  { %8947 = vst [vmem:[#allocation67_spill] sm:$0xff] %v5441_v63  ;;  %8948 = vst [vmem:[#allocation68_spill] sm:$0xff] %v5446_v49  ;;  %v5457_v4 = vadd.f32 %v1028_v1, %v5180_v21  ;;  %v5460_v13 = vadd.f32 %v1029_v36, %v5198_v61  ;;  %v5465_v23 = vld [vmem:[%s8221_s0 + $0xc1] sm:$0xff]  ;;  %v5470_v6 = vld [vmem:[%s8221_s0 + $0xc9] sm:$0xff]  ;;  %v1098_v21 = vmul.f32 0.07927255, %v2641_v47  ;;  %v5478_v33 = vadd.f32 %v1030_v46, %v5201_v34 }
  0xec   :  { %8949 = vst [vmem:[#allocation69_spill] sm:$0xff] %v5451_v48  ;;  %8950 = vst [vmem:[#allocation70_spill] sm:$0xff] %v5465_v23  ;;  %v5475_v57 = vld [vmem:[%s8221_s0 + $0xd9] sm:$0xff]  ;;  %v5481_v61 = vadd.f32 %v1031_v50, %v5204_v18  ;;  %v5486_v38 = vld [vmem:[%s8221_s0 + $0xe1] sm:$0xff]  ;;  %v1099_v34 = vmul.f32 0.07927255, %v2642_v41  ;;  %v5500_v18 = vadd.f32 %v1032_v24, %v5223_v30 }
  0xed   :  { %8951 = vst [vmem:[#allocation71_spill] sm:$0xff] %v5470_v6  ;;  %8952 = vst [vmem:[#allocation72_spill] sm:$0xff] %v5475_v57  ;;  %v5491_v60 = vld [vmem:[%s8221_s0 + $0xf1] sm:$0xff]  ;;  %v5496_v8 = vld [vmem:[%s8221_s0 + $0xf9] sm:$0xff]  ;;  %v1100_v46 = vmul.f32 0.07927255, %v5370_v7 }
  0xee   :  { %8953 = vst [vmem:[#allocation73_spill] sm:$0xff] %v5481_v61  ;;  %8954 = vst [vmem:[#allocation74_spill] sm:$0xff] %v5486_v38  ;;  %v5505_v20 = vld [vmem:[%s8221_s0 + $0x109] sm:$0xff]  ;;  %v5510_v62 = vld [vmem:[%s8221_s0 + $0x111] sm:$0xff]  ;;  %v1101_v1 = vmul.f32 0.07927255, %v5387_v59 }
  0xef   :  { %8955 = vst [vmem:[#allocation75_spill] sm:$0xff] %v5491_v60  ;;  %8956 = vst [vmem:[#allocation76_spill] sm:$0xff] %v5496_v8  ;;  %v5515_v3 = vld [vmem:[%s8221_s0 + $0x121] sm:$0xff]  ;;  %v1102_v30 = vmul.f32 0.07927255, %v5392_v27  ;;  %v8961_v36 = vld [vmem:[#allocation44_spill] sm:$0xff] }
  0xf0   :  { %8957 = vst [vmem:[#allocation6_spill] sm:$0xff] %v5500_v18  ;;  %8958 = vst [vmem:[#allocation77_spill] sm:$0xff] %v5505_v20  ;;  %v1103_v24 = vmul.f32 0.07927255, %v5397_v54  ;;  %v5521_v12 = vadd.f32 %v1033_v15, %v8961_v36  ;;  %v5526_v50 = vld [vmem:[%s8221_s0 + $0x129] sm:$0xff]  ;;  %v5531_v47 = vld [vmem:[%s8221_s0 + $0x139] sm:$0xff] }
  0xf1   :  { %8959 = vst [vmem:[#allocation78_spill] sm:$0xff] %v5510_v62  ;;  %8960 = vst [vmem:[#allocation79_spill] sm:$0xff] %v5515_v3  ;;  %v5536_v41 = vld [vmem:[%s8221_s0 + $0x141] sm:$0xff]  ;;  %v1104_v54 = vmul.f32 0.07927255, %v5414_v0  ;;  %v5544_v27 = vld [vmem:[%s8221_s0 + $0x151] sm:$0xff] }
  0xf2   :  { %8962 = vst [vmem:[#allocation9_spill] sm:$0xff] %v5521_v12  ;;  %8963 = vst [vmem:[#allocation80_spill] sm:$0xff] %v5526_v50  ;;  %v1105_v15 = vmul.f32 0.07927255, %v5419_v9  ;;  %v1106_v36 = vmul.f32 0.07927255, %v5424_v35 }
  0xf3   :  { %8964 = vst [vmem:[#allocation81_spill] sm:$0xff] %v5531_v47  ;;  %8965 = vst [vmem:[#allocation83_spill] sm:$0xff] %v5536_v41  ;;  %v5549_v59 = vld [vmem:[%s8221_s0 + $0x159] sm:$0xff]  ;;  %v5554_v7 = vld [vmem:[%s8221_s0 + $0x169] sm:$0xff]  ;;  %v1107_v0 = vmul.f32 0.07927255, %v5441_v63 }
  0xf4   :  { %8966 = vst [vmem:[#allocation10_spill] sm:$0xff] %v5544_v27  ;;  %8967 = vst [vmem:[#allocation84_spill] sm:$0xff] %v5549_v59  ;;  %v1108_v9 = vmul.f32 0.07927255, %v5446_v49  ;;  %v1109_v35 = vmul.f32 0.07927255, %v5451_v48 }
  0xf5   :  { %8968 = vst [vmem:[#allocation85_spill] sm:$0xff] %v5554_v7  ;;  %v8969_v26 = vld [vmem:[#allocation50_spill] sm:$0xff]  ;;  %v5565_v11 = vld [vmem:[%s8221_s0 + $0x171] sm:$0xff]  ;;  %v1110_v32 = vmul.f32 0.07927255, %v5465_v23 }
  0xf6   :  { %v5560_v53 = vadd.f32 %v1098_v21, %v8969_v26  ;;  %8971 = vst [vmem:[#allocation88_spill] sm:$0xff] %v5565_v11  ;;  %v1111_v16 = vmul.f32 0.07927255, %v5470_v6  ;;  %v1112_v12 = vmul.f32 0.07927255, %v5475_v57  ;;  %v8972_v18 = vld [vmem:[#allocation53_spill] sm:$0xff] }
  0xf7   :  { %v5571_v63 = vadd.f32 %v1099_v34, %v8972_v18  ;;  %v5576_v48 = vld [vmem:[%s8221_s0 + $0x199] sm:$0xff]  ;;  %v5581_v26 = vld [vmem:[%s8221_s0 + $0x1a1] sm:$0xff]  ;;  %v1113_v21 = vmul.f32 0.07927255, %v5486_v38  ;;  %v1114_v23 = vmul.f32 0.07927255, %v5491_v60 }
  0xf8   :  { %8970 = vst [vmem:[#allocation87_spill] sm:$0xff] %v5560_v53  ;;  %8974 = vst [vmem:[#allocation91_spill] sm:$0xff] %v5576_v48  ;;  %v1115_v6 = vmul.f32 0.07927255, %v5496_v8  ;;  %v8976_v57 = vld [vmem:[#allocation56_spill] sm:$0xff]  ;;  %v5593_v53 = vadd.f32 %v1101_v1, %v5317_v14  ;;  %v5599_v8 = vadd.f32 %v1102_v30, %v5323_v51  ;;  %v8977_v1 = vld [vmem:[#allocation7_spill] sm:$0xff] }
  0xf9   :  { %8973 = vst [vmem:[#allocation89_spill] sm:$0xff] %v5571_v63  ;;  %8975 = vst [vmem:[#allocation92_spill] sm:$0xff] %v5581_v26  ;;  %v5587_v49 = vadd.f32 %v1100_v46, %v8976_v57  ;;  %v1116_v34 = vmul.f32 0.07927255, %v5505_v20  ;;  %v1117_v18 = vmul.f32 0.07927255, %v5510_v62 }
  0xfa   :  { %v1118_v63 = vmul.f32 0.07927255, %v5515_v3  ;;  %v1119_v61 = vmul.f32 0.07927255, %v5526_v50  ;;  %v1120_v38 = vmul.f32 0.07927255, %v5531_v47  ;;  %v5605_v3 = vadd.f32 %v1103_v24, %v5329_v43 }
  0xfb   :  { %v1121_v60 = vmul.f32 0.07927255, %v5536_v41  ;;  %v1122_v57 = vmul.f32 0.07927255, %v5544_v27  ;;  %v1123_v46 = vmul.f32 0.07927255, %v5549_v59  ;;  %v5611_v41 = vadd.f32 %v1104_v54, %v5335_v52 }
  0xfc   :  { %v1124_v62 = vmul.f32 0.07927255, %v5554_v7  ;;  %v1125_v14 = vmul.f32 0.07927255, %v5565_v11  ;;  %v1126_v50 = vmul.f32 0.07927255, %v8977_v1  ;;  %v5616_v59 = vadd.f32 %v1105_v15, %v5341_v55 }
  0xfd   :  { %v8978_v20 = vld [vmem:[#allocation8_spill] sm:$0xff]  ;;  %v1128_v51 = vmul.f32 0.07927255, %v5576_v48  ;;  %v1129_v30 = vmul.f32 0.07927255, %v5581_v26  ;;  %v5619_v7 = vadd.f32 %v1106_v36, %v5347_v17  ;;  %v5622_v43 = vadd.f32 %v1107_v0, %v5350_v25  ;;  %v2674_v17 = vld [vmem:[%s8221_s0 + $0x3a] sm:$0xff] }
  0xfe   :  { %v1127_v47 = vmul.f32 0.07927255, %v8978_v20  ;;  %v5625_v24 = vadd.f32 %v1108_v9, %v5353_v39  ;;  %v5628_v20 = vadd.f32 %v1109_v35, %v5356_v56  ;;  %v5631_v52 = vadd.f32 %v1110_v32, %v5359_v19  ;;  %v2673_v55 = vld [vmem:[%s8221_s0 + $0x32] sm:$0xff]  ;;  %v5654_v19 = vld [vmem:[%s8221_s0 + $0x4a] sm:$0xff]  ;;  %v5686_v9 = vld [vmem:[%s8221_s0 + $0x7a] sm:$0xff] }
  0xff   :  { %v5640_v25 = vadd.f32 %v1111_v16, %v5373_v29  ;;  %v5643_v39 = vadd.f32 %v1112_v12, %v5376_v40  ;;  %v5646_v56 = vadd.f32 %v1113_v21, %v5379_v10  ;;  %v5649_v32 = vadd.f32 %v1114_v23, %v5382_v2  ;;  %8979 = vst [vmem:[#allocation93_spill] sm:$0xff] %v5654_v19  ;;  %v5659_v54 = vld [vmem:[%s8221_s0 + $0x52] sm:$0xff]  ;;  %v5664_v16 = vld [vmem:[%s8221_s0 + $0x62] sm:$0xff]  ;;  %v5681_v0 = vld [vmem:[%s8221_s0 + $0x6a] sm:$0xff] }
 0x100   :  { %8980 = vst [vmem:[#allocation95_spill] sm:$0xff] %v5659_v54  ;;  %8981 = vst [vmem:[#allocation96_spill] sm:$0xff] %v5664_v16  ;;  %v5667_v29 = vadd.f32 %v1115_v6, %v5400_v42  ;;  %v5670_v40 = vadd.f32 %v1116_v34, %v5403_v31  ;;  %v5673_v10 = vadd.f32 %v1117_v18, %v5406_v58  ;;  %v5691_v42 = vld [vmem:[%s8221_s0 + $0x82] sm:$0xff]  ;;  %v5705_v35 = vld [vmem:[%s8221_s0 + $0x92] sm:$0xff]  ;;  %v1198_v1 = vmul.f32 0.28132927, %v5664_v16 }
 0x101   :  { %v5676_v2 = vadd.f32 %v1118_v63, %v5409_v44  ;;  %8982 = vst [vmem:[#allocation60_spill] sm:$0xff] %v5681_v0  ;;  %8983 = vst [vmem:[#allocation97_spill] sm:$0xff] %v5686_v9  ;;  %v5694_v31 = vadd.f32 %v1119_v61, %v5427_v22  ;;  %v5697_v58 = vadd.f32 %v1120_v38, %v5430_v45  ;;  %v5710_v63 = vld [vmem:[%s8221_s0 + $0x9a] sm:$0xff]  ;;  %v5715_v22 = vld [vmem:[%s8221_s0 + $0xaa] sm:$0xff]  ;;  %v1194_v45 = vmul.f32 0.28132927, %v2673_v55 }
 0x102   :  { %8984 = vst [vmem:[#allocation98_spill] sm:$0xff] %v5691_v42  ;;  %v5700_v44 = vadd.f32 %v1121_v60, %v5433_v28  ;;  %8985 = vst [vmem:[#allocation99_spill] sm:$0xff] %v5705_v35  ;;  %v5718_v23 = vadd.f32 %v1122_v57, %v5436_v5  ;;  %v5721_v28 = vadd.f32 %v1123_v46, %v5454_v37  ;;  %v5729_v61 = vld [vmem:[%s8221_s0 + $0xb2] sm:$0xff]  ;;  %v5734_v38 = vld [vmem:[%s8221_s0 + $0xc2] sm:$0xff]  ;;  %v1195_v37 = vmul.f32 0.28132927, %v2674_v17 }
 0x103   :  { %8986 = vst [vmem:[#allocation100_spill] sm:$0xff] %v5710_v63  ;;  %8987 = vst [vmem:[#allocation101_spill] sm:$0xff] %v5715_v22  ;;  %v5724_v6 = vadd.f32 %v1124_v62, %v5457_v4  ;;  %v5739_v5 = vld [vmem:[%s8221_s0 + $0xca] sm:$0xff]  ;;  %v5742_v60 = vadd.f32 %v1125_v14, %v5460_v13  ;;  %v5745_v4 = vadd.f32 %v1126_v50, %v5478_v33  ;;  %v8991_v62 = vld [vmem:[#allocation73_spill] sm:$0xff]  ;;  %v1196_v33 = vmul.f32 0.28132927, %v5654_v19 }
 0x104   :  { %8988 = vst [vmem:[#allocation102_spill] sm:$0xff] %v5729_v61  ;;  %8989 = vst [vmem:[#allocation103_spill] sm:$0xff] %v5734_v38  ;;  %v5748_v12 = vadd.f32 %v1127_v47, %v8991_v62  ;;  %v5753_v15 = vld [vmem:[%s8221_s0 + $0xda] sm:$0xff]  ;;  %v5758_v36 = vld [vmem:[%s8221_s0 + $0xe2] sm:$0xff]  ;;  %v1197_v14 = vmul.f32 0.28132927, %v5659_v54 }
 0x105   :  { %8990 = vst [vmem:[#allocation104_spill] sm:$0xff] %v5739_v5  ;;  %8992 = vst [vmem:[#allocation105_spill] sm:$0xff] %v5753_v15  ;;  %v5763_v13 = vld [vmem:[%s8221_s0 + $0xf2] sm:$0xff]  ;;  %v8995_v50 = vld [vmem:[#allocation6_spill] sm:$0xff]  ;;  %v1199_v17 = vmul.f32 0.28132927, %v5681_v0 }
 0x106   :  { %8993 = vst [vmem:[#allocation106_spill] sm:$0xff] %v5758_v36  ;;  %8994 = vst [vmem:[#allocation107_spill] sm:$0xff] %v5763_v13  ;;  %v5767_v47 = vadd.f32 %v1128_v51, %v8995_v50  ;;  %v8996_v21 = vld [vmem:[#allocation9_spill] sm:$0xff]  ;;  %v5780_v57 = vld [vmem:[%s8221_s0 + $0x10a] sm:$0xff]  ;;  %v1200_v62 = vmul.f32 0.28132927, %v5686_v9 }
 0x107   :  { %v5770_v34 = vadd.f32 %v1129_v30, %v8996_v21  ;;  %v5775_v18 = vld [vmem:[%s8221_s0 + $0xfa] sm:$0xff]  ;;  %8999 = vst [vmem:[#allocation110_spill] sm:$0xff] %v5780_v57  ;;  %v5785_v46 = vld [vmem:[%s8221_s0 + $0x112] sm:$0xff]  ;;  %v5792_v51 = vld [vmem:[%s8221_s0 + $0x122] sm:$0xff]  ;;  %v1201_v50 = vmul.f32 0.28132927, %v5691_v42 }
 0x108   :  { %8998 = vst [vmem:[#allocation109_spill] sm:$0xff] %v5775_v18  ;;  %9000 = vst [vmem:[#allocation111_spill] sm:$0xff] %v5785_v46  ;;  %v5797_v30 = vld [vmem:[%s8221_s0 + $0x12a] sm:$0xff]  ;;  %v5802_v55 = vld [vmem:[%s8221_s0 + $0x13a] sm:$0xff]  ;;  %v1202_v42 = vmul.f32 0.28132927, %v5705_v35 }
 0x109   :  { %8997 = vst [vmem:[#allocation108_spill] sm:$0xff] %v5770_v34  ;;  %9001 = vst [vmem:[#allocation112_spill] sm:$0xff] %v5792_v51  ;;  %v9004_v21 = vld [vmem:[#allocation87_spill] sm:$0xff]  ;;  %v5818_v19 = vld [vmem:[%s8221_s0 + $0x152] sm:$0xff]  ;;  %v1205_v27 = vmul.f32 0.28132927, %v5729_v61 }
 0x10a   :  { %9002 = vst [vmem:[#allocation113_spill] sm:$0xff] %v5797_v30  ;;  %9003 = vst [vmem:[#allocation11_spill] sm:$0xff] %v5802_v55  ;;  %v5808_v16 = vadd.f32 %v1194_v45, %v9004_v21  ;;  %v5813_v54 = vld [vmem:[%s8221_s0 + $0x142] sm:$0xff]  ;;  %v5823_v0 = vld [vmem:[%s8221_s0 + $0x15a] sm:$0xff]  ;;  %v1203_v45 = vmul.f32 0.28132927, %v5710_v63 }
 0x10b   :  { %9006 = vst [vmem:[#allocation82_spill] sm:$0xff] %v5813_v54  ;;  %9007 = vst [vmem:[#allocation115_spill] sm:$0xff] %v5818_v19  ;;  %v1204_v21 = vmul.f32 0.28132927, %v5715_v22  ;;  %v9009_v9 = vld [vmem:[#allocation89_spill] sm:$0xff]  ;;  %v5834_v48 = vld [vmem:[%s8221_s0 + $0x16a] sm:$0xff]  ;;  %v5845_v22 = vadd.f32 %v1196_v33, %v5587_v49 }
 0x10c   :  { %9005 = vst [vmem:[#allocation114_spill] sm:$0xff] %v5808_v16  ;;  %9008 = vst [vmem:[#allocation14_spill] sm:$0xff] %v5823_v0  ;;  %v5829_v26 = vadd.f32 %v1195_v37, %v9009_v9  ;;  %v5839_v11 = vld [vmem:[%s8221_s0 + $0x172] sm:$0xff]  ;;  %v1206_v35 = vmul.f32 0.28132927, %v5734_v38  ;;  %v5850_v9 = vld [vmem:[%s8221_s0 + $0x19a] sm:$0xff]  ;;  %v5867_v16 = vadd.f32 %v1198_v1, %v5599_v8 }
 0x10d   :  { %9011 = vst [vmem:[#allocation116_spill] sm:$0xff] %v5834_v48  ;;  %9012 = vst [vmem:[#allocation117_spill] sm:$0xff] %v5839_v11  ;;  %v1207_v63 = vmul.f32 0.28132927, %v5739_v5  ;;  %v5855_v37 = vld [vmem:[%s8221_s0 + $0x1a2] sm:$0xff]  ;;  %v5861_v5 = vadd.f32 %v1197_v14, %v5593_v53 }
 0x10e   :  { %9010 = vst [vmem:[#allocation86_spill] sm:$0xff] %v5829_v26  ;;  %9013 = vst [vmem:[#allocation15_spill] sm:$0xff] %v5845_v22  ;;  %v1208_v26 = vmul.f32 0.28132927, %v5753_v15  ;;  %v1209_v61 = vmul.f32 0.28132927, %v5758_v36 }
 0x10f   :  { %9014 = vst [vmem:[#allocation118_spill] sm:$0xff] %v5850_v9  ;;  %9015 = vst [vmem:[#allocation119_spill] sm:$0xff] %v5855_v37  ;;  %v1210_v38 = vmul.f32 0.28132927, %v5763_v13  ;;  %v1211_v49 = vmul.f32 0.28132927, %v5775_v18  ;;  %v5873_v13 = vadd.f32 %v1199_v17, %v5605_v3 }
 0x110   :  { %v1212_v33 = vmul.f32 0.28132927, %v5780_v57  ;;  %v1213_v22 = vmul.f32 0.28132927, %v5785_v46  ;;  %v1214_v34 = vmul.f32 0.28132927, %v5792_v51  ;;  %v5879_v46 = vadd.f32 %v1200_v62, %v5611_v41 }
 0x111   :  { %v1215_v15 = vmul.f32 0.28132927, %v5797_v30  ;;  %v1216_v36 = vmul.f32 0.28132927, %v5802_v55  ;;  %v1217_v53 = vmul.f32 0.28132927, %v5813_v54  ;;  %v5885_v55 = vadd.f32 %v1201_v50, %v5616_v59 }
 0x112   :  { %v1218_v14 = vmul.f32 0.28132927, %v5818_v19  ;;  %v1219_v57 = vmul.f32 0.28132927, %v5823_v0  ;;  %v1220_v8 = vmul.f32 0.28132927, %v5834_v48  ;;  %v5891_v0 = vadd.f32 %v1202_v42, %v5619_v7 }
 0x113   :  { %v1221_v1 = vmul.f32 0.28132927, %v5839_v11  ;;  %v9016_v51 = vld [vmem:[#allocation12_spill] sm:$0xff]  ;;  %v9017_v3 = vld [vmem:[#allocation13_spill] sm:$0xff]  ;;  %v1224_v54 = vmul.f32 0.28132927, %v5850_v9  ;;  %v5894_v41 = vadd.f32 %v1203_v45, %v5622_v43  ;;  %v5897_v62 = vadd.f32 %v1204_v21, %v5625_v24 }
 0x114   :  { %v1222_v30 = vmul.f32 0.28132927, %v9016_v51  ;;  %v1223_v17 = vmul.f32 0.28132927, %v9017_v3  ;;  %v1225_v19 = vmul.f32 0.28132927, %v5855_v37  ;;  %v5900_v51 = vadd.f32 %v1205_v27, %v5628_v20 }
 0x115   :  { %v5903_v59 = vadd.f32 %v1206_v35, %v5631_v52  ;;  %v2705_v50 = vld [vmem:[%s8221_s0 + $0x33] sm:$0xff]  ;;  %v2706_v7 = vld [vmem:[%s8221_s0 + $0x3b] sm:$0xff]  ;;  %v5912_v43 = vadd.f32 %v1207_v63, %v5640_v25  ;;  %v5915_v24 = vadd.f32 %v1208_v26, %v5643_v39  ;;  %v5918_v27 = vadd.f32 %v1209_v61, %v5646_v56  ;;  %v5926_v52 = vld [vmem:[%s8221_s0 + $0x4b] sm:$0xff] }
 0x116   :  { %v5921_v20 = vadd.f32 %v1210_v38, %v5649_v32  ;;  %9018 = vst [vmem:[#allocation120_spill] sm:$0xff] %v5926_v52  ;;  %v5931_v42 = vld [vmem:[%s8221_s0 + $0x53] sm:$0xff]  ;;  %v5936_v26 = vld [vmem:[%s8221_s0 + $0x63] sm:$0xff]  ;;  %v5939_v25 = vadd.f32 %v1211_v49, %v5667_v29  ;;  %v5942_v39 = vadd.f32 %v1212_v33, %v5670_v40  ;;  %v5945_v56 = vadd.f32 %v1213_v22, %v5673_v10  ;;  %v5953_v35 = vld [vmem:[%s8221_s0 + $0x6b] sm:$0xff] }
 0x117   :  { %9019 = vst [vmem:[#allocation121_spill] sm:$0xff] %v5931_v42  ;;  %9020 = vst [vmem:[#allocation122_spill] sm:$0xff] %v5936_v26  ;;  %v5948_v32 = vadd.f32 %v1214_v34, %v5676_v2  ;;  %v5958_v63 = vld [vmem:[%s8221_s0 + $0x7b] sm:$0xff]  ;;  %v5963_v29 = vld [vmem:[%s8221_s0 + $0x83] sm:$0xff]  ;;  %v5966_v40 = vadd.f32 %v1215_v15, %v5694_v31  ;;  %v5969_v10 = vadd.f32 %v1216_v36, %v5697_v58  ;;  %v1290_v58 = vmul.f32 0.07927255, %v2705_v50 }
 0x118   :  { %9021 = vst [vmem:[#allocation123_spill] sm:$0xff] %v5953_v35  ;;  %9022 = vst [vmem:[#allocation124_spill] sm:$0xff] %v5958_v63  ;;  %v5972_v2 = vadd.f32 %v1217_v53, %v5700_v44  ;;  %v5977_v22 = vld [vmem:[%s8221_s0 + $0x93] sm:$0xff]  ;;  %v5982_v61 = vld [vmem:[%s8221_s0 + $0x9b] sm:$0xff]  ;;  %v5990_v38 = vadd.f32 %v1218_v14, %v5718_v23  ;;  %v5993_v44 = vadd.f32 %v1219_v57, %v5721_v28  ;;  %v1291_v28 = vmul.f32 0.07927255, %v2706_v7 }
 0x119   :  { %9023 = vst [vmem:[#allocation16_spill] sm:$0xff] %v5963_v29  ;;  %9024 = vst [vmem:[#allocation125_spill] sm:$0xff] %v5977_v22  ;;  %v5987_v31 = vld [vmem:[%s8221_s0 + $0xab] sm:$0xff]  ;;  %v5996_v15 = vadd.f32 %v1220_v8, %v5724_v6  ;;  %v6001_v36 = vld [vmem:[%s8221_s0 + $0xb3] sm:$0xff]  ;;  %v6014_v57 = vadd.f32 %v1221_v1, %v5742_v60  ;;  %v6017_v6 = vadd.f32 %v1222_v30, %v5745_v4  ;;  %v1292_v4 = vmul.f32 0.07927255, %v5926_v52 }
 0x11a   :  { %9025 = vst [vmem:[#allocation17_spill] sm:$0xff] %v5982_v61  ;;  %9026 = vst [vmem:[#allocation18_spill] sm:$0xff] %v5987_v31  ;;  %v6006_v34 = vld [vmem:[%s8221_s0 + $0xc3] sm:$0xff]  ;;  %v6011_v23 = vld [vmem:[%s8221_s0 + $0xcb] sm:$0xff]  ;;  %v6020_v45 = vadd.f32 %v1223_v17, %v5748_v12  ;;  %v6039_v12 = vadd.f32 %v1224_v54, %v5767_v47  ;;  %v1293_v54 = vmul.f32 0.07927255, %v5931_v42 }
 0x11b   :  { %9027 = vst [vmem:[#allocation19_spill] sm:$0xff] %v6001_v36  ;;  %9028 = vst [vmem:[#allocation126_spill] sm:$0xff] %v6006_v34  ;;  %v6025_v21 = vld [vmem:[%s8221_s0 + $0xdb] sm:$0xff]  ;;  %v6030_v49 = vld [vmem:[%s8221_s0 + $0xe3] sm:$0xff]  ;;  %v1295_v17 = vmul.f32 0.07927255, %v5953_v35 }
 0x11c   :  { %9029 = vst [vmem:[#allocation20_spill] sm:$0xff] %v6011_v23  ;;  %9030 = vst [vmem:[#allocation21_spill] sm:$0xff] %v6025_v21  ;;  %v6035_v60 = vld [vmem:[%s8221_s0 + $0xf3] sm:$0xff]  ;;  %v6047_v53 = vld [vmem:[%s8221_s0 + $0xfb] sm:$0xff]  ;;  %v1296_v50 = vmul.f32 0.07927255, %v5958_v63 }
 0x11d   :  { %9031 = vst [vmem:[#allocation127_spill] sm:$0xff] %v6030_v49  ;;  %9032 = vst [vmem:[#allocation128_spill] sm:$0xff] %v6035_v60  ;;  %v9033_v30 = vld [vmem:[#allocation108_spill] sm:$0xff]  ;;  %v6064_v47 = vld [vmem:[%s8221_s0 + $0x123] sm:$0xff]  ;;  %v1297_v7 = vmul.f32 0.07927255, %v5963_v29 }
 0x11e   :  { %v6042_v33 = vadd.f32 %v1225_v19, %v9033_v30  ;;  %9035 = vst [vmem:[#allocation130_spill] sm:$0xff] %v6047_v53  ;;  %v6052_v14 = vld [vmem:[%s8221_s0 + $0x10b] sm:$0xff]  ;;  %v6057_v8 = vld [vmem:[%s8221_s0 + $0x113] sm:$0xff]  ;;  %v1294_v19 = vmul.f32 0.07927255, %v5936_v26  ;;  %9038 = vst [vmem:[#allocation133_spill] sm:$0xff] %v6064_v47 }
 0x11f   :  { %9036 = vst [vmem:[#allocation131_spill] sm:$0xff] %v6052_v14  ;;  %9037 = vst [vmem:[#allocation132_spill] sm:$0xff] %v6057_v8  ;;  %v6069_v1 = vld [vmem:[%s8221_s0 + $0x12b] sm:$0xff]  ;;  %v6074_v3 = vld [vmem:[%s8221_s0 + $0x13b] sm:$0xff]  ;;  %v1298_v29 = vmul.f32 0.07927255, %v5977_v22 }
 0x120   :  { %9034 = vst [vmem:[#allocation129_spill] sm:$0xff] %v6042_v33  ;;  %9039 = vst [vmem:[#allocation134_spill] sm:$0xff] %v6069_v1  ;;  %v9041_v30 = vld [vmem:[#allocation114_spill] sm:$0xff]  ;;  %v6090_v52 = vld [vmem:[%s8221_s0 + $0x153] sm:$0xff]  ;;  %v1301_v48 = vmul.f32 0.07927255, %v6001_v36 }
 0x121   :  { %9040 = vst [vmem:[#allocation135_spill] sm:$0xff] %v6074_v3  ;;  %v6080_v26 = vadd.f32 %v1290_v58, %v9041_v30  ;;  %v6085_v42 = vld [vmem:[%s8221_s0 + $0x143] sm:$0xff]  ;;  %9044 = vst [vmem:[#allocation138_spill] sm:$0xff] %v6090_v52  ;;  %v6095_v35 = vld [vmem:[%s8221_s0 + $0x15b] sm:$0xff]  ;;  %v1299_v58 = vmul.f32 0.07927255, %v5982_v61 }
 0x122   :  { %9043 = vst [vmem:[#allocation137_spill] sm:$0xff] %v6085_v42  ;;  %9045 = vst [vmem:[#allocation139_spill] sm:$0xff] %v6095_v35  ;;  %v1300_v30 = vmul.f32 0.07927255, %v5987_v31  ;;  %v9046_v63 = vld [vmem:[#allocation86_spill] sm:$0xff]  ;;  %v6106_v9 = vld [vmem:[%s8221_s0 + $0x16b] sm:$0xff] }
 0x123   :  { %9042 = vst [vmem:[#allocation136_spill] sm:$0xff] %v6080_v26  ;;  %v6101_v37 = vadd.f32 %v1291_v28, %v9046_v63  ;;  %9048 = vst [vmem:[#allocation141_spill] sm:$0xff] %v6106_v9  ;;  %v6111_v11 = vld [vmem:[%s8221_s0 + $0x173] sm:$0xff]  ;;  %v1302_v22 = vmul.f32 0.07927255, %v6006_v34  ;;  %v9050_v31 = vld [vmem:[#allocation15_spill] sm:$0xff]  ;;  %v6139_v26 = vadd.f32 %v1294_v19, %v5867_v16 }
 0x124   :  { %9049 = vst [vmem:[#allocation142_spill] sm:$0xff] %v6111_v11  ;;  %v1303_v61 = vmul.f32 0.07927255, %v6011_v23  ;;  %v6117_v18 = vadd.f32 %v1292_v4, %v9050_v31  ;;  %v6122_v63 = vld [vmem:[%s8221_s0 + $0x19b] sm:$0xff]  ;;  %v6127_v28 = vld [vmem:[%s8221_s0 + $0x1a3] sm:$0xff]  ;;  %v6133_v23 = vadd.f32 %v1293_v54, %v5861_v5 }
 0x125   :  { %9047 = vst [vmem:[#allocation140_spill] sm:$0xff] %v6101_v37  ;;  %9052 = vst [vmem:[#allocation144_spill] sm:$0xff] %v6122_v63  ;;  %v1304_v37 = vmul.f32 0.07927255, %v6025_v21  ;;  %v1305_v36 = vmul.f32 0.07927255, %v6030_v49 }
 0x126   :  { %9051 = vst [vmem:[#allocation143_spill] sm:$0xff] %v6117_v18  ;;  %9053 = vst [vmem:[#allocation145_spill] sm:$0xff] %v6127_v28  ;;  %v1306_v34 = vmul.f32 0.07927255, %v6035_v60  ;;  %v1307_v31 = vmul.f32 0.07927255, %v6047_v53  ;;  %v6145_v60 = vadd.f32 %v1295_v17, %v5873_v13 }
 0x127   :  { %v1308_v4 = vmul.f32 0.07927255, %v6052_v14  ;;  %v1309_v18 = vmul.f32 0.07927255, %v6057_v8  ;;  %v1310_v33 = vmul.f32 0.07927255, %v6064_v47  ;;  %v6151_v8 = vadd.f32 %v1296_v50, %v5879_v46 }
 0x128   :  { %v1311_v21 = vmul.f32 0.07927255, %v6069_v1  ;;  %v1312_v49 = vmul.f32 0.07927255, %v6074_v3  ;;  %v1313_v5 = vmul.f32 0.07927255, %v6085_v42  ;;  %v6157_v3 = vadd.f32 %v1297_v7, %v5885_v55 }
 0x129   :  { %v1314_v54 = vmul.f32 0.07927255, %v6090_v52  ;;  %v1315_v14 = vmul.f32 0.07927255, %v6095_v35  ;;  %v1316_v16 = vmul.f32 0.07927255, %v6106_v9  ;;  %v6163_v35 = vadd.f32 %v1298_v29, %v5891_v0 }
 0x12a   :  { %v1317_v19 = vmul.f32 0.07927255, %v6111_v11  ;;  %v9054_v47 = vld [vmem:[#allocation22_spill] sm:$0xff]  ;;  %v9055_v13 = vld [vmem:[#allocation23_spill] sm:$0xff]  ;;  %v1320_v42 = vmul.f32 0.07927255, %v6122_v63  ;;  %v6166_v46 = vadd.f32 %v1299_v58, %v5894_v41  ;;  %v6169_v50 = vadd.f32 %v1300_v30, %v5897_v62 }
 0x12b   :  { %v1318_v1 = vmul.f32 0.07927255, %v9054_v47  ;;  %v1319_v17 = vmul.f32 0.07927255, %v9055_v13  ;;  %v1321_v52 = vmul.f32 0.07927255, %v6127_v28  ;;  %v6172_v47 = vadd.f32 %v1301_v48, %v5900_v51 }
 0x12c   :  { %v6175_v55 = vadd.f32 %v1302_v22, %v5903_v59  ;;  %v2737_v7 = vld [vmem:[%s8221_s0 + $0x34] sm:$0xff]  ;;  %v2738_v0 = vld [vmem:[%s8221_s0 + $0x3c] sm:$0xff]  ;;  %v6186_v41 = vld [vmem:[%s8221_s0 + $0x4c] sm:$0xff]  ;;  %v6189_v62 = vadd.f32 %v1303_v61, %v5912_v43  ;;  %v6192_v48 = vadd.f32 %v1304_v37, %v5915_v24  ;;  %v6195_v51 = vadd.f32 %v1305_v36, %v5918_v27 }
 0x12d   :  { %9056 = vst [vmem:[#allocation146_spill] sm:$0xff] %v6186_v41  ;;  %v6198_v59 = vadd.f32 %v1306_v34, %v5921_v20  ;;  %v6203_v29 = vld [vmem:[%s8221_s0 + $0x54] sm:$0xff]  ;;  %v6208_v22 = vld [vmem:[%s8221_s0 + $0x64] sm:$0xff]  ;;  %v6213_v37 = vld [vmem:[%s8221_s0 + $0x6c] sm:$0xff]  ;;  %v6216_v43 = vadd.f32 %v1307_v31, %v5939_v25  ;;  %v6219_v24 = vadd.f32 %v1308_v4, %v5942_v39  ;;  %v6222_v27 = vadd.f32 %v1309_v18, %v5945_v56 }
 0x12e   :  { %9057 = vst [vmem:[#allocation90_spill] sm:$0xff] %v6203_v29  ;;  %9058 = vst [vmem:[#allocation94_spill] sm:$0xff] %v6208_v22  ;;  %v6225_v20 = vadd.f32 %v1310_v33, %v5948_v32  ;;  %v6230_v61 = vld [vmem:[%s8221_s0 + $0x7c] sm:$0xff]  ;;  %v6235_v36 = vld [vmem:[%s8221_s0 + $0x84] sm:$0xff]  ;;  %v6243_v18 = vadd.f32 %v1311_v21, %v5966_v40  ;;  %v6246_v39 = vadd.f32 %v1312_v49, %v5969_v10 }
 0x12f   :  { %9059 = vst [vmem:[#allocation147_spill] sm:$0xff] %v6213_v37  ;;  %9060 = vst [vmem:[#allocation148_spill] sm:$0xff] %v6230_v61  ;;  %v6240_v25 = vld [vmem:[%s8221_s0 + $0x94] sm:$0xff]  ;;  %v6249_v56 = vadd.f32 %v1313_v5, %v5972_v2  ;;  %v6252_v32 = vadd.f32 %v1314_v54, %v5990_v38  ;;  %v6257_v34 = vld [vmem:[%s8221_s0 + $0x9c] sm:$0xff]  ;;  %v6270_v10 = vadd.f32 %v1315_v14, %v5993_v44 }
 0x130   :  { %9061 = vst [vmem:[#allocation149_spill] sm:$0xff] %v6235_v36  ;;  %9062 = vst [vmem:[#allocation150_spill] sm:$0xff] %v6240_v25  ;;  %v6262_v33 = vld [vmem:[%s8221_s0 + $0xac] sm:$0xff]  ;;  %v6267_v40 = vld [vmem:[%s8221_s0 + $0xb4] sm:$0xff]  ;;  %v6273_v2 = vadd.f32 %v1316_v16, %v5996_v15  ;;  %v6276_v38 = vadd.f32 %v1317_v19, %v6014_v57  ;;  %v1386_v15 = vmul.f32 0.020157779, %v2737_v7  ;;  %v6294_v14 = vadd.f32 %v1318_v1, %v6017_v6 }
 0x131   :  { %9063 = vst [vmem:[#allocation152_spill] sm:$0xff] %v6257_v34  ;;  %9064 = vst [vmem:[#allocation24_spill] sm:$0xff] %v6262_v33  ;;  %v6281_v21 = vld [vmem:[%s8221_s0 + $0xc4] sm:$0xff]  ;;  %v6286_v49 = vld [vmem:[%s8221_s0 + $0xcc] sm:$0xff]  ;;  %v6297_v57 = vadd.f32 %v1319_v17, %v6020_v45  ;;  %v1387_v6 = vmul.f32 0.020157779, %v2738_v0  ;;  %v6316_v45 = vadd.f32 %v1320_v42, %v6039_v12 }
 0x132   :  { %9065 = vst [vmem:[#allocation25_spill] sm:$0xff] %v6267_v40  ;;  %9066 = vst [vmem:[#allocation27_spill] sm:$0xff] %v6276_v38  ;;  %v6291_v44 = vld [vmem:[%s8221_s0 + $0xdc] sm:$0xff]  ;;  %v6302_v58 = vld [vmem:[%s8221_s0 + $0xe4] sm:$0xff]  ;;  %v1388_v1 = vmul.f32 0.020157779, %v6186_v41 }
 0x133   :  { %9067 = vst [vmem:[#allocation28_spill] sm:$0xff] %v6281_v21  ;;  %9068 = vst [vmem:[#allocation2_spill] sm:$0xff] %v6286_v49  ;;  %v6307_v30 = vld [vmem:[%s8221_s0 + $0xf4] sm:$0xff]  ;;  %v6312_v31 = vld [vmem:[%s8221_s0 + $0xfc] sm:$0xff]  ;;  %v1389_v16 = vmul.f32 0.020157779, %v6203_v29 }
 0x134   :  { %9069 = vst [vmem:[#allocation3_spill] sm:$0xff] %v6291_v44  ;;  %9070 = vst [vmem:[#allocation44_spill] sm:$0xff] %v6294_v14  ;;  %v6321_v4 = vld [vmem:[%s8221_s0 + $0x10c] sm:$0xff]  ;;  %v6326_v5 = vld [vmem:[%s8221_s0 + $0x114] sm:$0xff]  ;;  %v1390_v42 = vmul.f32 0.020157779, %v6208_v22 }
 0x135   :  { %9071 = vst [vmem:[#allocation50_spill] sm:$0xff] %v6297_v57  ;;  %9072 = vst [vmem:[#allocation53_spill] sm:$0xff] %v6302_v58  ;;  %v6331_v54 = vld [vmem:[%s8221_s0 + $0x124] sm:$0xff]  ;;  %v1391_v12 = vmul.f32 0.020157779, %v6213_v37  ;;  %v9079_v19 = vld [vmem:[#allocation129_spill] sm:$0xff]  ;;  %v6405_v57 = vadd.f32 %v1389_v16, %v6133_v23 }
 0x136   :  { %9073 = vst [vmem:[#allocation56_spill] sm:$0xff] %v6307_v30  ;;  %9074 = vst [vmem:[#allocation7_spill] sm:$0xff] %v6312_v31  ;;  %v6337_v13 = vadd.f32 %v1321_v52, %v9079_v19  ;;  %v6342_v17 = vld [vmem:[%s8221_s0 + $0x12c] sm:$0xff]  ;;  %v6347_v7 = vld [vmem:[%s8221_s0 + $0x13c] sm:$0xff]  ;;  %v1392_v37 = vmul.f32 0.020157779, %v6230_v61 }
 0x137   :  { %9075 = vst [vmem:[#allocation8_spill] sm:$0xff] %v6316_v45  ;;  %9076 = vst [vmem:[#allocation73_spill] sm:$0xff] %v6321_v4  ;;  %v6352_v0 = vld [vmem:[%s8221_s0 + $0x144] sm:$0xff]  ;;  %v1393_v52 = vmul.f32 0.020157779, %v6235_v36  ;;  %v6360_v22 = vld [vmem:[%s8221_s0 + $0x154] sm:$0xff] }
 0x138   :  { %9077 = vst [vmem:[#allocation6_spill] sm:$0xff] %v6326_v5  ;;  %9078 = vst [vmem:[#allocation9_spill] sm:$0xff] %v6331_v54  ;;  %v1394_v19 = vmul.f32 0.020157779, %v6240_v25  ;;  %v6365_v29 = vld [vmem:[%s8221_s0 + $0x15c] sm:$0xff]  ;;  %v6370_v41 = vld [vmem:[%s8221_s0 + $0x16c] sm:$0xff] }
 0x139   :  { %9080 = vst [vmem:[#allocation87_spill] sm:$0xff] %v6337_v13  ;;  %9081 = vst [vmem:[#allocation89_spill] sm:$0xff] %v6342_v17  ;;  %v1395_v61 = vmul.f32 0.020157779, %v6257_v34  ;;  %v1396_v36 = vmul.f32 0.020157779, %v6262_v33 }
 0x13a   :  { %9082 = vst [vmem:[#allocation12_spill] sm:$0xff] %v6347_v7  ;;  %9083 = vst [vmem:[#allocation13_spill] sm:$0xff] %v6352_v0  ;;  %v1397_v25 = vmul.f32 0.020157779, %v6267_v40  ;;  %v9087_v28 = vld [vmem:[#allocation136_spill] sm:$0xff]  ;;  %v6390_v40 = vld [vmem:[%s8221_s0 + $0x19c] sm:$0xff] }
 0x13b   :  { %9084 = vst [vmem:[#allocation108_spill] sm:$0xff] %v6360_v22  ;;  %9085 = vst [vmem:[#allocation114_spill] sm:$0xff] %v6365_v29  ;;  %v6376_v63 = vadd.f32 %v1386_v15, %v9087_v28  ;;  %v6381_v11 = vld [vmem:[%s8221_s0 + $0x174] sm:$0xff]  ;;  %v1398_v9 = vmul.f32 0.020157779, %v6281_v21  ;;  %v6395_v28 = vld [vmem:[%s8221_s0 + $0x1a4] sm:$0xff] }
 0x13c   :  { %9086 = vst [vmem:[#allocation86_spill] sm:$0xff] %v6370_v41  ;;  %9089 = vst [vmem:[#allocation22_spill] sm:$0xff] %v6381_v11  ;;  %v1399_v53 = vmul.f32 0.020157779, %v6286_v49  ;;  %v1400_v13 = vmul.f32 0.020157779, %v6291_v44 }
 0x13d   :  { %9088 = vst [vmem:[#allocation15_spill] sm:$0xff] %v6376_v63  ;;  %v9090_v45 = vld [vmem:[#allocation140_spill] sm:$0xff]  ;;  %9091 = vst [vmem:[#allocation23_spill] sm:$0xff] %v6390_v40  ;;  %v1401_v15 = vmul.f32 0.020157779, %v6302_v58  ;;  %v9093_v33 = vld [vmem:[#allocation143_spill] sm:$0xff] }
 0x13e   :  { %v1419_v34 = vadd.f32 %v1387_v6, %v9090_v45  ;;  %9092 = vst [vmem:[#allocation129_spill] sm:$0xff] %v6395_v28  ;;  %v1402_v21 = vmul.f32 0.020157779, %v6307_v30  ;;  %v1403_v49 = vmul.f32 0.020157779, %v6312_v31  ;;  %v1420_v44 = vadd.f32 %v1388_v1, %v9093_v33  ;;  %v9094_v16 = vld [vmem:[#allocation26_spill] sm:$0xff] }
 0x13f   :  { %v1404_v6 = vmul.f32 0.020157779, %v6321_v4  ;;  %v1405_v45 = vmul.f32 0.020157779, %v6326_v5  ;;  %v1406_v63 = vmul.f32 0.020157779, %v6331_v54  ;;  %v6411_v30 = vadd.f32 %v1390_v42, %v6139_v26 }
 0x140   :  { %v1407_v14 = vmul.f32 0.020157779, %v6342_v17  ;;  %v1408_v38 = vmul.f32 0.020157779, %v6347_v7  ;;  %v1409_v58 = vmul.f32 0.020157779, %v6352_v0  ;;  %v6417_v54 = vadd.f32 %v1391_v12, %v6145_v60 }
 0x141   :  { %v1410_v33 = vmul.f32 0.020157779, %v6360_v22  ;;  %v1411_v1 = vmul.f32 0.020157779, %v6365_v29  ;;  %v1412_v5 = vmul.f32 0.020157779, %v6370_v41  ;;  %v6423_v0 = vadd.f32 %v1392_v37, %v6151_v8 }
 0x142   :  { %v1413_v23 = vmul.f32 0.020157779, %v6381_v11  ;;  %v1414_v17 = vmul.f32 0.020157779, %v9094_v16  ;;  %v9095_v4 = vld [vmem:[#allocation151_spill] sm:$0xff]  ;;  %v6428_v29 = vadd.f32 %v1393_v52, %v6157_v3  ;;  %v6431_v41 = vadd.f32 %v1394_v19, %v6163_v35  ;;  %v9106_v52 = vld [vmem:[#allocation34_spill] sm:$0xff] }
 0x143   :  { %v1415_v7 = vmul.f32 0.020157779, %v9095_v4  ;;  %v1416_v26 = vmul.f32 0.020157779, %v6390_v40  ;;  %v1417_v42 = vmul.f32 0.020157779, %v6395_v28  ;;  %v6434_v60 = vadd.f32 %v1395_v61, %v6166_v46 }
 0x144   :  { %v6437_v12 = vadd.f32 %v1396_v36, %v6169_v50  ;;  %v6440_v4 = vadd.f32 %v1397_v25, %v6172_v47  ;;  %v6443_v8 = vadd.f32 %v1398_v9, %v6175_v55  ;;  %v6446_v37 = vadd.f32 %v1399_v53, %v6189_v62  ;;  %v9098_v61 = vld [vmem:[#allocation27_spill] sm:$0xff]  ;;  %v9099_v25 = vld [vmem:[#allocation44_spill] sm:$0xff]  ;;  %v9129_v11 = vld [vmem:[#allocation49_spill] sm:$0xff] }
 0x145   :  { %v6449_v3 = vadd.f32 %v1400_v13, %v6192_v48  ;;  %v6452_v35 = vadd.f32 %v1401_v15, %v6195_v51  ;;  %v6455_v46 = vadd.f32 %v1402_v21, %v6198_v59  ;;  %v6458_v50 = vadd.f32 %v1403_v49, %v6216_v43  ;;  %v9096_v51 = vld [vmem:[#allocation29_spill] sm:$0xff]  ;;  %v9102_v21 = vld [vmem:[#allocation8_spill] sm:$0xff]  ;;  %v9107_v15 = vld [vmem:[#allocation35_spill] sm:$0xff] }
 0x146   :  { %v6461_v47 = vadd.f32 %v1404_v6, %v6219_v24  ;;  %v6464_v9 = vadd.f32 %v1405_v45, %v6222_v27  ;;  %v6467_v53 = vadd.f32 %v1406_v63, %v6225_v20  ;;  %v6470_v55 = vadd.f32 %v1407_v14, %v6243_v18  ;;  %v9097_v27 = vld [vmem:[#allocation30_spill] sm:$0xff]  ;;  %v9108_v6 = vld [vmem:[#allocation36_spill] sm:$0xff]  ;;  %v9111_v16 = vld [vmem:[#allocation39_spill] sm:$0xff] }
 0x147   :  { %v6473_v62 = vadd.f32 %v1408_v38, %v6246_v39  ;;  %v6476_v48 = vadd.f32 %v1409_v58, %v6249_v56  ;;  %v1483_v59 = vmul.f32 0.015719416, %v9096_v51  ;;  %v6480_v43 = vadd.f32 %v1410_v33, %v6252_v32  ;;  %v9100_v39 = vld [vmem:[#allocation50_spill] sm:$0xff]  ;;  %v9101_v38 = vld [vmem:[#allocation31_spill] sm:$0xff]  ;;  %v9112_v51 = vld [vmem:[#allocation37_spill] sm:$0xff] }
 0x148   :  { %v6483_v24 = vadd.f32 %v1411_v1, %v6270_v10  ;;  %v6486_v63 = vadd.f32 %v1412_v5, %v6273_v2  ;;  %v1484_v20 = vmul.f32 0.015719416, %v9097_v27  ;;  %v6490_v36 = vadd.f32 %v1413_v23, %v9098_v61  ;;  %v9103_v10 = vld [vmem:[#allocation87_spill] sm:$0xff]  ;;  %v9104_v2 = vld [vmem:[#allocation32_spill] sm:$0xff]  ;;  %v9105_v5 = vld [vmem:[#allocation33_spill] sm:$0xff] }
 0x149   :  { %v6493_v18 = vadd.f32 %v1414_v17, %v9099_v25  ;;  %v6496_v56 = vadd.f32 %v1415_v7, %v9100_v39  ;;  %v1485_v32 = vmul.f32 0.015719416, %v9101_v38  ;;  %v6500_v49 = vadd.f32 %v1416_v26, %v9102_v21  ;;  %v9109_v7 = vld [vmem:[#allocation15_spill] sm:$0xff]  ;;  %v9110_v1 = vld [vmem:[#allocation38_spill] sm:$0xff]  ;;  %v9117_v38 = vld [vmem:[#allocation41_spill] sm:$0xff] }
 0x14a   :  { %v6503_v14 = vadd.f32 %v1417_v42, %v9103_v10  ;;  %v1486_v58 = vmul.f32 0.015719416, %v9104_v2  ;;  %v1487_v13 = vmul.f32 0.015719416, %v9105_v5  ;;  %v1488_v19 = vmul.f32 0.015719416, %v9106_v52 }
 0x14b   :  { %v1489_v17 = vmul.f32 0.015719416, %v9107_v15  ;;  %v1490_v45 = vmul.f32 0.015719416, %v9108_v6  ;;  %v6511_v33 = vadd.f32 %v1483_v59, %v9109_v7  ;;  %v1491_v23 = vmul.f32 0.015719416, %v9110_v1 }
 0x14c   :  { %v1492_v26 = vmul.f32 0.015719416, %v9111_v16  ;;  %v1493_v42 = vmul.f32 0.015719416, %v9112_v51  ;;  %v6516_v27 = vadd.f32 %v1484_v20, %v1419_v34  ;;  %v6521_v61 = vld [vmem:[%s8221_s0 + $0x180] sm:$0xff]  ;;  %v6526_v25 = vld [vmem:[%s8221_s0 + $0x188] sm:$0xff]  ;;  %v6531_v5 = vadd.f32 %v1485_v32, %v1420_v44 }
 0x14d   :  { %9114 = vst [vmem:[#allocation140_spill] sm:$0xff] %v6521_v61  ;;  %9115 = vst [vmem:[#allocation143_spill] sm:$0xff] %v6526_v25  ;;  %v9116_v59 = vld [vmem:[#allocation40_spill] sm:$0xff]  ;;  %v1495_v21 = vmul.f32 0.015719416, %v9117_v38  ;;  %v9118_v10 = vld [vmem:[#allocation42_spill] sm:$0xff]  ;;  %v6547_v51 = vadd.f32 %v1486_v58, %v6405_v57  ;;  %v6553_v40 = vadd.f32 %v1487_v13, %v6411_v30 }
 0x14e   :  { %9113 = vst [vmem:[#allocation136_spill] sm:$0xff] %v6516_v27  ;;  %v1494_v39 = vmul.f32 0.015719416, %v9116_v59  ;;  %v1496_v2 = vmul.f32 0.015719416, %v9118_v10  ;;  %9119 = vst [vmem:[#allocation26_spill] sm:$0xff] %v6531_v5 }
 0x14f   :  { %v6536_v34 = vld [vmem:[%s8221_s0 + $0x1b0] sm:$0xff]  ;;  %v6541_v20 = vld [vmem:[%s8221_s0 + $0x1b8] sm:$0xff]  ;;  %v9122_v52 = vld [vmem:[#allocation43_spill] sm:$0xff]  ;;  %9125 = vst [vmem:[#allocation30_spill] sm:$0xff] %v6547_v51  ;;  %v1503_v22 = vmul.f32 0.015719416, %v9129_v11 }
 0x150   :  { %9120 = vst [vmem:[#allocation151_spill] sm:$0xff] %v6536_v34  ;;  %9121 = vst [vmem:[#allocation29_spill] sm:$0xff] %v6541_v20  ;;  %v1497_v15 = vmul.f32 0.015719416, %v9122_v52  ;;  %v9123_v6 = vld [vmem:[#allocation45_spill] sm:$0xff]  ;;  %v9124_v1 = vld [vmem:[#allocation46_spill] sm:$0xff] }
 0x151   :  { %v1498_v7 = vmul.f32 0.015719416, %v9123_v6  ;;  %v1499_v16 = vmul.f32 0.015719416, %v9124_v1  ;;  %v9126_v44 = vld [vmem:[#allocation47_spill] sm:$0xff]  ;;  %v9127_v59 = vld [vmem:[#allocation48_spill] sm:$0xff]  ;;  %v6559_v1 = vadd.f32 %v1488_v19, %v6417_v54 }
 0x152   :  { %v1500_v32 = vmul.f32 0.015719416, %v9126_v44  ;;  %v1501_v38 = vmul.f32 0.015719416, %v9127_v59  ;;  %v9128_v10 = vld [vmem:[#allocation4_spill] sm:$0xff]  ;;  %v9130_v31 = vld [vmem:[#allocation51_spill] sm:$0xff] }
 0x153   :  { %v1502_v28 = vmul.f32 0.015719416, %v9128_v10  ;;  %v1504_v52 = vmul.f32 0.015719416, %v9130_v31  ;;  %v9131_v5 = vld [vmem:[#allocation5_spill] sm:$0xff]  ;;  %v9132_v57 = vld [vmem:[#allocation52_spill] sm:$0xff]  ;;  %v6565_v10 = vadd.f32 %v1489_v17, %v6423_v0  ;;  %v6580_v0 = vadd.f32 %v1492_v26, %v6434_v60 }
 0x154   :  { %v1505_v6 = vmul.f32 0.015719416, %v9131_v5  ;;  %v1506_v58 = vmul.f32 0.015719416, %v9132_v57  ;;  %v9133_v51 = vld [vmem:[#allocation54_spill] sm:$0xff]  ;;  %v9134_v27 = vld [vmem:[#allocation55_spill] sm:$0xff]  ;;  %v6571_v5 = vadd.f32 %v1490_v45, %v6428_v29  ;;  %v6583_v17 = vadd.f32 %v1493_v42, %v6437_v12 }
 0x155   :  { %v1507_v44 = vmul.f32 0.015719416, %v9133_v51  ;;  %v1508_v59 = vmul.f32 0.015719416, %v9134_v27  ;;  %v1509_v30 = vmul.f32 0.015719416, %v6521_v61  ;;  %v6577_v27 = vadd.f32 %v1491_v23, %v6431_v41 }
 0x156   :  { %v1510_v11 = vmul.f32 0.015719416, %v6526_v25  ;;  %v9135_v13 = vld [vmem:[#allocation57_spill] sm:$0xff]  ;;  %v9136_v54 = vld [vmem:[#allocation58_spill] sm:$0xff]  ;;  %v1513_v57 = vmul.f32 0.015719416, %v6536_v34  ;;  %v6589_v29 = vadd.f32 %v1495_v21, %v6443_v8  ;;  %v6592_v45 = vadd.f32 %v1496_v2, %v6446_v37 }
 0x157   :  { %v1511_v31 = vmul.f32 0.015719416, %v9135_v13  ;;  %v1512_v19 = vmul.f32 0.015719416, %v9136_v54  ;;  %v1514_v51 = vmul.f32 0.015719416, %v6541_v20  ;;  %v6586_v13 = vadd.f32 %v1494_v39, %v6440_v4 }
 0x158   :  { %v6595_v54 = vadd.f32 %v1497_v15, %v6449_v3  ;;  %v6598_v41 = vadd.f32 %v1498_v7, %v6452_v35  ;;  %v6601_v60 = vadd.f32 %v1499_v16, %v6455_v46  ;;  %v6604_v12 = vadd.f32 %v1500_v32, %v6458_v50  ;;  %v9137_v50 = vld [vmem:[#allocation59_spill] sm:$0xff]  ;;  %v9139_v26 = vld [vmem:[#allocation62_spill] sm:$0xff]  ;;  %v9141_v21 = vld [vmem:[#allocation64_spill] sm:$0xff] }
 0x159   :  { %v6607_v4 = vadd.f32 %v1501_v38, %v6461_v47  ;;  %v6610_v8 = vadd.f32 %v1502_v28, %v6464_v9  ;;  %v6613_v37 = vadd.f32 %v1503_v22, %v6467_v53  ;;  %v6616_v3 = vadd.f32 %v1504_v52, %v6470_v55  ;;  %v9138_v9 = vld [vmem:[#allocation61_spill] sm:$0xff]  ;;  %v9143_v7 = vld [vmem:[#allocation66_spill] sm:$0xff]  ;;  %v9144_v16 = vld [vmem:[#allocation67_spill] sm:$0xff] }
 0x15a   :  { %v6619_v35 = vadd.f32 %v1505_v6, %v6473_v62  ;;  %v6622_v46 = vadd.f32 %v1506_v58, %v6476_v48  ;;  %v1579_v23 = vmul.f32 0.040059876, %v9137_v50  ;;  %v6626_v47 = vadd.f32 %v1507_v44, %v6480_v43  ;;  %v9145_v38 = vld [vmem:[#allocation68_spill] sm:$0xff]  ;;  %v9147_v58 = vld [vmem:[#allocation70_spill] sm:$0xff]  ;;  %v9167_v34 = vld [vmem:[#allocation81_spill] sm:$0xff] }
 0x15b   :  { %v6629_v28 = vadd.f32 %v1508_v59, %v6483_v24  ;;  %v6632_v22 = vadd.f32 %v1509_v30, %v6486_v63  ;;  %v1580_v53 = vmul.f32 0.040059876, %v9138_v9  ;;  %v6636_v55 = vadd.f32 %v1510_v11, %v6490_v36  ;;  %v9140_v63 = vld [vmem:[#allocation63_spill] sm:$0xff]  ;;  %v9142_v36 = vld [vmem:[#allocation65_spill] sm:$0xff]  ;;  %v9148_v44 = vld [vmem:[#allocation136_spill] sm:$0xff] }
 0x15c   :  { %v6639_v62 = vadd.f32 %v1511_v31, %v6493_v18  ;;  %v6642_v48 = vadd.f32 %v1512_v19, %v6496_v56  ;;  %v1581_v43 = vmul.f32 0.040059876, %v9139_v26  ;;  %v6646_v42 = vadd.f32 %v1513_v57, %v6500_v49  ;;  %v9146_v49 = vld [vmem:[#allocation69_spill] sm:$0xff]  ;;  %v6668_v30 = vld [vmem:[%s8221_s0 + $0x181] sm:$0xff]  ;;  %v6673_v11 = vld [vmem:[%s8221_s0 + $0x189] sm:$0xff] }
 0x15d   :  { %v6649_v24 = vadd.f32 %v1514_v51, %v6503_v14  ;;  %v1582_v39 = vmul.f32 0.040059876, %v9140_v63  ;;  %v1583_v2 = vmul.f32 0.040059876, %v9141_v21  ;;  %v1584_v15 = vmul.f32 0.040059876, %v9142_v36 }
 0x15e   :  { %v1585_v18 = vmul.f32 0.040059876, %v9143_v7  ;;  %v1586_v32 = vmul.f32 0.040059876, %v9144_v16  ;;  %v6657_v56 = vadd.f32 %v1579_v23, %v6511_v33  ;;  %v1587_v52 = vmul.f32 0.040059876, %v9145_v38 }
 0x15f   :  { %v1588_v6 = vmul.f32 0.040059876, %v9146_v49  ;;  %v1589_v14 = vmul.f32 0.040059876, %v9147_v58  ;;  %v6663_v59 = vadd.f32 %v1580_v53, %v9148_v44  ;;  %9150 = vst [vmem:[#allocation44_spill] sm:$0xff] %v6668_v30  ;;  %9151 = vst [vmem:[#allocation50_spill] sm:$0xff] %v6673_v11  ;;  %v6701_v20 = vadd.f32 %v1583_v2, %v6553_v40 }
 0x160   :  { %v9152_v33 = vld [vmem:[#allocation71_spill] sm:$0xff]  ;;  %v9153_v19 = vld [vmem:[#allocation72_spill] sm:$0xff]  ;;  %v9154_v51 = vld [vmem:[#allocation74_spill] sm:$0xff]  ;;  %v1599_v25 = vmul.f32 0.040059876, %v9167_v34 }
 0x161   :  { %9149 = vst [vmem:[#allocation27_spill] sm:$0xff] %v6663_v59  ;;  %v1590_v31 = vmul.f32 0.040059876, %v9152_v33  ;;  %v1591_v57 = vmul.f32 0.040059876, %v9153_v19  ;;  %v9155_v23 = vld [vmem:[#allocation26_spill] sm:$0xff] }
 0x162   :  { %v1592_v50 = vmul.f32 0.040059876, %v9154_v51  ;;  %v6679_v9 = vadd.f32 %v1581_v43, %v9155_v23  ;;  %v6684_v53 = vld [vmem:[%s8221_s0 + $0x1b1] sm:$0xff]  ;;  %v6689_v26 = vld [vmem:[%s8221_s0 + $0x1b9] sm:$0xff]  ;;  %v9159_v63 = vld [vmem:[#allocation75_spill] sm:$0xff] }
 0x163   :  { %9157 = vst [vmem:[#allocation8_spill] sm:$0xff] %v6684_v53  ;;  %9158 = vst [vmem:[#allocation87_spill] sm:$0xff] %v6689_v26  ;;  %v1593_v21 = vmul.f32 0.040059876, %v9159_v63  ;;  %v9160_v36 = vld [vmem:[#allocation76_spill] sm:$0xff]  ;;  %v9161_v16 = vld [vmem:[#allocation77_spill] sm:$0xff] }
 0x164   :  { %9156 = vst [vmem:[#allocation31_spill] sm:$0xff] %v6679_v9  ;;  %v1594_v7 = vmul.f32 0.040059876, %v9160_v36  ;;  %v1595_v38 = vmul.f32 0.040059876, %v9161_v16  ;;  %v9162_v49 = vld [vmem:[#allocation30_spill] sm:$0xff]  ;;  %v6707_v16 = vadd.f32 %v1584_v15, %v6559_v1 }
 0x165   :  { %v6695_v58 = vadd.f32 %v1582_v39, %v9162_v49  ;;  %v9164_v43 = vld [vmem:[#allocation78_spill] sm:$0xff]  ;;  %v9165_v33 = vld [vmem:[#allocation79_spill] sm:$0xff]  ;;  %v9166_v51 = vld [vmem:[#allocation80_spill] sm:$0xff]  ;;  %v1605_v40 = vmul.f32 0.040059876, %v6668_v30 }
 0x166   :  { %v1596_v44 = vmul.f32 0.040059876, %v9164_v43  ;;  %v1597_v19 = vmul.f32 0.040059876, %v9165_v33  ;;  %v1598_v23 = vmul.f32 0.040059876, %v9166_v51  ;;  %v6713_v51 = vadd.f32 %v1585_v18, %v6565_v10 }
 0x167   :  { %9163 = vst [vmem:[#allocation32_spill] sm:$0xff] %v6695_v58  ;;  %v9168_v61 = vld [vmem:[#allocation83_spill] sm:$0xff]  ;;  %v9169_v9 = vld [vmem:[#allocation10_spill] sm:$0xff]  ;;  %v9170_v39 = vld [vmem:[#allocation84_spill] sm:$0xff]  ;;  %v1606_v34 = vmul.f32 0.040059876, %v6673_v11  ;;  %v6728_v10 = vadd.f32 %v1588_v6, %v6580_v0  ;;  %v6731_v18 = vadd.f32 %v1589_v14, %v6583_v17  ;;  %v6749_v0 = vadd.f32 %v1595_v38, %v6601_v60 }
 0x168   :  { %v1600_v63 = vmul.f32 0.040059876, %v9168_v61  ;;  %v1601_v36 = vmul.f32 0.040059876, %v9169_v9  ;;  %v1602_v49 = vmul.f32 0.040059876, %v9170_v39  ;;  %v6719_v9 = vadd.f32 %v1586_v32, %v6571_v5 }
 0x169   :  { %v9171_v58 = vld [vmem:[#allocation85_spill] sm:$0xff]  ;;  %v9172_v59 = vld [vmem:[#allocation88_spill] sm:$0xff]  ;;  %v9173_v2 = vld [vmem:[#allocation91_spill] sm:$0xff]  ;;  %v1609_v39 = vmul.f32 0.040059876, %v6684_v53  ;;  %v6737_v5 = vadd.f32 %v1591_v57, %v6589_v29  ;;  %v6740_v32 = vadd.f32 %v1592_v50, %v6592_v45  ;;  %v6752_v17 = vadd.f32 %v1596_v44, %v6604_v12 }
 0x16a   :  { %v1603_v43 = vmul.f32 0.040059876, %v9171_v58  ;;  %v1604_v33 = vmul.f32 0.040059876, %v9172_v59  ;;  %v1607_v61 = vmul.f32 0.040059876, %v9173_v2  ;;  %v6725_v59 = vadd.f32 %v1587_v52, %v6577_v27 }
 0x16b   :  { %v9174_v1 = vld [vmem:[#allocation92_spill] sm:$0xff]  ;;  %v1610_v58 = vmul.f32 0.040059876, %v6689_v26  ;;  %v6734_v2 = vadd.f32 %v1590_v31, %v6586_v13  ;;  %v6746_v27 = vadd.f32 %v1594_v7, %v6598_v41  ;;  %v6755_v13 = vadd.f32 %v1597_v19, %v6607_v4  ;;  %v9177_v52 = vld [vmem:[#allocation95_spill] sm:$0xff]  ;;  %v9181_v57 = vld [vmem:[#allocation97_spill] sm:$0xff] }
 0x16c   :  { %v1608_v15 = vmul.f32 0.040059876, %v9174_v1  ;;  %v6743_v1 = vadd.f32 %v1593_v21, %v6595_v54  ;;  %v6758_v29 = vadd.f32 %v1598_v23, %v6610_v8  ;;  %v6761_v45 = vadd.f32 %v1599_v25, %v6613_v37  ;;  %v9175_v37 = vld [vmem:[#allocation93_spill] sm:$0xff]  ;;  %v9178_v6 = vld [vmem:[#allocation96_spill] sm:$0xff]  ;;  %v9182_v50 = vld [vmem:[#allocation98_spill] sm:$0xff] }
 0x16d   :  { %v6764_v54 = vadd.f32 %v1600_v63, %v6616_v3  ;;  %v6767_v41 = vadd.f32 %v1601_v36, %v6619_v35  ;;  %v6770_v60 = vadd.f32 %v1602_v49, %v6622_v46  ;;  %v6773_v12 = vadd.f32 %v1603_v43, %v6626_v47  ;;  %v9186_v19 = vld [vmem:[#allocation101_spill] sm:$0xff]  ;;  %v9188_v63 = vld [vmem:[#allocation102_spill] sm:$0xff]  ;;  %v9189_v49 = vld [vmem:[#allocation103_spill] sm:$0xff] }
 0x16e   :  { %v6776_v4 = vadd.f32 %v1604_v33, %v6629_v28  ;;  %v6779_v8 = vadd.f32 %v1605_v40, %v6632_v22  ;;  %v6782_v25 = vadd.f32 %v1606_v34, %v6636_v55  ;;  %v1675_v3 = vmul.f32 0.07927255, %v9175_v37  ;;  %v9180_v22 = vld [vmem:[#allocation60_spill] sm:$0xff]  ;;  %v9195_v37 = vld [vmem:[#allocation107_spill] sm:$0xff]  ;;  %v9208_v30 = vld [vmem:[#allocation82_spill] sm:$0xff] }
 0x16f   :  { %v6786_v35 = vadd.f32 %v1607_v61, %v6639_v62  ;;  %v6789_v46 = vadd.f32 %v1608_v15, %v6642_v48  ;;  %v1676_v47 = vmul.f32 0.07927255, %v9177_v52  ;;  %v1677_v14 = vmul.f32 0.07927255, %v9178_v6  ;;  %v9184_v62 = vld [vmem:[#allocation99_spill] sm:$0xff]  ;;  %v9185_v48 = vld [vmem:[#allocation100_spill] sm:$0xff] }
 0x170   :  { %v6794_v28 = vadd.f32 %v1609_v39, %v6646_v42  ;;  %v1678_v31 = vmul.f32 0.07927255, %v9180_v22  ;;  %v1679_v55 = vmul.f32 0.07927255, %v9181_v57  ;;  %v1680_v21 = vmul.f32 0.07927255, %v9182_v50 }
 0x171   :  { %9176 = vst [vmem:[#allocation33_spill] sm:$0xff] %v6789_v46  ;;  %v6800_v7 = vadd.f32 %v1610_v58, %v6649_v24  ;;  %v1681_v38 = vmul.f32 0.07927255, %v9184_v62  ;;  %v1682_v44 = vmul.f32 0.07927255, %v9185_v48  ;;  %v6808_v42 = vld [vmem:[%s8221_s0 + $0x182] sm:$0xff]  ;;  %v6814_v24 = vadd.f32 %v1675_v3, %v6657_v56 }
 0x172   :  { %9179 = vst [vmem:[#allocation34_spill] sm:$0xff] %v6794_v28  ;;  %v1683_v23 = vmul.f32 0.07927255, %v9186_v19  ;;  %9187 = vst [vmem:[#allocation36_spill] sm:$0xff] %v6808_v42  ;;  %v1684_v36 = vmul.f32 0.07927255, %v9188_v63 }
 0x173   :  { %9183 = vst [vmem:[#allocation35_spill] sm:$0xff] %v6800_v7  ;;  %v1685_v43 = vmul.f32 0.07927255, %v9189_v49  ;;  %v9190_v33 = vld [vmem:[#allocation104_spill] sm:$0xff]  ;;  %9191 = vst [vmem:[#allocation15_spill] sm:$0xff] %v6814_v24  ;;  %v9193_v61 = vld [vmem:[#allocation105_spill] sm:$0xff] }
 0x174   :  { %v1686_v40 = vmul.f32 0.07927255, %v9190_v33  ;;  %v6819_v34 = vld [vmem:[%s8221_s0 + $0x18a] sm:$0xff]  ;;  %v1687_v15 = vmul.f32 0.07927255, %v9193_v61  ;;  %v9194_v39 = vld [vmem:[#allocation106_spill] sm:$0xff] }
 0x175   :  { %9192 = vst [vmem:[#allocation38_spill] sm:$0xff] %v6819_v34  ;;  %v1688_v58 = vmul.f32 0.07927255, %v9194_v39  ;;  %v1689_v52 = vmul.f32 0.07927255, %v9195_v37  ;;  %v9196_v6 = vld [vmem:[#allocation27_spill] sm:$0xff] }
 0x176   :  { %v1708_v22 = vadd.f32 %v1676_v47, %v9196_v6  ;;  %v6828_v57 = vld [vmem:[%s8221_s0 + $0x1b2] sm:$0xff]  ;;  %v6833_v56 = vld [vmem:[%s8221_s0 + $0x1ba] sm:$0xff]  ;;  %v9201_v19 = vld [vmem:[#allocation111_spill] sm:$0xff]  ;;  %v1696_v24 = vmul.f32 0.07927255, %v9208_v30 }
 0x177   :  { %9197 = vst [vmem:[#allocation39_spill] sm:$0xff] %v6828_v57  ;;  %9198 = vst [vmem:[#allocation37_spill] sm:$0xff] %v6833_v56  ;;  %v9199_v3 = vld [vmem:[#allocation109_spill] sm:$0xff]  ;;  %v9200_v62 = vld [vmem:[#allocation110_spill] sm:$0xff]  ;;  %v1692_v63 = vmul.f32 0.07927255, %v9201_v19 }
 0x178   :  { %v1690_v50 = vmul.f32 0.07927255, %v9199_v3  ;;  %v1691_v48 = vmul.f32 0.07927255, %v9200_v62  ;;  %v9202_v49 = vld [vmem:[#allocation31_spill] sm:$0xff]  ;;  %v9203_v61 = vld [vmem:[#allocation112_spill] sm:$0xff]  ;;  %v6849_v62 = vadd.f32 %v1679_v55, %v6701_v20 }
 0x179   :  { %v1709_v33 = vadd.f32 %v1677_v14, %v9202_v49  ;;  %v1693_v47 = vmul.f32 0.07927255, %v9203_v61  ;;  %v9204_v39 = vld [vmem:[#allocation113_spill] sm:$0xff]  ;;  %v9205_v6 = vld [vmem:[#allocation11_spill] sm:$0xff]  ;;  %v9206_v53 = vld [vmem:[#allocation32_spill] sm:$0xff] }
 0x17a   :  { %v1694_v37 = vmul.f32 0.07927255, %v9204_v39  ;;  %v1695_v26 = vmul.f32 0.07927255, %v9205_v6  ;;  %v6843_v11 = vadd.f32 %v1678_v31, %v9206_v53  ;;  %v9209_v7 = vld [vmem:[#allocation115_spill] sm:$0xff]  ;;  %v9210_v3 = vld [vmem:[#allocation14_spill] sm:$0xff]  ;;  %v6855_v6 = vadd.f32 %v1680_v21, %v6707_v16 }
 0x17b   :  { %v1697_v28 = vmul.f32 0.07927255, %v9209_v7  ;;  %v1698_v46 = vmul.f32 0.07927255, %v9210_v3  ;;  %v9211_v19 = vld [vmem:[#allocation116_spill] sm:$0xff]  ;;  %v9212_v49 = vld [vmem:[#allocation117_spill] sm:$0xff]  ;;  %v6861_v3 = vadd.f32 %v1681_v38, %v6713_v51  ;;  %v6872_v16 = vadd.f32 %v1684_v36, %v6728_v10 }
 0x17c   :  { %9207 = vst [vmem:[#allocation40_spill] sm:$0xff] %v6843_v11  ;;  %v1699_v14 = vmul.f32 0.07927255, %v9211_v19  ;;  %v1700_v61 = vmul.f32 0.07927255, %v9212_v49  ;;  %v9213_v31 = vld [vmem:[#allocation118_spill] sm:$0xff]  ;;  %v6866_v19 = vadd.f32 %v1682_v44, %v6719_v9  ;;  %v6869_v49 = vadd.f32 %v1683_v23, %v6725_v59 }
 0x17d   :  { %v1701_v39 = vmul.f32 0.07927255, %v6808_v42  ;;  %v1702_v53 = vmul.f32 0.07927255, %v6819_v34  ;;  %v1703_v30 = vmul.f32 0.07927255, %v9213_v31  ;;  %v6875_v21 = vadd.f32 %v1685_v43, %v6731_v18 }
 0x17e   :  { %v9214_v11 = vld [vmem:[#allocation119_spill] sm:$0xff]  ;;  %v1705_v20 = vmul.f32 0.07927255, %v6828_v57  ;;  %v1706_v55 = vmul.f32 0.07927255, %v6833_v56  ;;  %v6881_v51 = vadd.f32 %v1687_v15, %v6737_v5  ;;  %v6884_v38 = vadd.f32 %v1688_v58, %v6740_v32  ;;  %v9219_v36 = vld [vmem:[#allocation34_spill] sm:$0xff] }
 0x17f   :  { %v1704_v7 = vmul.f32 0.07927255, %v9214_v11  ;;  %v6878_v11 = vadd.f32 %v1686_v40, %v6734_v2  ;;  %v6887_v9 = vadd.f32 %v1689_v52, %v6743_v1  ;;  %v6890_v59 = vadd.f32 %v1690_v50, %v6746_v27  ;;  %v9222_v15 = vld [vmem:[#allocation124_spill] sm:$0xff]  ;;  %v9224_v50 = vld [vmem:[#allocation125_spill] sm:$0xff]  ;;  %v9229_v31 = vld [vmem:[#allocation126_spill] sm:$0xff] }
 0x180   :  { %v6893_v10 = vadd.f32 %v1691_v48, %v6749_v0  ;;  %v6896_v18 = vadd.f32 %v1692_v63, %v6752_v17  ;;  %v6899_v2 = vadd.f32 %v1693_v47, %v6755_v13  ;;  %v6902_v5 = vadd.f32 %v1694_v37, %v6758_v29  ;;  %v9215_v17 = vld [vmem:[#allocation120_spill] sm:$0xff]  ;;  %v9225_v48 = vld [vmem:[#allocation17_spill] sm:$0xff]  ;;  %v9226_v47 = vld [vmem:[#allocation15_spill] sm:$0xff] }
 0x181   :  { %v6905_v32 = vadd.f32 %v1695_v26, %v6761_v45  ;;  %v6908_v1 = vadd.f32 %v1696_v24, %v6764_v54  ;;  %v6911_v27 = vadd.f32 %v1697_v28, %v6767_v41  ;;  %v6914_v0 = vadd.f32 %v1698_v46, %v6770_v60  ;;  %v9216_v45 = vld [vmem:[#allocation121_spill] sm:$0xff]  ;;  %v9218_v28 = vld [vmem:[#allocation122_spill] sm:$0xff]  ;;  %v9247_v57 = vld [vmem:[#allocation135_spill] sm:$0xff] }
 0x182   :  { %v1771_v44 = vmul.f32 0.040059876, %v9215_v17  ;;  %v6918_v13 = vadd.f32 %v1699_v14, %v6773_v12  ;;  %v6921_v29 = vadd.f32 %v1700_v61, %v6776_v4  ;;  %v6924_v26 = vadd.f32 %v1701_v39, %v6779_v8  ;;  %v9217_v60 = vld [vmem:[#allocation33_spill] sm:$0xff]  ;;  %v9220_v4 = vld [vmem:[#allocation35_spill] sm:$0xff]  ;;  %v9227_v14 = vld [vmem:[#allocation18_spill] sm:$0xff] }
 0x183   :  { %v1772_v54 = vmul.f32 0.040059876, %v9216_v45  ;;  %v6928_v23 = vadd.f32 %v1702_v53, %v6782_v25  ;;  %v6931_v41 = vadd.f32 %v1703_v30, %v6786_v35  ;;  %v6934_v46 = vadd.f32 %v1704_v7, %v9217_v60  ;;  %v9221_v8 = vld [vmem:[#allocation123_spill] sm:$0xff]  ;;  %v9223_v25 = vld [vmem:[#allocation16_spill] sm:$0xff]  ;;  %v9234_v45 = vld [vmem:[#allocation21_spill] sm:$0xff] }
 0x184   :  { %v1773_v12 = vmul.f32 0.040059876, %v9218_v28  ;;  %v6938_v43 = vadd.f32 %v1705_v20, %v9219_v36  ;;  %v6941_v40 = vadd.f32 %v1706_v55, %v9220_v4  ;;  %v1774_v24 = vmul.f32 0.040059876, %v9221_v8  ;;  %v9228_v39 = vld [vmem:[#allocation19_spill] sm:$0xff]  ;;  %v9233_v17 = vld [vmem:[#allocation20_spill] sm:$0xff] }
 0x185   :  { %v1775_v58 = vmul.f32 0.040059876, %v9222_v15  ;;  %v1776_v52 = vmul.f32 0.040059876, %v9223_v25  ;;  %v1777_v35 = vmul.f32 0.040059876, %v9224_v50  ;;  %v6949_v37 = vadd.f32 %v1771_v44, %v9226_v47 }
 0x186   :  { %v1778_v63 = vmul.f32 0.040059876, %v9225_v48  ;;  %v1779_v61 = vmul.f32 0.040059876, %v9227_v14  ;;  %v1780_v53 = vmul.f32 0.040059876, %v9228_v39  ;;  %v6954_v7 = vadd.f32 %v1772_v54, %v1708_v22 }
 0x187   :  { %v1781_v30 = vmul.f32 0.040059876, %v9229_v31  ;;  %v6959_v20 = vld [vmem:[%s8221_s0 + $0x183] sm:$0xff]  ;;  %v6964_v55 = vld [vmem:[%s8221_s0 + $0x18b] sm:$0xff]  ;;  %v1782_v44 = vmul.f32 0.040059876, %v9233_v17  ;;  %v6969_v4 = vadd.f32 %v1773_v12, %v1709_v33  ;;  %v6991_v56 = vadd.f32 %v1775_v58, %v6849_v62 }
 0x188   :  { %9230 = vst [vmem:[#allocation41_spill] sm:$0xff] %v6954_v7  ;;  %9231 = vst [vmem:[#allocation42_spill] sm:$0xff] %v6959_v20  ;;  %v1783_v60 = vmul.f32 0.040059876, %v9234_v45  ;;  %v9235_v28 = vld [vmem:[#allocation127_spill] sm:$0xff]  ;;  %v6974_v22 = vld [vmem:[%s8221_s0 + $0x1b3] sm:$0xff] }
 0x189   :  { %9232 = vst [vmem:[#allocation43_spill] sm:$0xff] %v6964_v55  ;;  %v1784_v36 = vmul.f32 0.040059876, %v9235_v28  ;;  %9236 = vst [vmem:[#allocation45_spill] sm:$0xff] %v6969_v4  ;;  %v6979_v54 = vld [vmem:[%s8221_s0 + $0x1bb] sm:$0xff]  ;;  %v9239_v8 = vld [vmem:[#allocation128_spill] sm:$0xff] }
 0x18a   :  { %9237 = vst [vmem:[#allocation46_spill] sm:$0xff] %v6974_v22  ;;  %9238 = vst [vmem:[#allocation47_spill] sm:$0xff] %v6979_v54  ;;  %v1785_v15 = vmul.f32 0.040059876, %v9239_v8  ;;  %v9240_v25 = vld [vmem:[#allocation130_spill] sm:$0xff]  ;;  %v9241_v48 = vld [vmem:[#allocation131_spill] sm:$0xff] }
 0x18b   :  { %v1786_v50 = vmul.f32 0.040059876, %v9240_v25  ;;  %v1787_v47 = vmul.f32 0.040059876, %v9241_v48  ;;  %v9242_v14 = vld [vmem:[#allocation40_spill] sm:$0xff]  ;;  %v9245_v31 = vld [vmem:[#allocation133_spill] sm:$0xff]  ;;  %v6997_v48 = vadd.f32 %v1776_v52, %v6855_v6 }
 0x18c   :  { %v6985_v39 = vadd.f32 %v1774_v24, %v9242_v14  ;;  %v9244_v33 = vld [vmem:[#allocation132_spill] sm:$0xff]  ;;  %v1789_v17 = vmul.f32 0.040059876, %v9245_v31  ;;  %v9246_v45 = vld [vmem:[#allocation134_spill] sm:$0xff]  ;;  %v1791_v34 = vmul.f32 0.040059876, %v9247_v57 }
 0x18d   :  { %v1788_v12 = vmul.f32 0.040059876, %v9244_v33  ;;  %v1790_v28 = vmul.f32 0.040059876, %v9246_v45  ;;  %v9248_v42 = vld [vmem:[#allocation137_spill] sm:$0xff]  ;;  %v9249_v4 = vld [vmem:[#allocation138_spill] sm:$0xff]  ;;  %v7003_v45 = vadd.f32 %v1777_v35, %v6861_v3  ;;  %v7018_v3 = vadd.f32 %v1780_v53, %v6872_v16 }
 0x18e   :  { %9243 = vst [vmem:[#allocation48_spill] sm:$0xff] %v6985_v39  ;;  %v1792_v8 = vmul.f32 0.040059876, %v9248_v42  ;;  %v1793_v25 = vmul.f32 0.040059876, %v9249_v4  ;;  %v9250_v24 = vld [vmem:[#allocation139_spill] sm:$0xff]  ;;  %v7009_v4 = vadd.f32 %v1778_v63, %v6866_v19  ;;  %v7021_v35 = vadd.f32 %v1781_v30, %v6875_v21 }
 0x18f   :  { %v1794_v14 = vmul.f32 0.040059876, %v9250_v24  ;;  %v9251_v39 = vld [vmem:[#allocation141_spill] sm:$0xff]  ;;  %v9252_v7 = vld [vmem:[#allocation142_spill] sm:$0xff]  ;;  %v1797_v62 = vmul.f32 0.040059876, %v6959_v20  ;;  %v7027_v19 = vadd.f32 %v1783_v60, %v6881_v51  ;;  %v7030_v63 = vadd.f32 %v1784_v36, %v6884_v38 }
 0x190   :  { %v1795_v33 = vmul.f32 0.040059876, %v9251_v39  ;;  %v1796_v31 = vmul.f32 0.040059876, %v9252_v7  ;;  %v1798_v57 = vmul.f32 0.040059876, %v6964_v55  ;;  %v7015_v7 = vadd.f32 %v1779_v61, %v6869_v49 }
 0x191   :  { %v9253_v58 = vld [vmem:[#allocation144_spill] sm:$0xff]  ;;  %v9254_v6 = vld [vmem:[#allocation145_spill] sm:$0xff]  ;;  %v1801_v24 = vmul.f32 0.040059876, %v6974_v22  ;;  %v1802_v39 = vmul.f32 0.040059876, %v6979_v54  ;;  %v7036_v49 = vadd.f32 %v1786_v50, %v6890_v59  ;;  %v7039_v16 = vadd.f32 %v1787_v47, %v6893_v10 }
 0x192   :  { %v1799_v42 = vmul.f32 0.040059876, %v9253_v58  ;;  %v1800_v52 = vmul.f32 0.040059876, %v9254_v6  ;;  %v7024_v58 = vadd.f32 %v1782_v44, %v6878_v11  ;;  %v7033_v6 = vadd.f32 %v1785_v15, %v6887_v9  ;;  %v9257_v30 = vld [vmem:[#allocation94_spill] sm:$0xff]  ;;  %v9259_v36 = vld [vmem:[#allocation148_spill] sm:$0xff] }
 0x193   :  { %v7042_v21 = vadd.f32 %v1788_v12, %v6896_v18  ;;  %v7045_v11 = vadd.f32 %v1789_v17, %v6899_v2  ;;  %v7048_v51 = vadd.f32 %v1790_v28, %v6902_v5  ;;  %v7051_v38 = vadd.f32 %v1791_v34, %v6905_v32  ;;  %v9255_v18 = vld [vmem:[#allocation146_spill] sm:$0xff]  ;;  %v9262_v12 = vld [vmem:[#allocation152_spill] sm:$0xff]  ;;  %v9286_v20 = vld [vmem:[#allocation13_spill] sm:$0xff] }
 0x194   :  { %v7054_v9 = vadd.f32 %v1792_v8, %v6908_v1  ;;  %v7057_v59 = vadd.f32 %v1793_v25, %v6911_v27  ;;  %v7060_v10 = vadd.f32 %v1794_v14, %v6914_v0  ;;  %v1867_v61 = vmul.f32 0.015719416, %v9255_v18  ;;  %v9256_v32 = vld [vmem:[#allocation90_spill] sm:$0xff]  ;;  %v9263_v28 = vld [vmem:[#allocation24_spill] sm:$0xff] }
 0x195   :  { %v7064_v2 = vadd.f32 %v1795_v33, %v6918_v13  ;;  %v7067_v5 = vadd.f32 %v1796_v31, %v6921_v29  ;;  %v7070_v34 = vadd.f32 %v1797_v62, %v6924_v26  ;;  %v1868_v1 = vmul.f32 0.015719416, %v9256_v32  ;;  %v9258_v26 = vld [vmem:[#allocation147_spill] sm:$0xff]  ;;  %v9261_v47 = vld [vmem:[#allocation150_spill] sm:$0xff]  ;;  %v9265_v14 = vld [vmem:[#allocation28_spill] sm:$0xff] }
 0x196   :  { %v7074_v53 = vadd.f32 %v1798_v57, %v6928_v23  ;;  %v7077_v27 = vadd.f32 %v1799_v42, %v6931_v41  ;;  %v7080_v0 = vadd.f32 %v1800_v52, %v6934_v46  ;;  %v1869_v13 = vmul.f32 0.015719416, %v9257_v30  ;;  %v9260_v23 = vld [vmem:[#allocation149_spill] sm:$0xff]  ;;  %v7106_v62 = vld [vmem:[%s8221_s0 + $0x184] sm:$0xff]  ;;  %v7111_v57 = vld [vmem:[%s8221_s0 + $0x18c] sm:$0xff] }
 0x197   :  { %v7084_v44 = vadd.f32 %v1801_v24, %v6938_v43  ;;  %v7087_v29 = vadd.f32 %v1802_v39, %v6941_v40  ;;  %v1870_v60 = vmul.f32 0.015719416, %v9258_v26  ;;  %v1871_v15 = vmul.f32 0.015719416, %v9259_v36  ;;  %v9264_v43 = vld [vmem:[#allocation25_spill] sm:$0xff]  ;;  %9268 = vst [vmem:[#allocation49_spill] sm:$0xff] %v7106_v62 }
 0x198   :  { %v1872_v50 = vmul.f32 0.015719416, %v9260_v23  ;;  %v1873_v41 = vmul.f32 0.015719416, %v9261_v47  ;;  %v1874_v17 = vmul.f32 0.015719416, %v9262_v12  ;;  %v7095_v46 = vadd.f32 %v1867_v61, %v6949_v37 }
 0x199   :  { %v1875_v8 = vmul.f32 0.015719416, %v9263_v28  ;;  %v1876_v25 = vmul.f32 0.015719416, %v9264_v43  ;;  %v1877_v40 = vmul.f32 0.015719416, %v9265_v14  ;;  %v7139_v54 = vadd.f32 %v1871_v15, %v6991_v56 }
 0x19a   :  { %v9266_v33 = vld [vmem:[#allocation41_spill] sm:$0xff]  ;;  %9269 = vst [vmem:[#allocation51_spill] sm:$0xff] %v7111_v57  ;;  %v9270_v37 = vld [vmem:[#allocation2_spill] sm:$0xff]  ;;  %v9271_v52 = vld [vmem:[#allocation3_spill] sm:$0xff]  ;;  %v1893_v56 = vmul.f32 0.015719416, %v7106_v62 }
 0x19b   :  { %v7101_v31 = vadd.f32 %v1868_v1, %v9266_v33  ;;  %v1878_v42 = vmul.f32 0.015719416, %v9270_v37  ;;  %v1879_v24 = vmul.f32 0.015719416, %v9271_v52  ;;  %v9272_v39 = vld [vmem:[#allocation53_spill] sm:$0xff]  ;;  %v9277_v26 = vld [vmem:[#allocation56_spill] sm:$0xff] }
 0x19c   :  { %v1880_v18 = vmul.f32 0.015719416, %v9272_v39  ;;  %v9273_v61 = vld [vmem:[#allocation45_spill] sm:$0xff]  ;;  %v1881_v36 = vmul.f32 0.015719416, %v9277_v26  ;;  %v9278_v23 = vld [vmem:[#allocation7_spill] sm:$0xff] }
 0x19d   :  { %9267 = vst [vmem:[#allocation4_spill] sm:$0xff] %v7101_v31  ;;  %v7117_v32 = vadd.f32 %v1869_v13, %v9273_v61  ;;  %v7122_v1 = vld [vmem:[%s8221_s0 + $0x1b4] sm:$0xff]  ;;  %v7127_v30 = vld [vmem:[%s8221_s0 + $0x1bc] sm:$0xff]  ;;  %v1882_v47 = vmul.f32 0.015719416, %v9278_v23  ;;  %v9291_v15 = vld [vmem:[#allocation23_spill] sm:$0xff] }
 0x19e   :  { %9275 = vst [vmem:[#allocation52_spill] sm:$0xff] %v7122_v1  ;;  %9276 = vst [vmem:[#allocation54_spill] sm:$0xff] %v7127_v30  ;;  %v9279_v12 = vld [vmem:[#allocation73_spill] sm:$0xff]  ;;  %v9280_v43 = vld [vmem:[#allocation48_spill] sm:$0xff]  ;;  %v1888_v26 = vmul.f32 0.015719416, %v9286_v20 }
 0x19f   :  { %9274 = vst [vmem:[#allocation5_spill] sm:$0xff] %v7117_v32  ;;  %v1883_v28 = vmul.f32 0.015719416, %v9279_v12  ;;  %v7133_v14 = vadd.f32 %v1870_v60, %v9280_v43  ;;  %v9282_v13 = vld [vmem:[#allocation6_spill] sm:$0xff]  ;;  %v9283_v37 = vld [vmem:[#allocation9_spill] sm:$0xff]  ;;  %v9285_v22 = vld [vmem:[#allocation12_spill] sm:$0xff]  ;;  %v7145_v12 = vadd.f32 %v1872_v50, %v6997_v48 }
 0x1a0   :  { %v1884_v33 = vmul.f32 0.015719416, %v9282_v13  ;;  %v1885_v52 = vmul.f32 0.015719416, %v9283_v37  ;;  %v9284_v39 = vld [vmem:[#allocation89_spill] sm:$0xff]  ;;  %v9287_v32 = vld [vmem:[#allocation108_spill] sm:$0xff] }
 0x1a1   :  { %9281 = vst [vmem:[#allocation55_spill] sm:$0xff] %v7133_v14  ;;  %v1886_v61 = vmul.f32 0.015719416, %v9284_v39  ;;  %v1887_v55 = vmul.f32 0.015719416, %v9285_v22  ;;  %v9288_v60 = vld [vmem:[#allocation114_spill] sm:$0xff]  ;;  %v7151_v39 = vadd.f32 %v1873_v41, %v7003_v45  ;;  %v7166_v45 = vadd.f32 %v1876_v25, %v7018_v3 }
 0x1a2   :  { %v1889_v23 = vmul.f32 0.015719416, %v9287_v32  ;;  %v1890_v43 = vmul.f32 0.015719416, %v9288_v60  ;;  %v9289_v14 = vld [vmem:[#allocation86_spill] sm:$0xff]  ;;  %v7157_v32 = vadd.f32 %v1874_v17, %v7009_v4  ;;  %v9292_v48 = vld [vmem:[#allocation129_spill] sm:$0xff]  ;;  %v7169_v41 = vadd.f32 %v1877_v40, %v7021_v35 }
 0x1a3   :  { %v1891_v13 = vmul.f32 0.015719416, %v9289_v14  ;;  %v9290_v31 = vld [vmem:[#allocation22_spill] sm:$0xff]  ;;  %v1894_v22 = vmul.f32 0.015719416, %v7111_v57  ;;  %v7175_v4 = vadd.f32 %v1879_v24, %v7027_v19  ;;  %v2931_v3 = vld [vmem:[%s8221_s0 + $0x78] sm:$0xff]  ;;  %v7187_v35 = vadd.f32 %v1880_v18, %v7030_v63 }
 0x1a4   :  { %v1892_v37 = vmul.f32 0.015719416, %v9290_v31  ;;  %v1895_v20 = vmul.f32 0.015719416, %v9291_v15  ;;  %v1896_v50 = vmul.f32 0.015719416, %v9292_v48  ;;  %v7163_v31 = vadd.f32 %v1875_v8, %v7015_v7 }
 0x1a5   :  { %v1897_v60 = vmul.f32 0.015719416, %v7122_v1  ;;  %v1898_v14 = vmul.f32 0.015719416, %v7127_v30  ;;  %v7172_v15 = vadd.f32 %v1878_v42, %v7024_v58  ;;  %v2929_v17 = vld [vmem:[%s8221_s0 + $0x60] sm:$0xff]  ;;  %v2930_v7 = vld [vmem:[%s8221_s0 + $0x68] sm:$0xff]  ;;  %v7190_v58 = vadd.f32 %v1881_v36, %v7033_v6 }
 0x1a6   :  { %v7193_v19 = vadd.f32 %v1882_v47, %v7036_v49  ;;  %v7196_v8 = vadd.f32 %v1883_v28, %v7039_v16  ;;  %v2932_v25 = vld [vmem:[%s8221_s0 + $0x80] sm:$0xff]  ;;  %v2933_v40 = vld [vmem:[%s8221_s0 + $0x90] sm:$0xff]  ;;  %v2934_v63 = vld [vmem:[%s8221_s0 + $0x98] sm:$0xff]  ;;  %v7208_v6 = vadd.f32 %v1884_v33, %v7042_v21  ;;  %v7211_v49 = vadd.f32 %v1885_v52, %v7045_v11 }
 0x1a7   :  { %v7214_v16 = vadd.f32 %v1886_v61, %v7048_v51  ;;  %v7217_v42 = vadd.f32 %v1887_v55, %v7051_v38  ;;  %v2935_v24 = vld [vmem:[%s8221_s0 + $0xa8] sm:$0xff]  ;;  %v2936_v18 = vld [vmem:[%s8221_s0 + $0xb0] sm:$0xff]  ;;  %v2937_v21 = vld [vmem:[%s8221_s0 + $0xc0] sm:$0xff]  ;;  %v7229_v11 = vadd.f32 %v1888_v26, %v7054_v9  ;;  %v7232_v51 = vadd.f32 %v1889_v23, %v7057_v59 }
 0x1a8   :  { %v7235_v55 = vadd.f32 %v1890_v43, %v7060_v10  ;;  %v7238_v38 = vadd.f32 %v1891_v13, %v7064_v2  ;;  %v2938_v36 = vld [vmem:[%s8221_s0 + $0xc8] sm:$0xff]  ;;  %v2939_v47 = vld [vmem:[%s8221_s0 + $0xd8] sm:$0xff]  ;;  %v2940_v9 = vld [vmem:[%s8221_s0 + $0xe0] sm:$0xff]  ;;  %v7250_v59 = vadd.f32 %v1892_v37, %v7067_v5  ;;  %v7253_v10 = vadd.f32 %v1893_v56, %v7070_v34 }
 0x1a9   :  { %v7256_v2 = vadd.f32 %v1894_v22, %v7074_v53  ;;  %v2941_v28 = vld [vmem:[%s8221_s0 + $0xf0] sm:$0xff]  ;;  %v2942_v33 = vld [vmem:[%s8221_s0 + $0xf8] sm:$0xff]  ;;  %v2943_v52 = vld [vmem:[%s8221_s0 + $0x108] sm:$0xff]  ;;  %v1964_v5 = vmul.f32 0.008738643, %v2929_v17  ;;  %v7268_v61 = vadd.f32 %v1895_v20, %v7077_v27  ;;  %v7271_v34 = vadd.f32 %v1896_v50, %v7080_v0 }
 0x1aa   :  { %9293 = vst [vmem:[#allocation57_spill] sm:$0xff] %v7253_v10  ;;  %v2944_v53 = vld [vmem:[%s8221_s0 + $0x110] sm:$0xff]  ;;  %v2945_v26 = vld [vmem:[%s8221_s0 + $0x120] sm:$0xff]  ;;  %v2946_v23 = vld [vmem:[%s8221_s0 + $0x128] sm:$0xff]  ;;  %v1965_v43 = vmul.f32 0.008738643, %v2930_v7  ;;  %v7283_v27 = vadd.f32 %v1897_v60, %v7084_v44  ;;  %v7295_v50 = vadd.f32 %v1898_v14, %v7087_v29 }
 0x1ab   :  { %9294 = vst [vmem:[#allocation58_spill] sm:$0xff] %v7256_v2  ;;  %9295 = vst [vmem:[#allocation59_spill] sm:$0xff] %v7268_v61  ;;  %v1966_v13 = vmul.f32 0.008738643, %v2931_v3  ;;  %v2947_v0 = vld [vmem:[%s8221_s0 + $0x138] sm:$0xff]  ;;  %v2948_v37 = vld [vmem:[%s8221_s0 + $0x140] sm:$0xff]  ;;  %v7310_v30 = vadd.f32 %v1964_v5, %v7095_v46 }
 0x1ac   :  { %9296 = vst [vmem:[#allocation61_spill] sm:$0xff] %v7271_v34  ;;  %9297 = vst [vmem:[#allocation62_spill] sm:$0xff] %v7283_v27  ;;  %v2949_v56 = vld [vmem:[%s8221_s0 + $0x150] sm:$0xff]  ;;  %v1967_v22 = vmul.f32 0.008738643, %v2932_v25  ;;  %v2950_v44 = vld [vmem:[%s8221_s0 + $0x158] sm:$0xff] }
 0x1ad   :  { %v1968_v20 = vmul.f32 0.008738643, %v2933_v40  ;;  %v1969_v48 = vmul.f32 0.008738643, %v2934_v63  ;;  %9298 = vst [vmem:[#allocation63_spill] sm:$0xff] %v7295_v50  ;;  %v2951_v60 = vld [vmem:[%s8221_s0 + $0x168] sm:$0xff] }
 0x1ae   :  { %v2952_v17 = vld [vmem:[%s8221_s0 + $0x170] sm:$0xff]  ;;  %v1970_v7 = vmul.f32 0.008738643, %v2935_v24  ;;  %v1971_v3 = vmul.f32 0.008738643, %v2936_v18  ;;  %v2955_v29 = vld [vmem:[%s8221_s0 + $0x198] sm:$0xff] }
 0x1af   :  { %v1972_v25 = vmul.f32 0.008738643, %v2937_v21  ;;  %v1973_v14 = vmul.f32 0.008738643, %v2938_v36  ;;  %v1974_v40 = vmul.f32 0.008738643, %v2939_v47  ;;  %v7331_v61 = vadd.f32 %v1968_v20, %v7139_v54 }
 0x1b0   :  { %v1975_v63 = vmul.f32 0.008738643, %v2940_v9  ;;  %9299 = vst [vmem:[#allocation64_spill] sm:$0xff] %v7310_v30  ;;  %v2956_v1 = vld [vmem:[%s8221_s0 + $0x1a0] sm:$0xff]  ;;  %v1976_v57 = vmul.f32 0.008738643, %v2941_v28  ;;  %v7344_v54 = vadd.f32 %v1971_v3, %v7157_v32 }
 0x1b1   :  { %v1977_v62 = vmul.f32 0.008738643, %v2942_v33  ;;  %v1978_v50 = vmul.f32 0.008738643, %v2943_v52  ;;  %v9300_v24 = vld [vmem:[#allocation4_spill] sm:$0xff]  ;;  %v2959_v21 = vld [vmem:[%s8221_s0 + $0x1c8] sm:$0xff]  ;;  %v7350_v20 = vadd.f32 %v1973_v14, %v7166_v45 }
 0x1b2   :  { %v7316_v18 = vadd.f32 %v1965_v43, %v9300_v24  ;;  %v2960_v36 = vld [vmem:[%s8221_s0 + $0x1d0] sm:$0xff]  ;;  %v1979_v46 = vmul.f32 0.008738643, %v2944_v53  ;;  %v1980_v47 = vmul.f32 0.008738643, %v2945_v26  ;;  %v9302_v5 = vld [vmem:[#allocation5_spill] sm:$0xff] }
 0x1b3   :  { %v1981_v9 = vmul.f32 0.008738643, %v2946_v23  ;;  %v7325_v30 = vadd.f32 %v1966_v13, %v9302_v5  ;;  %v1982_v28 = vmul.f32 0.008738643, %v2947_v0  ;;  %v1983_v33 = vmul.f32 0.008738643, %v2948_v37 }
 0x1b4   :  { %9301 = vst [vmem:[#allocation65_spill] sm:$0xff] %v7316_v18  ;;  %v1984_v52 = vmul.f32 0.008738643, %v2949_v56  ;;  %v9303_v27 = vld [vmem:[#allocation55_spill] sm:$0xff]  ;;  %v1985_v24 = vmul.f32 0.008738643, %v2950_v44  ;;  %v7336_v13 = vadd.f32 %v1969_v48, %v7145_v12  ;;  %v7356_v12 = vadd.f32 %v1975_v63, %v7172_v15 }
 0x1b5   :  { %v7328_v43 = vadd.f32 %v1967_v22, %v9303_v27  ;;  %v1986_v18 = vmul.f32 0.008738643, %v2951_v60  ;;  %v1987_v34 = vmul.f32 0.008738643, %v2952_v17  ;;  %v9304_v2 = vld [vmem:[#allocation140_spill] sm:$0xff]  ;;  %v9305_v53 = vld [vmem:[#allocation143_spill] sm:$0xff]  ;;  %v7341_v22 = vadd.f32 %v1970_v7, %v7151_v39 }
 0x1b6   :  { %v1988_v10 = vmul.f32 0.008738643, %v9304_v2  ;;  %v1989_v26 = vmul.f32 0.008738643, %v9305_v53  ;;  %v1990_v23 = vmul.f32 0.008738643, %v2955_v29  ;;  %v7347_v2 = vadd.f32 %v1972_v25, %v7163_v31 }
 0x1b7   :  { %v1991_v0 = vmul.f32 0.008738643, %v2956_v1  ;;  %v9306_v37 = vld [vmem:[#allocation151_spill] sm:$0xff]  ;;  %v9307_v5 = vld [vmem:[#allocation29_spill] sm:$0xff]  ;;  %v1994_v44 = vmul.f32 0.008738643, %v2959_v21  ;;  %v7353_v1 = vadd.f32 %v1974_v40, %v7169_v41  ;;  %v7359_v39 = vadd.f32 %v1976_v57, %v7175_v4 }
 0x1b8   :  { %v1992_v56 = vmul.f32 0.008738643, %v9306_v37  ;;  %v1993_v27 = vmul.f32 0.008738643, %v9307_v5  ;;  %v1995_v60 = vmul.f32 0.008738643, %v2960_v36  ;;  %v7368_v45 = vadd.f32 %v1977_v62, %v7187_v35 }
 0x1b9   :  { %v2961_v32 = vld [vmem:[%s8221_s0 + $0x61] sm:$0xff]  ;;  %v2962_v31 = vld [vmem:[%s8221_s0 + $0x69] sm:$0xff]  ;;  %v7371_v41 = vadd.f32 %v1978_v50, %v7190_v58  ;;  %v7374_v15 = vadd.f32 %v1979_v46, %v7193_v19  ;;  %v7377_v57 = vadd.f32 %v1980_v47, %v7196_v8  ;;  %v2963_v4 = vld [vmem:[%s8221_s0 + $0x79] sm:$0xff]  ;;  %v7389_v35 = vadd.f32 %v1981_v9, %v7208_v6 }
 0x1ba   :  { %v2964_v48 = vld [vmem:[%s8221_s0 + $0x81] sm:$0xff]  ;;  %v2965_v62 = vld [vmem:[%s8221_s0 + $0x91] sm:$0xff]  ;;  %v7392_v58 = vadd.f32 %v1982_v28, %v7211_v49  ;;  %v7395_v19 = vadd.f32 %v1983_v33, %v7214_v16  ;;  %v7398_v8 = vadd.f32 %v1984_v52, %v7217_v42  ;;  %v2966_v50 = vld [vmem:[%s8221_s0 + $0x99] sm:$0xff]  ;;  %v7410_v49 = vadd.f32 %v1985_v24, %v7229_v11 }
 0x1bb   :  { %v2967_v17 = vld [vmem:[%s8221_s0 + $0xa9] sm:$0xff]  ;;  %v2968_v6 = vld [vmem:[%s8221_s0 + $0xb1] sm:$0xff]  ;;  %v7413_v16 = vadd.f32 %v1986_v18, %v7232_v51  ;;  %v7416_v42 = vadd.f32 %v1987_v34, %v7235_v55  ;;  %v7419_v7 = vadd.f32 %v1988_v10, %v7238_v38  ;;  %v2969_v3 = vld [vmem:[%s8221_s0 + $0xc1] sm:$0xff]  ;;  %v7431_v51 = vadd.f32 %v1989_v26, %v7250_v59 }
 0x1bc   :  { %v2970_v25 = vld [vmem:[%s8221_s0 + $0xc9] sm:$0xff]  ;;  %v2971_v11 = vld [vmem:[%s8221_s0 + $0xd9] sm:$0xff]  ;;  %v2972_v38 = vld [vmem:[%s8221_s0 + $0xe1] sm:$0xff]  ;;  %v2060_v14 = vmul.f32 0.015719416, %v2961_v32 }
 0x1bd   :  { %v9308_v55 = vld [vmem:[#allocation57_spill] sm:$0xff]  ;;  %v2061_v40 = vmul.f32 0.015719416, %v2962_v31  ;;  %v9309_v63 = vld [vmem:[#allocation58_spill] sm:$0xff]  ;;  %v9310_v18 = vld [vmem:[#allocation59_spill] sm:$0xff] }
 0x1be   :  { %v7434_v34 = vadd.f32 %v1990_v23, %v9308_v55  ;;  %v2973_v10 = vld [vmem:[%s8221_s0 + $0xf1] sm:$0xff]  ;;  %v2974_v29 = vld [vmem:[%s8221_s0 + $0xf9] sm:$0xff]  ;;  %v7446_v59 = vadd.f32 %v1991_v0, %v9309_v63  ;;  %v7449_v21 = vadd.f32 %v1992_v56, %v9310_v18  ;;  %v2975_v47 = vld [vmem:[%s8221_s0 + $0x109] sm:$0xff]  ;;  %v2062_v33 = vmul.f32 0.015719416, %v2963_v4 }
 0x1bf   :  { %v9312_v36 = vld [vmem:[#allocation61_spill] sm:$0xff]  ;;  %v2977_v28 = vld [vmem:[%s8221_s0 + $0x121] sm:$0xff]  ;;  %v2978_v23 = vld [vmem:[%s8221_s0 + $0x129] sm:$0xff]  ;;  %v2063_v56 = vmul.f32 0.015719416, %v2964_v48 }
 0x1c0   :  { %9311 = vst [vmem:[#allocation66_spill] sm:$0xff] %v7449_v21  ;;  %v7452_v46 = vadd.f32 %v1993_v27, %v9312_v36  ;;  %v2976_v9 = vld [vmem:[%s8221_s0 + $0x111] sm:$0xff]  ;;  %v9314_v52 = vld [vmem:[#allocation62_spill] sm:$0xff]  ;;  %v9316_v53 = vld [vmem:[#allocation63_spill] sm:$0xff]  ;;  %v2064_v5 = vmul.f32 0.015719416, %v2965_v62 }
 0x1c1   :  { %v7464_v24 = vadd.f32 %v1994_v44, %v9314_v52  ;;  %v7467_v26 = vadd.f32 %v1995_v60, %v9316_v53  ;;  %v2979_v0 = vld [vmem:[%s8221_s0 + $0x139] sm:$0xff]  ;;  %v2980_v37 = vld [vmem:[%s8221_s0 + $0x141] sm:$0xff]  ;;  %v2981_v27 = vld [vmem:[%s8221_s0 + $0x151] sm:$0xff]  ;;  %v2065_v32 = vmul.f32 0.015719416, %v2966_v50 }
 0x1c2   :  { %9313 = vst [vmem:[#allocation67_spill] sm:$0xff] %v7452_v46  ;;  %v2982_v44 = vld [vmem:[%s8221_s0 + $0x159] sm:$0xff]  ;;  %v2983_v60 = vld [vmem:[%s8221_s0 + $0x169] sm:$0xff]  ;;  %v2066_v31 = vmul.f32 0.015719416, %v2967_v17  ;;  %v2984_v48 = vld [vmem:[%s8221_s0 + $0x171] sm:$0xff] }
 0x1c3   :  { %9315 = vst [vmem:[#allocation68_spill] sm:$0xff] %v7464_v24  ;;  %9317 = vst [vmem:[#allocation69_spill] sm:$0xff] %v7467_v26  ;;  %v2067_v4 = vmul.f32 0.015719416, %v2968_v6  ;;  %v9318_v55 = vld [vmem:[#allocation64_spill] sm:$0xff]  ;;  %v9320_v52 = vld [vmem:[#allocation65_spill] sm:$0xff]  ;;  %v7518_v24 = vadd.f32 %v2065_v32, %v7336_v13 }
 0x1c4   :  { %v7488_v63 = vadd.f32 %v2060_v14, %v9318_v55  ;;  %v2068_v62 = vmul.f32 0.015719416, %v2969_v3  ;;  %v2069_v18 = vmul.f32 0.015719416, %v2970_v25  ;;  %v2070_v36 = vmul.f32 0.015719416, %v2971_v11 }
 0x1c5   :  { %v7494_v53 = vadd.f32 %v2061_v40, %v9320_v52  ;;  %v2987_v26 = vld [vmem:[%s8221_s0 + $0x199] sm:$0xff]  ;;  %v2988_v50 = vld [vmem:[%s8221_s0 + $0x1a1] sm:$0xff]  ;;  %v2071_v17 = vmul.f32 0.015719416, %v2972_v38  ;;  %v2072_v6 = vmul.f32 0.015719416, %v2973_v10  ;;  %v7503_v55 = vadd.f32 %v2062_v33, %v7325_v30 }
 0x1c6   :  { %9319 = vst [vmem:[#allocation70_spill] sm:$0xff] %v7488_v63  ;;  %v2073_v14 = vmul.f32 0.015719416, %v2974_v29  ;;  %v2991_v3 = vld [vmem:[%s8221_s0 + $0x1c9] sm:$0xff]  ;;  %v2992_v25 = vld [vmem:[%s8221_s0 + $0x1d1] sm:$0xff]  ;;  %v7515_v30 = vadd.f32 %v2064_v5, %v7331_v61  ;;  %v7527_v61 = vadd.f32 %v2067_v4, %v7344_v54 }
 0x1c7   :  { %9321 = vst [vmem:[#allocation136_spill] sm:$0xff] %v7494_v53  ;;  %9322 = vst [vmem:[#allocation71_spill] sm:$0xff] %v7503_v55  ;;  %v2074_v11 = vmul.f32 0.015719416, %v2975_v47  ;;  %v2075_v40 = vmul.f32 0.015719416, %v2976_v9  ;;  %v7512_v53 = vadd.f32 %v2063_v56, %v7328_v43  ;;  %v7523_v43 = vadd.f32 %v2066_v31, %v7341_v22 }
 0x1c8   :  { %v2076_v52 = vmul.f32 0.015719416, %v2977_v28  ;;  %v2077_v38 = vmul.f32 0.015719416, %v2978_v23  ;;  %v2078_v10 = vmul.f32 0.015719416, %v2979_v0  ;;  %v7537_v22 = vadd.f32 %v2070_v36, %v7353_v1 }
 0x1c9   :  { %v2079_v29 = vmul.f32 0.015719416, %v2980_v37  ;;  %v2080_v33 = vmul.f32 0.015719416, %v2981_v27  ;;  %v2081_v55 = vmul.f32 0.015719416, %v2982_v44  ;;  %v7543_v32 = vadd.f32 %v2072_v6, %v7359_v39 }
 0x1ca   :  { %v2082_v63 = vmul.f32 0.015719416, %v2983_v60  ;;  %v2083_v46 = vmul.f32 0.015719416, %v2984_v48  ;;  %v9323_v21 = vld [vmem:[#allocation44_spill] sm:$0xff]  ;;  %v9324_v9 = vld [vmem:[#allocation50_spill] sm:$0xff]  ;;  %v7531_v60 = vadd.f32 %v2068_v62, %v7347_v2  ;;  %v7555_v1 = vadd.f32 %v2074_v11, %v7371_v41 }
 0x1cb   :  { %v2084_v47 = vmul.f32 0.015719416, %v9323_v21  ;;  %v2085_v28 = vmul.f32 0.015719416, %v9324_v9  ;;  %v2086_v23 = vmul.f32 0.015719416, %v2987_v26  ;;  %v7534_v21 = vadd.f32 %v2069_v18, %v7350_v20 }
 0x1cc   :  { %v2087_v0 = vmul.f32 0.015719416, %v2988_v50  ;;  %v9325_v37 = vld [vmem:[#allocation8_spill] sm:$0xff]  ;;  %v9326_v5 = vld [vmem:[#allocation87_spill] sm:$0xff]  ;;  %v2090_v44 = vmul.f32 0.015719416, %v2991_v3  ;;  %v7540_v26 = vadd.f32 %v2071_v17, %v7356_v12  ;;  %v7552_v20 = vadd.f32 %v2073_v14, %v7368_v45 }
 0x1cd   :  { %v2088_v56 = vmul.f32 0.015719416, %v9325_v37  ;;  %v2089_v27 = vmul.f32 0.015719416, %v9326_v5  ;;  %v2091_v13 = vmul.f32 0.015719416, %v2992_v25  ;;  %v7558_v12 = vadd.f32 %v2075_v40, %v7374_v15 }
 0x1ce   :  { %v2993_v54 = vld [vmem:[%s8221_s0 + $0x62] sm:$0xff]  ;;  %v2994_v2 = vld [vmem:[%s8221_s0 + $0x6a] sm:$0xff]  ;;  %v7561_v39 = vadd.f32 %v2076_v52, %v7377_v57  ;;  %v2995_v31 = vld [vmem:[%s8221_s0 + $0x7a] sm:$0xff]  ;;  %v7573_v41 = vadd.f32 %v2077_v38, %v7389_v35  ;;  %v7576_v15 = vadd.f32 %v2078_v10, %v7392_v58  ;;  %v7579_v57 = vadd.f32 %v2079_v29, %v7395_v19 }
 0x1cf   :  { %v2996_v4 = vld [vmem:[%s8221_s0 + $0x82] sm:$0xff]  ;;  %v2997_v45 = vld [vmem:[%s8221_s0 + $0x92] sm:$0xff]  ;;  %v7582_v48 = vadd.f32 %v2080_v33, %v7398_v8  ;;  %v2998_v62 = vld [vmem:[%s8221_s0 + $0x9a] sm:$0xff]  ;;  %v7594_v58 = vadd.f32 %v2081_v55, %v7410_v49  ;;  %v7597_v19 = vadd.f32 %v2082_v63, %v7413_v16  ;;  %v7600_v8 = vadd.f32 %v2083_v46, %v7416_v42 }
 0x1d0   :  { %v2999_v18 = vld [vmem:[%s8221_s0 + $0xaa] sm:$0xff]  ;;  %v3000_v35 = vld [vmem:[%s8221_s0 + $0xb2] sm:$0xff]  ;;  %v7603_v36 = vadd.f32 %v2084_v47, %v7419_v7  ;;  %v3001_v50 = vld [vmem:[%s8221_s0 + $0xc2] sm:$0xff]  ;;  %v7615_v16 = vadd.f32 %v2085_v28, %v7431_v51  ;;  %v7618_v42 = vadd.f32 %v2086_v23, %v7434_v34  ;;  %v7621_v7 = vadd.f32 %v2087_v0, %v7446_v59 }
 0x1d1   :  { %v3002_v17 = vld [vmem:[%s8221_s0 + $0xca] sm:$0xff]  ;;  %v3003_v49 = vld [vmem:[%s8221_s0 + $0xda] sm:$0xff]  ;;  %v3004_v46 = vld [vmem:[%s8221_s0 + $0xe2] sm:$0xff]  ;;  %v2156_v51 = vmul.f32 0.020157779, %v2993_v54 }
 0x1d2   :  { %v3005_v63 = vld [vmem:[%s8221_s0 + $0xf2] sm:$0xff]  ;;  %v3006_v6 = vld [vmem:[%s8221_s0 + $0xfa] sm:$0xff]  ;;  %v9329_v34 = vld [vmem:[#allocation67_spill] sm:$0xff]  ;;  %v2157_v40 = vmul.f32 0.020157779, %v2994_v2 }
 0x1d3   :  { %v9327_v14 = vld [vmem:[#allocation66_spill] sm:$0xff]  ;;  %v7636_v3 = vadd.f32 %v2089_v27, %v9329_v34  ;;  %v3007_v59 = vld [vmem:[%s8221_s0 + $0x10a] sm:$0xff]  ;;  %v3008_v25 = vld [vmem:[%s8221_s0 + $0x112] sm:$0xff]  ;;  %v2158_v52 = vmul.f32 0.020157779, %v2995_v31 }
 0x1d4   :  { %v7633_v55 = vadd.f32 %v2088_v56, %v9327_v14  ;;  %v3009_v11 = vld [vmem:[%s8221_s0 + $0x122] sm:$0xff]  ;;  %v9331_v38 = vld [vmem:[#allocation68_spill] sm:$0xff]  ;;  %v9333_v29 = vld [vmem:[#allocation69_spill] sm:$0xff]  ;;  %v2159_v23 = vmul.f32 0.020157779, %v2996_v4 }
 0x1d5   :  { %9330 = vst [vmem:[#allocation74_spill] sm:$0xff] %v7636_v3  ;;  %v7648_v10 = vadd.f32 %v2090_v44, %v9331_v38  ;;  %v7651_v33 = vadd.f32 %v2091_v13, %v9333_v29  ;;  %v3010_v47 = vld [vmem:[%s8221_s0 + $0x12a] sm:$0xff]  ;;  %v3011_v9 = vld [vmem:[%s8221_s0 + $0x13a] sm:$0xff]  ;;  %v3012_v28 = vld [vmem:[%s8221_s0 + $0x142] sm:$0xff]  ;;  %v2160_v0 = vmul.f32 0.020157779, %v2997_v45 }
 0x1d6   :  { %9328 = vst [vmem:[#allocation72_spill] sm:$0xff] %v7633_v55  ;;  %v3013_v37 = vld [vmem:[%s8221_s0 + $0x152] sm:$0xff]  ;;  %v3014_v56 = vld [vmem:[%s8221_s0 + $0x15a] sm:$0xff]  ;;  %v3015_v5 = vld [vmem:[%s8221_s0 + $0x16a] sm:$0xff]  ;;  %v2161_v27 = vmul.f32 0.020157779, %v2998_v62 }
 0x1d7   :  { %9332 = vst [vmem:[#allocation26_spill] sm:$0xff] %v7648_v10  ;;  %9334 = vst [vmem:[#allocation75_spill] sm:$0xff] %v7651_v33  ;;  %v2162_v44 = vmul.f32 0.020157779, %v2999_v18  ;;  %v2163_v13 = vmul.f32 0.020157779, %v3000_v35 }
 0x1d8   :  { %v9335_v54 = vld [vmem:[#allocation70_spill] sm:$0xff]  ;;  %v3016_v31 = vld [vmem:[%s8221_s0 + $0x172] sm:$0xff]  ;;  %v2164_v4 = vmul.f32 0.020157779, %v3001_v50  ;;  %v2165_v45 = vmul.f32 0.020157779, %v3002_v17  ;;  %v7702_v10 = vadd.f32 %v2161_v27, %v7518_v24 }
 0x1d9   :  { %v7672_v2 = vadd.f32 %v2156_v51, %v9335_v54  ;;  %v2166_v14 = vmul.f32 0.020157779, %v3003_v49  ;;  %v9337_v34 = vld [vmem:[#allocation136_spill] sm:$0xff]  ;;  %v3019_v29 = vld [vmem:[%s8221_s0 + $0x19a] sm:$0xff]  ;;  %v3020_v62 = vld [vmem:[%s8221_s0 + $0x1a2] sm:$0xff] }
 0x1da   :  { %v7678_v38 = vadd.f32 %v2157_v40, %v9337_v34  ;;  %v2167_v18 = vmul.f32 0.020157779, %v3004_v46  ;;  %v2168_v35 = vmul.f32 0.020157779, %v3005_v63  ;;  %v2169_v51 = vmul.f32 0.020157779, %v3006_v6 }
 0x1db   :  { %9336 = vst [vmem:[#allocation76_spill] sm:$0xff] %v7672_v2  ;;  %v9339_v54 = vld [vmem:[#allocation71_spill] sm:$0xff]  ;;  %v3024_v17 = vld [vmem:[%s8221_s0 + $0x1d2] sm:$0xff]  ;;  %v2170_v49 = vmul.f32 0.020157779, %v3007_v59 }
 0x1dc   :  { %9338 = vst [vmem:[#allocation77_spill] sm:$0xff] %v7678_v38  ;;  %v7687_v2 = vadd.f32 %v2158_v52, %v9339_v54  ;;  %v3023_v50 = vld [vmem:[%s8221_s0 + $0x1ca] sm:$0xff]  ;;  %v2171_v40 = vmul.f32 0.020157779, %v3008_v25  ;;  %v2172_v34 = vmul.f32 0.020157779, %v3009_v11  ;;  %v7696_v38 = vadd.f32 %v2159_v23, %v7512_v53 }
 0x1dd   :  { %v2173_v46 = vmul.f32 0.020157779, %v3010_v47  ;;  %v2174_v63 = vmul.f32 0.020157779, %v3011_v9  ;;  %v2175_v6 = vmul.f32 0.020157779, %v3012_v28  ;;  %v7699_v52 = vadd.f32 %v2160_v0, %v7515_v30 }
 0x1de   :  { %9340 = vst [vmem:[#allocation30_spill] sm:$0xff] %v7687_v2  ;;  %v2176_v54 = vmul.f32 0.020157779, %v3013_v37  ;;  %v2177_v2 = vmul.f32 0.020157779, %v3014_v56  ;;  %v9341_v55 = vld [vmem:[#allocation36_spill] sm:$0xff]  ;;  %v7707_v53 = vadd.f32 %v2162_v44, %v7523_v43  ;;  %v7711_v30 = vadd.f32 %v2163_v13, %v7527_v61 }
 0x1df   :  { %v2178_v33 = vmul.f32 0.020157779, %v3015_v5  ;;  %v2179_v3 = vmul.f32 0.020157779, %v3016_v31  ;;  %v2180_v59 = vmul.f32 0.020157779, %v9341_v55  ;;  %v7715_v5 = vadd.f32 %v2164_v4, %v7531_v60 }
 0x1e0   :  { %v9342_v25 = vld [vmem:[#allocation38_spill] sm:$0xff]  ;;  %v2182_v47 = vmul.f32 0.020157779, %v3019_v29  ;;  %v2183_v9 = vmul.f32 0.020157779, %v3020_v62  ;;  %v9343_v28 = vld [vmem:[#allocation39_spill] sm:$0xff]  ;;  %v7718_v55 = vadd.f32 %v2165_v45, %v7534_v21  ;;  %v7721_v43 = vadd.f32 %v2166_v14, %v7537_v22 }
 0x1e1   :  { %v2181_v11 = vmul.f32 0.020157779, %v9342_v25  ;;  %v2184_v23 = vmul.f32 0.020157779, %v9343_v28  ;;  %v9344_v0 = vld [vmem:[#allocation37_spill] sm:$0xff]  ;;  %v7724_v27 = vadd.f32 %v2167_v18, %v7540_v26  ;;  %v7727_v44 = vadd.f32 %v2168_v35, %v7543_v32  ;;  %v3025_v61 = vld [vmem:[%s8221_s0 + $0x63] sm:$0xff] }
 0x1e2   :  { %v2185_v37 = vmul.f32 0.020157779, %v9344_v0  ;;  %v2186_v56 = vmul.f32 0.020157779, %v3023_v50  ;;  %v2187_v24 = vmul.f32 0.020157779, %v3024_v17  ;;  %v7739_v22 = vadd.f32 %v2169_v51, %v7552_v20 }
 0x1e3   :  { %v3026_v60 = vld [vmem:[%s8221_s0 + $0x6b] sm:$0xff]  ;;  %v3027_v21 = vld [vmem:[%s8221_s0 + $0x7b] sm:$0xff]  ;;  %v7742_v26 = vadd.f32 %v2170_v49, %v7555_v1  ;;  %v7745_v32 = vadd.f32 %v2171_v40, %v7558_v12  ;;  %v7748_v13 = vadd.f32 %v2172_v34, %v7561_v39  ;;  %v3028_v31 = vld [vmem:[%s8221_s0 + $0x83] sm:$0xff]  ;;  %v7760_v1 = vadd.f32 %v2173_v46, %v7573_v41 }
 0x1e4   :  { %v3029_v4 = vld [vmem:[%s8221_s0 + $0x93] sm:$0xff]  ;;  %v3030_v20 = vld [vmem:[%s8221_s0 + $0x9b] sm:$0xff]  ;;  %v7763_v12 = vadd.f32 %v2174_v63, %v7576_v15  ;;  %v7766_v39 = vadd.f32 %v2175_v6, %v7579_v57  ;;  %v7769_v45 = vadd.f32 %v2176_v54, %v7582_v48  ;;  %v3031_v14 = vld [vmem:[%s8221_s0 + $0xab] sm:$0xff]  ;;  %v7781_v15 = vadd.f32 %v2177_v2, %v7594_v58 }
 0x1e5   :  { %v3032_v29 = vld [vmem:[%s8221_s0 + $0xb3] sm:$0xff]  ;;  %v3033_v41 = vld [vmem:[%s8221_s0 + $0xc3] sm:$0xff]  ;;  %v7784_v57 = vadd.f32 %v2178_v33, %v7597_v19  ;;  %v7787_v48 = vadd.f32 %v2179_v3, %v7600_v8  ;;  %v7790_v62 = vadd.f32 %v2180_v59, %v7603_v36  ;;  %v3034_v18 = vld [vmem:[%s8221_s0 + $0xcb] sm:$0xff]  ;;  %v7802_v19 = vadd.f32 %v2181_v11, %v7615_v16 }
 0x1e6   :  { %v3035_v35 = vld [vmem:[%s8221_s0 + $0xdb] sm:$0xff]  ;;  %v3036_v58 = vld [vmem:[%s8221_s0 + $0xe3] sm:$0xff]  ;;  %v7805_v8 = vadd.f32 %v2182_v47, %v7618_v42  ;;  %v7808_v36 = vadd.f32 %v2183_v9, %v7621_v7  ;;  %v9347_v3 = vld [vmem:[#allocation72_spill] sm:$0xff]  ;;  %v2252_v40 = vmul.f32 0.015719416, %v3025_v61 }
 0x1e7   :  { %v7811_v33 = vadd.f32 %v2184_v23, %v9347_v3  ;;  %v3037_v2 = vld [vmem:[%s8221_s0 + $0xf3] sm:$0xff]  ;;  %v3038_v51 = vld [vmem:[%s8221_s0 + $0xfb] sm:$0xff]  ;;  %v3039_v16 = vld [vmem:[%s8221_s0 + $0x10b] sm:$0xff]  ;;  %v2253_v34 = vmul.f32 0.015719416, %v3026_v60 }
 0x1e8   :  { %9345 = vst [vmem:[#allocation78_spill] sm:$0xff] %v7805_v8  ;;  %9346 = vst [vmem:[#allocation79_spill] sm:$0xff] %v7808_v36  ;;  %v9349_v42 = vld [vmem:[#allocation74_spill] sm:$0xff]  ;;  %v3040_v7 = vld [vmem:[%s8221_s0 + $0x113] sm:$0xff]  ;;  %v2254_v46 = vmul.f32 0.015719416, %v3027_v21 }
 0x1e9   :  { %9348 = vst [vmem:[#allocation80_spill] sm:$0xff] %v7811_v33  ;;  %v7823_v50 = vadd.f32 %v2185_v37, %v9349_v42  ;;  %v3041_v17 = vld [vmem:[%s8221_s0 + $0x123] sm:$0xff]  ;;  %v3042_v49 = vld [vmem:[%s8221_s0 + $0x12b] sm:$0xff]  ;;  %v3043_v54 = vld [vmem:[%s8221_s0 + $0x13b] sm:$0xff]  ;;  %v2255_v11 = vmul.f32 0.015719416, %v3028_v31 }
 0x1ea   :  { %v9351_v63 = vld [vmem:[#allocation26_spill] sm:$0xff]  ;;  %v3045_v25 = vld [vmem:[%s8221_s0 + $0x153] sm:$0xff]  ;;  %v2256_v47 = vmul.f32 0.015719416, %v3029_v4  ;;  %v2257_v9 = vmul.f32 0.015719416, %v3030_v20 }
 0x1eb   :  { %9350 = vst [vmem:[#allocation81_spill] sm:$0xff] %v7823_v50  ;;  %v7835_v6 = vadd.f32 %v2186_v56, %v9351_v63  ;;  %v3044_v59 = vld [vmem:[%s8221_s0 + $0x143] sm:$0xff]  ;;  %v3046_v0 = vld [vmem:[%s8221_s0 + $0x15b] sm:$0xff]  ;;  %v3047_v37 = vld [vmem:[%s8221_s0 + $0x16b] sm:$0xff]  ;;  %v2258_v61 = vmul.f32 0.015719416, %v3031_v14 }
 0x1ec   :  { %v9353_v28 = vld [vmem:[#allocation75_spill] sm:$0xff]  ;;  %v3048_v56 = vld [vmem:[%s8221_s0 + $0x173] sm:$0xff]  ;;  %v2259_v60 = vmul.f32 0.015719416, %v3032_v29  ;;  %v2260_v21 = vmul.f32 0.015719416, %v3033_v41  ;;  %v7883_v33 = vadd.f32 %v2256_v47, %v7699_v52 }
 0x1ed   :  { %9352 = vst [vmem:[#allocation83_spill] sm:$0xff] %v7835_v6  ;;  %v7847_v23 = vadd.f32 %v2187_v24, %v9353_v28  ;;  %v3051_v24 = vld [vmem:[%s8221_s0 + $0x19b] sm:$0xff]  ;;  %v2261_v31 = vmul.f32 0.015719416, %v3034_v18  ;;  %v2262_v4 = vmul.f32 0.015719416, %v3035_v35 }
 0x1ee   :  { %v2263_v20 = vmul.f32 0.015719416, %v3036_v58  ;;  %v9355_v3 = vld [vmem:[#allocation76_spill] sm:$0xff]  ;;  %v3052_v63 = vld [vmem:[%s8221_s0 + $0x1a3] sm:$0xff]  ;;  %v2264_v28 = vmul.f32 0.015719416, %v3037_v2  ;;  %v7896_v52 = vadd.f32 %v2259_v60, %v7711_v30 }
 0x1ef   :  { %9354 = vst [vmem:[#allocation10_spill] sm:$0xff] %v7847_v23  ;;  %v7862_v42 = vadd.f32 %v2252_v40, %v9355_v3  ;;  %v2265_v23 = vmul.f32 0.015719416, %v3038_v51  ;;  %v2266_v6 = vmul.f32 0.015719416, %v3039_v16  ;;  %v9357_v14 = vld [vmem:[#allocation77_spill] sm:$0xff]  ;;  %v7902_v47 = vadd.f32 %v2261_v31, %v7718_v55 }
 0x1f0   :  { %v7868_v29 = vadd.f32 %v2253_v34, %v9357_v14  ;;  %v3055_v41 = vld [vmem:[%s8221_s0 + $0x1cb] sm:$0xff]  ;;  %v3056_v18 = vld [vmem:[%s8221_s0 + $0x1d3] sm:$0xff]  ;;  %v2267_v35 = vmul.f32 0.015719416, %v3040_v7  ;;  %v2268_v58 = vmul.f32 0.015719416, %v3041_v17  ;;  %v7880_v34 = vadd.f32 %v2255_v11, %v7696_v38 }
 0x1f1   :  { %9356 = vst [vmem:[#allocation84_spill] sm:$0xff] %v7862_v42  ;;  %v2269_v40 = vmul.f32 0.015719416, %v3042_v49  ;;  %v9359_v3 = vld [vmem:[#allocation30_spill] sm:$0xff]  ;;  %v2270_v2 = vmul.f32 0.015719416, %v3043_v54  ;;  %v7893_v11 = vadd.f32 %v2258_v61, %v7707_v53  ;;  %v7911_v53 = vadd.f32 %v2264_v28, %v7727_v44 }
 0x1f2   :  { %9358 = vst [vmem:[#allocation85_spill] sm:$0xff] %v7868_v29  ;;  %v7877_v42 = vadd.f32 %v2254_v46, %v9359_v3  ;;  %v2271_v51 = vmul.f32 0.015719416, %v3044_v59  ;;  %v2272_v16 = vmul.f32 0.015719416, %v3045_v25  ;;  %v9360_v36 = vld [vmem:[#allocation42_spill] sm:$0xff]  ;;  %v7888_v46 = vadd.f32 %v2257_v9, %v7702_v10 }
 0x1f3   :  { %v2273_v14 = vmul.f32 0.015719416, %v3046_v0  ;;  %v2274_v29 = vmul.f32 0.015719416, %v3047_v37  ;;  %v2275_v50 = vmul.f32 0.015719416, %v3048_v56  ;;  %v7905_v10 = vadd.f32 %v2262_v4, %v7721_v43 }
 0x1f4   :  { %v2276_v8 = vmul.f32 0.015719416, %v9360_v36  ;;  %v9361_v7 = vld [vmem:[#allocation43_spill] sm:$0xff]  ;;  %v2278_v49 = vmul.f32 0.015719416, %v3051_v24  ;;  %v9362_v59 = vld [vmem:[#allocation46_spill] sm:$0xff]  ;;  %v7899_v36 = vadd.f32 %v2260_v21, %v7715_v5  ;;  %v7908_v9 = vadd.f32 %v2263_v20, %v7724_v27 }
 0x1f5   :  { %v2277_v17 = vmul.f32 0.015719416, %v9361_v7  ;;  %v2279_v54 = vmul.f32 0.015719416, %v3052_v63  ;;  %v2280_v25 = vmul.f32 0.015719416, %v9362_v59  ;;  %v7920_v55 = vadd.f32 %v2265_v23, %v7739_v22 }
 0x1f6   :  { %v9363_v3 = vld [vmem:[#allocation47_spill] sm:$0xff]  ;;  %v2282_v0 = vmul.f32 0.015719416, %v3055_v41  ;;  %v2283_v37 = vmul.f32 0.015719416, %v3056_v18  ;;  %v7923_v43 = vadd.f32 %v2266_v6, %v7742_v26  ;;  %v7926_v27 = vadd.f32 %v2267_v35, %v7745_v32  ;;  %v3059_v56 = vld [vmem:[%s8221_s0 + $0x7c] sm:$0xff] }
 0x1f7   :  { %v2281_v38 = vmul.f32 0.015719416, %v9363_v3  ;;  %v3057_v30 = vld [vmem:[%s8221_s0 + $0x64] sm:$0xff]  ;;  %v3058_v5 = vld [vmem:[%s8221_s0 + $0x6c] sm:$0xff]  ;;  %v7929_v44 = vadd.f32 %v2268_v58, %v7748_v13  ;;  %v3061_v22 = vld [vmem:[%s8221_s0 + $0x94] sm:$0xff]  ;;  %v7941_v26 = vadd.f32 %v2269_v40, %v7760_v1  ;;  %v7944_v32 = vadd.f32 %v2270_v2, %v7763_v12 }
 0x1f8   :  { %v3060_v61 = vld [vmem:[%s8221_s0 + $0x84] sm:$0xff]  ;;  %v7947_v13 = vadd.f32 %v2271_v51, %v7766_v39  ;;  %v7950_v6 = vadd.f32 %v2272_v16, %v7769_v45  ;;  %v3062_v23 = vld [vmem:[%s8221_s0 + $0x9c] sm:$0xff]  ;;  %v3063_v60 = vld [vmem:[%s8221_s0 + $0xac] sm:$0xff]  ;;  %v7962_v12 = vadd.f32 %v2273_v14, %v7781_v15  ;;  %v7965_v39 = vadd.f32 %v2274_v29, %v7784_v57 }
 0x1f9   :  { %v3064_v1 = vld [vmem:[%s8221_s0 + $0xb4] sm:$0xff]  ;;  %v7968_v45 = vadd.f32 %v2275_v50, %v7787_v48  ;;  %v7971_v21 = vadd.f32 %v2276_v8, %v7790_v62  ;;  %v3065_v24 = vld [vmem:[%s8221_s0 + $0xc4] sm:$0xff]  ;;  %v3066_v31 = vld [vmem:[%s8221_s0 + $0xcc] sm:$0xff]  ;;  %v7983_v57 = vadd.f32 %v2277_v17, %v7802_v19  ;;  %v2348_v51 = vmul.f32 0.008738643, %v3057_v30 }
 0x1fa   :  { %v3067_v15 = vld [vmem:[%s8221_s0 + $0xdc] sm:$0xff]  ;;  %v9369_v62 = vld [vmem:[#allocation79_spill] sm:$0xff]  ;;  %v9371_v4 = vld [vmem:[#allocation80_spill] sm:$0xff]  ;;  %v2349_v16 = vmul.f32 0.008738643, %v3058_v5 }
 0x1fb   :  { %9364 = vst [vmem:[#allocation88_spill] sm:$0xff] %v7968_v45  ;;  %9365 = vst [vmem:[#allocation91_spill] sm:$0xff] %v7971_v21  ;;  %v9367_v48 = vld [vmem:[#allocation78_spill] sm:$0xff]  ;;  %v7989_v8 = vadd.f32 %v2279_v54, %v9369_v62  ;;  %v7992_v20 = vadd.f32 %v2280_v25, %v9371_v4  ;;  %v3069_v28 = vld [vmem:[%s8221_s0 + $0xf4] sm:$0xff]  ;;  %v2350_v59 = vmul.f32 0.008738643, %v3059_v56 }
 0x1fc   :  { %9366 = vst [vmem:[#allocation92_spill] sm:$0xff] %v7983_v57  ;;  %v7986_v50 = vadd.f32 %v2278_v49, %v9367_v48  ;;  %v3068_v63 = vld [vmem:[%s8221_s0 + $0xe4] sm:$0xff]  ;;  %v3070_v19 = vld [vmem:[%s8221_s0 + $0xfc] sm:$0xff]  ;;  %v3071_v58 = vld [vmem:[%s8221_s0 + $0x10c] sm:$0xff]  ;;  %v2351_v25 = vmul.f32 0.008738643, %v3060_v61 }
 0x1fd   :  { %9370 = vst [vmem:[#allocation95_spill] sm:$0xff] %v7989_v8  ;;  %9372 = vst [vmem:[#allocation96_spill] sm:$0xff] %v7992_v20  ;;  %v9373_v29 = vld [vmem:[#allocation81_spill] sm:$0xff]  ;;  %v9375_v18 = vld [vmem:[#allocation83_spill] sm:$0xff]  ;;  %v2352_v3 = vmul.f32 0.008738643, %v3061_v22 }
 0x1fe   :  { %9368 = vst [vmem:[#allocation93_spill] sm:$0xff] %v7986_v50  ;;  %v8004_v41 = vadd.f32 %v2281_v38, %v9373_v29  ;;  %v8007_v35 = vadd.f32 %v2282_v0, %v9375_v18  ;;  %v3072_v40 = vld [vmem:[%s8221_s0 + $0x114] sm:$0xff]  ;;  %v3073_v2 = vld [vmem:[%s8221_s0 + $0x124] sm:$0xff]  ;;  %v3074_v17 = vld [vmem:[%s8221_s0 + $0x12c] sm:$0xff]  ;;  %v2353_v30 = vmul.f32 0.008738643, %v3062_v23 }
 0x1ff   :  { %v9377_v14 = vld [vmem:[#allocation10_spill] sm:$0xff]  ;;  %v3077_v38 = vld [vmem:[%s8221_s0 + $0x154] sm:$0xff]  ;;  %v2354_v5 = vmul.f32 0.008738643, %v3063_v60  ;;  %v2355_v48 = vmul.f32 0.008738643, %v3064_v1 }
 0x200   :  { %9374 = vst [vmem:[#allocation60_spill] sm:$0xff] %v8004_v41  ;;  %9376 = vst [vmem:[#allocation97_spill] sm:$0xff] %v8007_v35  ;;  %v8019_v7 = vadd.f32 %v2283_v37, %v9377_v14  ;;  %v3075_v49 = vld [vmem:[%s8221_s0 + $0x13c] sm:$0xff]  ;;  %v3076_v54 = vld [vmem:[%s8221_s0 + $0x144] sm:$0xff]  ;;  %v2356_v61 = vmul.f32 0.008738643, %v3065_v24  ;;  %v2385_v20 = vadd.f32 %v2353_v30, %v7888_v46 }
 0x201   :  { %v3078_v0 = vld [vmem:[%s8221_s0 + $0x15c] sm:$0xff]  ;;  %v3079_v37 = vld [vmem:[%s8221_s0 + $0x16c] sm:$0xff]  ;;  %v3080_v56 = vld [vmem:[%s8221_s0 + $0x174] sm:$0xff]  ;;  %v2357_v22 = vmul.f32 0.008738643, %v3066_v31 }
 0x202   :  { %9378 = vst [vmem:[#allocation98_spill] sm:$0xff] %v8019_v7  ;;  %v9379_v62 = vld [vmem:[#allocation84_spill] sm:$0xff]  ;;  %v2358_v29 = vmul.f32 0.008738643, %v3067_v15  ;;  %v9381_v18 = vld [vmem:[#allocation85_spill] sm:$0xff]  ;;  %v3084_v23 = vld [vmem:[%s8221_s0 + $0x1a4] sm:$0xff] }
 0x203   :  { %v8040_v4 = vadd.f32 %v2348_v51, %v9379_v62  ;;  %v2381_v14 = vadd.f32 %v2349_v16, %v9381_v18  ;;  %v3083_v7 = vld [vmem:[%s8221_s0 + $0x19c] sm:$0xff]  ;;  %v2359_v60 = vmul.f32 0.008738643, %v3068_v63  ;;  %v2360_v1 = vmul.f32 0.008738643, %v3069_v28  ;;  %v3087_v24 = vld [vmem:[%s8221_s0 + $0x1cc] sm:$0xff] }
 0x204   :  { %v2361_v51 = vmul.f32 0.008738643, %v3070_v19  ;;  %v2382_v62 = vadd.f32 %v2350_v59, %v7877_v42  ;;  %v3088_v31 = vld [vmem:[%s8221_s0 + $0x1d4] sm:$0xff]  ;;  %v2362_v15 = vmul.f32 0.008738643, %v3071_v58  ;;  %v2384_v28 = vadd.f32 %v2352_v3, %v7883_v33  ;;  %v9383_v21 = vld [vmem:[#allocation51_spill] sm:$0xff] }
 0x205   :  { %9380 = vst [vmem:[#allocation99_spill] sm:$0xff] %v8040_v4  ;;  %v2363_v16 = vmul.f32 0.008738643, %v3072_v40  ;;  %v2364_v18 = vmul.f32 0.008738643, %v3073_v2  ;;  %v2383_v4 = vadd.f32 %v2351_v25, %v7880_v34  ;;  %v9382_v50 = vld [vmem:[#allocation49_spill] sm:$0xff]  ;;  %v2386_v58 = vadd.f32 %v2354_v5, %v7893_v11 }
 0x206   :  { %v2365_v35 = vmul.f32 0.008738643, %v3074_v17  ;;  %v2366_v41 = vmul.f32 0.008738643, %v3075_v49  ;;  %v2367_v63 = vmul.f32 0.008738643, %v3076_v54  ;;  %v2387_v49 = vadd.f32 %v2355_v48, %v7896_v52 }
 0x207   :  { %v2368_v19 = vmul.f32 0.008738643, %v3077_v38  ;;  %v2369_v42 = vmul.f32 0.008738643, %v3078_v0  ;;  %v2370_v59 = vmul.f32 0.008738643, %v3079_v37  ;;  %v2388_v38 = vadd.f32 %v2356_v61, %v7899_v36 }
 0x208   :  { %v2371_v8 = vmul.f32 0.008738643, %v3080_v56  ;;  %v2372_v57 = vmul.f32 0.008738643, %v9382_v50  ;;  %v2373_v45 = vmul.f32 0.008738643, %v9383_v21  ;;  %v2389_v46 = vadd.f32 %v2357_v22, %v7902_v47 }
 0x209   :  { %v2374_v40 = vmul.f32 0.008738643, %v3083_v7  ;;  %v2375_v2 = vmul.f32 0.008738643, %v3084_v23  ;;  %v9384_v34 = vld [vmem:[#allocation52_spill] sm:$0xff]  ;;  %v9385_v54 = vld [vmem:[#allocation54_spill] sm:$0xff]  ;;  %v2390_v50 = vadd.f32 %v2358_v29, %v7905_v10  ;;  %v2391_v21 = vadd.f32 %v2359_v60, %v7908_v9 }
 0x20a   :  { %v2376_v17 = vmul.f32 0.008738643, %v9384_v34  ;;  %v2377_v33 = vmul.f32 0.008738643, %v9385_v54  ;;  %v2378_v25 = vmul.f32 0.008738643, %v3087_v24  ;;  %v2392_v11 = vadd.f32 %v2360_v1, %v7911_v53 }
 0x20b   :  { %v2379_v3 = vmul.f32 0.008738643, %v3088_v31  ;;  %v2393_v7 = vadd.f32 %v2361_v51, %v7920_v55  ;;  %v2394_v0 = vadd.f32 %v2362_v15, %v7923_v43  ;;  %v2395_v52 = vadd.f32 %v2363_v16, %v7926_v27  ;;  %v9386_v5 = vld [vmem:[#allocation88_spill] sm:$0xff]  ;;  %v9387_v48 = vld [vmem:[#allocation91_spill] sm:$0xff]  ;;  %v9389_v61 = vld [vmem:[#allocation93_spill] sm:$0xff]  ;;  %2414 = vst.msk [vmem:[%s8222_s1 + $0x8] sm:$0xff] %vm2412_vm0, %v2381_v14 }
 0x20c   :  { %v2396_v37 = vadd.f32 %v2364_v18, %v7929_v44  ;;  %v2397_v30 = vadd.f32 %v2365_v35, %v7941_v26  ;;  %v2398_v36 = vadd.f32 %v2366_v41, %v7944_v32  ;;  %v2399_v47 = vadd.f32 %v2367_v63, %v7947_v13  ;;  %v9388_v56 = vld [vmem:[#allocation92_spill] sm:$0xff]  ;;  %v9390_v22 = vld [vmem:[#allocation95_spill] sm:$0xff]  ;;  %v9393_v29 = vld [vmem:[#allocation97_spill] sm:$0xff]  ;;  %2415 = vst.msk [vmem:[%s8222_s1 + $0x10] sm:$0xff] %vm2412_vm0, %v2382_v62 }
 0x20d   :  { %v2400_v10 = vadd.f32 %v2368_v19, %v7950_v6  ;;  %v2401_v9 = vadd.f32 %v2369_v42, %v7962_v12  ;;  %v2402_v53 = vadd.f32 %v2370_v59, %v7965_v39  ;;  %v2403_v55 = vadd.f32 %v2371_v8, %v9386_v5  ;;  %v9391_v35 = vld [vmem:[#allocation96_spill] sm:$0xff]  ;;  %v9394_v23 = vld [vmem:[#allocation98_spill] sm:$0xff]  ;;  %v9395_v39 = vld [vmem:[#allocation99_spill] sm:$0xff]  ;;  %2416 = vst.msk [vmem:[%s8222_s1 + $0x18] sm:$0xff] %vm2412_vm0, %v2383_v4 }
 0x20e   :  { %v2404_v43 = vadd.f32 %v2372_v57, %v9387_v48  ;;  %v2405_v27 = vadd.f32 %v2373_v45, %v9388_v56  ;;  %v2406_v44 = vadd.f32 %v2374_v40, %v9389_v61  ;;  %v2407_v26 = vadd.f32 %v2375_v2, %v9390_v22  ;;  %v9392_v41 = vld [vmem:[#allocation60_spill] sm:$0xff]  ;;  %2413 = vst.msk [vmem:[%s8222_s1] sm:$0xff] %vm2412_vm0, %v9395_v39 }
 0x20f   :  { %v2408_v32 = vadd.f32 %v2376_v17, %v9391_v35  ;;  %v2409_v13 = vadd.f32 %v2377_v33, %v9392_v41  ;;  %v2410_v6 = vadd.f32 %v2378_v25, %v9393_v29  ;;  %v2411_v12 = vadd.f32 %v2379_v3, %v9394_v23  ;;  %2417 = vst.msk [vmem:[%s8222_s1 + $0x20] sm:$0xff] %vm2412_vm0, %v2384_v28 }
 0x210   :  { %2418 = vst.msk [vmem:[%s8222_s1 + $0x28] sm:$0xff] %vm2412_vm0, %v2385_v20  ;;  %2419 = vst.msk [vmem:[%s8222_s1 + $0x30] sm:$0xff] %vm2412_vm0, %v2386_v58 }
 0x211   :  { %2420 = vst.msk [vmem:[%s8222_s1 + $0x38] sm:$0xff] %vm2412_vm0, %v2387_v49  ;;  %2421 = vst.msk [vmem:[%s8222_s1 + $0x40] sm:$0xff] %vm2412_vm0, %v2388_v38 }
 0x212   :  { %2422 = vst.msk [vmem:[%s8222_s1 + $0x48] sm:$0xff] %vm2412_vm0, %v2389_v46  ;;  %2423 = vst.msk [vmem:[%s8222_s1 + $0x50] sm:$0xff] %vm2412_vm0, %v2390_v50 }
 0x213   :  { %2424 = vst.msk [vmem:[%s8222_s1 + $0x58] sm:$0xff] %vm2412_vm0, %v2391_v21  ;;  %2425 = vst.msk [vmem:[%s8222_s1 + $0x60] sm:$0xff] %vm2412_vm0, %v2392_v11 }
 0x214   :  { %2426 = vst.msk [vmem:[%s8222_s1 + $0x68] sm:$0xff] %vm2412_vm0, %v2393_v7  ;;  %2427 = vst.msk [vmem:[%s8222_s1 + $0x70] sm:$0xff] %vm2412_vm0, %v2394_v0 }
 0x215   :  { %2428 = vst.msk [vmem:[%s8222_s1 + $0x78] sm:$0xff] %vm2412_vm0, %v2395_v52  ;;  %2429 = vst.msk [vmem:[%s8222_s1 + $0x80] sm:$0xff] %vm2412_vm0, %v2396_v37 }
 0x216   :  { %2430 = vst.msk [vmem:[%s8222_s1 + $0x88] sm:$0xff] %vm2412_vm0, %v2397_v30  ;;  %2431 = vst.msk [vmem:[%s8222_s1 + $0x90] sm:$0xff] %vm2412_vm0, %v2398_v36 }
 0x217   :  { %2432 = vst.msk [vmem:[%s8222_s1 + $0x98] sm:$0xff] %vm2412_vm0, %v2399_v47  ;;  %2433 = vst.msk [vmem:[%s8222_s1 + $0xa0] sm:$0xff] %vm2412_vm0, %v2400_v10 }
 0x218   :  { %2434 = vst.msk [vmem:[%s8222_s1 + $0xa8] sm:$0xff] %vm2412_vm0, %v2401_v9  ;;  %2435 = vst.msk [vmem:[%s8222_s1 + $0xb0] sm:$0xff] %vm2412_vm0, %v2402_v53 }
 0x219   :  { %2436 = vst.msk [vmem:[%s8222_s1 + $0xb8] sm:$0xff] %vm2412_vm0, %v2403_v55  ;;  %2437 = vst.msk [vmem:[%s8222_s1 + $0xc0] sm:$0xff] %vm2412_vm0, %v2404_v43 }
 0x21a   :  { %2438 = vst.msk [vmem:[%s8222_s1 + $0xc8] sm:$0xff] %vm2412_vm0, %v2405_v27  ;;  %2439 = vst.msk [vmem:[%s8222_s1 + $0xd0] sm:$0xff] %vm2412_vm0, %v2406_v44 }
 0x21b   :  { %2440 = vst.msk [vmem:[%s8222_s1 + $0xd8] sm:$0xff] %vm2412_vm0, %v2407_v26  ;;  %2441 = vst.msk [vmem:[%s8222_s1 + $0xe0] sm:$0xff] %vm2412_vm0, %v2408_v32 }
 0x21c   :  { %2442 = vst.msk [vmem:[%s8222_s1 + $0xe8] sm:$0xff] %vm2412_vm0, %v2409_v13  ;;  %2443 = vst.msk [vmem:[%s8222_s1 + $0xf0] sm:$0xff] %vm2412_vm0, %v2410_v6 }
 0x21d   :  { %2444 = vst.msk [vmem:[%s8222_s1 + $0xf8] sm:$0xff] %vm2412_vm0, %v2411_v12 }

</bundles_post_ra>
